<compile_context>
chip_gen: v7x
topology: tpu7x:2x2x1
jax: 0.10.0
libtpu: 0.0.40
codegen_flags: <defaults>
</compile_context>

<pallas_src>
import functools

import jax
import jax.numpy as jnp
from jax import lax
from jax.experimental import pallas as pl
from jax.experimental.pallas import tpu as pltpu

EPS = 1e-5       # nn.BatchNorm2d default
_PAD = 8         # sublane-aligned offset of the data region inside the padded buffer
                 # (left halo lives at columns _PAD-2, _PAD-1; write at _PAD is aligned)


# ----------------------------------------------------------------------------
# Fused Pallas kernel
# ----------------------------------------------------------------------------
def _vrelu_kernel(x_ref, w_ref, g_ref, b_ref, o_ref,
                  xpad_ref, xres_ref, psum_ref, psq_ref, *, keep_x):
    """Fused VReLU for one channel block.    grid = (C/CB, 3, N)

    x_ref   : (1, H, W, CB)        current batch element, current channel block
    w_ref   : (25, W, CB)          5x5 depthwise taps, pre-broadcast along W
    g_ref   : (1, CB)              BN gamma
    b_ref   : (1, CB)              BN beta
    o_ref   : (N, H, W, CB)        VMEM-resident across (phase, batch); holds the
                                   raw conv result in phases 0-1, final output after 2
    xpad_ref: (1, H+4, W+10, CB)   zero-padded staging buffer (scratch)
    xres_ref: (N, H, W, CB)        resident copy of x (scratch; dummy if keep_x=False)
    psum_ref: (1, CB)              running sum of conv output          (scratch)
    psq_ref : (1, CB)              running centered sum of squares     (scratch)
    """
    p = pl.program_id(1)
    bi = pl.program_id(2)

    nb, hh, ww, cb = o_ref.shape
    inv_cnt = 1.0 / float(nb * hh * ww)

    @pl.when((p == 0) & (bi == 0))
    def _init():
        # Halo stays zero (never rewritten); only the centre is rewritten per step.
        xpad_ref[...] = jnp.zeros_like(xpad_ref)
        psum_ref[...] = jnp.zeros_like(psum_ref)
        psq_ref[...] = jnp.zeros_like(psq_ref)

    # ---------------- phase 0: depthwise conv + per-channel sum ----------------
    @pl.when(p == 0)
    def _conv_and_sum():
        xv = x_ref[...]
        # Aligned (sublane offset 8) staging store into the padded buffer.
        xpad_ref[:, 2:2 + hh, _PAD:_PAD + ww, :] = xv
        if keep_x:
            xres_ref[pl.ds(bi, 1), :, :, :] = xv

        acc = jnp.zeros((1, hh, ww, cb), jnp.float32)
        # kx-outer / ky-inner: exactly one kx-shifted view live at a time,
        # loaded directly from the padded ref (5 sublane shifts per step total);
        # ky slices are leading-dim selects (free).  Weight loads are aligned
        # (W, CB) tiles — no in-kernel broadcast ops.
        for kx in range(5):
            xs = xpad_ref[:, :, _PAD - 2 + kx:_PAD - 2 + kx + ww, :]   # (1, H+4, W, CB)
            for ky in range(5):
                acc = acc + xs[:, ky:ky + hh, :, :] * w_ref[ky * 5 + kx]

        # Raw conv result stays VMEM-resident in the output block.
        o_ref[pl.ds(bi, 1), :, :, :] = acc
        # Fused reduction, H (VALU) first, then W (XLU sublane reduce).
        psum_ref[...] += jnp.sum(jnp.sum(acc, axis=1), axis=1)

    # ---------------- phase 1: centered sum of squares (two-pass var) ----------
    @pl.when(p == 1)
    def _centered_sq_sum():
        mu = psum_ref[...] * inv_cnt                         # (1, CB), recomputed (free)
        d = o_ref[pl.ds(bi, 1), :, :, :] - mu
        psq_ref[...] += jnp.sum(jnp.sum(d * d, axis=1), axis=1)

    # ---------------- phase 2: normalize + max ---------------------------------
    @pl.when(p == 2)
    def _normalize_and_max():
        mu = psum_ref[...] * inv_cnt
        var = psq_ref[...] * inv_cnt                         # biased batch variance
        scale = g_ref[...] * lax.rsqrt(var + EPS)
        shift = b_ref[...] - mu * scale                      # fold mu into the shift
        y = o_ref[pl.ds(bi, 1), :, :, :]
        if keep_x:
            xv = xres_ref[pl.ds(bi, 1), :, :, :]             # no extra HBM read of x
        else:
            xv = x_ref[...]
        o_ref[pl.ds(bi, 1), :, :, :] = jnp.maximum(xv, y * scale + shift)


# ----------------------------------------------------------------------------
# NHWC-native wrapper (no transposes — this is the fast path)
# ----------------------------------------------------------------------------
def vrelu_nhwc(x, conv_weight, bn_gamma, bn_beta):
    """VReLU forward: max(x, BN(depthwise_conv5x5(x))), batch-stat BN.

    x           : (N, H, W, C)  float32, NHWC (TPU-native; no layout transposes)
    conv_weight : (C, 1, 5, 5)  depthwise Conv2d weight (PyTorch layout)
    bn_gamma    : (C,)
    bn_beta     : (C,)
    """
    n, h, w, c = x.shape
    assert conv_weight.shape == (c, 1, 5, 5), conv_weight.shape

    # Lane-dense channel blocks: 128 when possible, otherwise the full C.
    cb = 128 if (c % 128 == 0) else c
    n_cblk = c // cb

    x = x.astype(jnp.float32)
    taps = jnp.transpose(conv_weight.astype(jnp.float32).reshape(c, 25), (1, 0))  # (25, C)
    # Pre-broadcast along W in the wrapper so the kernel does zero per-tap
    # broadcast_in_dim work (tiny HBM cost: 25*W*C*4 bytes).
    taps_b = jnp.broadcast_to(taps.reshape(25, 1, c), (25, w, c))
    gamma = bn_gamma.astype(jnp.float32).reshape(1, c)
    beta = bn_beta.astype(jnp.float32).reshape(1, c)

    # ---- VMEM budget: decide whether to keep x resident and set the limit ----
    f4 = 4
    blk_out = n * h * w * cb * f4                     # resident output block
    blk_x = h * w * cb * f4                           # one x block
    blk_w = 25 * w * cb * f4                          # weight block
    xpad_b = (h + 4) * (w + 10) * cb * f4             # padded staging scratch
    tmp_b = 4 * blk_x + (h + 4) * w * cb * f4         # acc + shifted view + headroom
    base = 2 * blk_out + 2 * blk_x + 2 * blk_w + xpad_b + tmp_b
    with_x = base + blk_out                           # + resident x copy (single-buffered)

    try:
        phys_vmem = int(pltpu.get_tpu_info().vmem_capacity_bytes)
    except Exception:
        phys_vmem = 64 * 2**20                        # conservative (v7x per-TC VMEM)
    cap = int(phys_vmem * 0.85)

    keep_x = with_x <= cap                            # drop extra HBM reads of x when it fits
    need = with_x if keep_x else base
    vmem_limit = int(min(max(need + (4 << 20), 32 << 20), cap))

    # x index_map: fetch a fresh block only in the phases that need it; in the
    # other phases the index collapses to a constant so Pallas issues no DMA.
    if keep_x:
        # need x only in phase 0:  p=0 -> bi ; p>=1 -> n-1 (constant, no refetch)
        x_index = lambda ci, p, bi: (jnp.minimum(bi + p * n, n - 1), 0, 0, ci)
    else:
        # need x in phases 0 and 2: p in {0,2} -> bi ; p=1 -> n-1 (constant)
        x_index = lambda ci, p, bi: (jnp.minimum(bi + (p % 2) * n, n - 1), 0, 0, ci)

    xres_shape = (n, h, w, cb) if keep_x else (1, 1, 8, 128)   # tiny dummy when unused

    grid_spec = pltpu.PrefetchScalarGridSpec(
        num_scalar_prefetch=0,
        grid=(n_cblk, 3, n),
        in_specs=[
            pl.BlockSpec((1, h, w, cb), x_index),
            pl.BlockSpec((25, w, cb), lambda ci, p, bi: (0, 0, ci)),
            pl.BlockSpec((1, cb), lambda ci, p, bi: (0, ci)),
            pl.BlockSpec((1, cb), lambda ci, p, bi: (0, ci)),
        ],
        out_specs=pl.BlockSpec((n, h, w, cb), lambda ci, p, bi: (0, 0, 0, ci)),
        scratch_shapes=[
            pltpu.VMEM((1, h + 4, w + 10, cb), jnp.float32),   # padded staging buffer
            pltpu.VMEM(xres_shape, jnp.float32),               # resident x (or dummy)
            pltpu.VMEM((1, cb), jnp.float32),                  # sum
            pltpu.VMEM((1, cb), jnp.float32),                  # centered sum of squares
        ],
    )

    return pl.pallas_call(
        functools.partial(_vrelu_kernel, keep_x=keep_x),
        out_shape=jax.ShapeDtypeStruct((n, h, w, c), jnp.float32),
        grid_spec=grid_spec,
        compiler_params=pltpu.CompilerParams(
            dimension_semantics=("parallel", "arbitrary", "arbitrary"),
            vmem_limit_bytes=vmem_limit),
    )(x, taps_b, gamma, beta)


# Thin PyTorch-layout (NCHW) convenience wrapper.  Prefer vrelu_nhwc: the two
# transposes here each add a full HBM read+write.
def vrelu_nchw(x_nchw, conv_weight, bn_gamma, bn_beta):
    x = jnp.transpose(x_nchw, (0, 2, 3, 1))
    out = vrelu_nhwc(x, conv_weight, bn_gamma, bn_beta)
    return jnp.transpose(out, (0, 3, 1, 2))


# ----------------------------------------------------------------------------
# Pure-JAX reference (mirrors PyTorch train-mode semantics, NHWC layout)
# ----------------------------------------------------------------------------
def vrelu_reference_nhwc(x, conv_weight, bn_gamma, bn_beta):
    n, h, w, c = x.shape
    xp = jnp.pad(x, ((0, 0), (2, 2), (2, 2), (0, 0)))
    taps = conv_weight.reshape(c, 25)
    y = jnp.zeros_like(x)
    for ky in range(5):
        for kx in range(5):
            y = y + xp[:, ky:ky + h, kx:kx + w, :] \
                * taps[:, ky * 5 + kx][None, None, None, :]
    mu = jnp.mean(y, axis=(0, 1, 2), keepdims=True)
    var = jnp.mean((y - mu) ** 2, axis=(0, 1, 2), keepdims=True)     # biased
    y_bn = (y - mu) * lax.rsqrt(var + EPS) * bn_gamma.reshape(1, 1, 1, c) \
        + bn_beta.reshape(1, 1, 1, c)
    return jnp.maximum(x, y_bn)


# ----------------------------------------------------------------------------
# Demo / self-check
# ----------------------------------------------------------------------------
if __name__ == "__main__":
    key = jax.random.PRNGKey(0)

    def make_params(case_key, n, c, h, w):
        k1, k2, k3, k4 = jax.random.split(case_key, 4)
        x = jax.random.normal(k1, (n, h, w, c), jnp.float32)
        conv_w = jax.random.normal(k2, (c, 1, 5, 5), jnp.float32) / 5.0
        gamma = 1.0 + 0.1 * jax.random.normal(k3, (c,), jnp.float32)
        beta = 0.1 * jax.random.normal(k4, (c,), jnp.float32)
        return x, conv_w, gamma, beta

    def run_case(case_key, n, c, h, w):
        x, conv_w, gamma, beta = make_params(case_key, n, c, h, w)
        out = jax.block_until_ready(jax.jit(vrelu_nhwc)(x, conv_w, gamma, beta))
        ref = jax.block_until_ready(jax.jit(vrelu_reference_nhwc)(x, conv_w, gamma, beta))
        assert out.shape == x.shape, out.shape
        assert bool(jnp.all(jnp.isfinite(out)))
        err = float(jnp.max(jnp.abs(out - ref)))
        assert err < 1e-4, f"max abs err {err}"

    k_a, k_b, k_c = jax.random.split(key, 3)
    run_case(k_a, n=2, c=128, h=16, w=16)   # single 128-wide channel block
    run_case(k_b, n=2, c=256, h=16, w=16)   # two channel blocks (exercises the grid)

    # PyTorch-layout (NCHW) convenience wrapper parity check at a tiny shape.
    x, conv_w, gamma, beta = make_params(k_c, n=2, c=128, h=8, w=8)
    x_nchw = jnp.transpose(x, (0, 3, 1, 2))
    out_nchw = jax.block_until_ready(jax.jit(vrelu_nchw)(x_nchw, conv_w, gamma, beta))
    ref_nchw = jnp.transpose(vrelu_reference_nhwc(x, conv_w, gamma, beta), (0, 3, 1, 2))
    assert float(jnp.max(jnp.abs(out_nchw - ref_nchw))) < 1e-4

    print("KERNEL_OK")
</pallas_src>

<mosaic_0001>
module attributes {stable_mosaic.version = 11 : i64} {
  func.func @_vrelu_kernel(%arg0: i32, %arg1: i32, %arg2: i32, %arg3: memref<1x16x16x128xf32, #tpu.memory_space<vmem>>, %arg4: memref<25x16x128xf32, #tpu.memory_space<vmem>>, %arg5: memref<1x128xf32, #tpu.memory_space<vmem>>, %arg6: memref<1x128xf32, #tpu.memory_space<vmem>>, %arg7: memref<2x16x16x128xf32, #tpu.memory_space<vmem>>, %arg8: memref<1x20x26x128xf32, #tpu.memory_space<vmem>>, %arg9: memref<2x16x16x128xf32, #tpu.memory_space<vmem>>, %arg10: memref<1x128xf32, #tpu.memory_space<vmem>>, %arg11: memref<1x128xf32, #tpu.memory_space<vmem>>) attributes {dimension_semantics = [#tpu.dimension_semantics<parallel>, #tpu.dimension_semantics<arbitrary>, #tpu.dimension_semantics<arbitrary>], iteration_bounds = array<i64: 1, 3, 2>, scalar_prefetch = 0 : i64, scratch_operands = 4 : i64, tpu.core_type = #tpu.core_type<tc>, window_params = [{transform_indices = @transform_0, window_bounds = array<i64: 1, 16, 16, 128>}, {transform_indices = @transform_1, window_bounds = array<i64: 25, 16, 128>}, {transform_indices = @transform_2, window_bounds = array<i64: 1, 128>}, {transform_indices = @transform_3, window_bounds = array<i64: 1, 128>}, {transform_indices = @transform_4, window_bounds = array<i64: 2, 16, 16, 128>}]} {
    %c0_i32 = arith.constant 0 : i32
    %0 = arith.cmpi eq, %arg1, %c0_i32 : i32
    %c0_i32_0 = arith.constant 0 : i32
    %1 = arith.cmpi eq, %arg2, %c0_i32_0 : i32
    %2 = arith.andi %0, %1 : i1
    %3 = arith.extui %2 : i1 to i32
    %c0_i32_1 = arith.constant 0 : i32
    %4 = arith.cmpi ne, %3, %c0_i32_1 : i32
    scf.if %4 {
      %cst = arith.constant 0.000000e+00 : f32
      %14 = vector.broadcast %cst : f32 to vector<1x20x26x128xf32>
      %c0 = arith.constant 0 : index
      %c0_6 = arith.constant 0 : index
      %c0_7 = arith.constant 0 : index
      %c0_8 = arith.constant 0 : index
      %15 = vector.load %arg8[%c0, %c0_6, %c0_7, %c0_8] : memref<1x20x26x128xf32, #tpu.memory_space<vmem>>, vector<1x20x26x128xf32>
      tpu.vector_store %arg8[%c0, %c0_6, %c0_7, %c0_8], %14 {strides = array<i32>} : memref<1x20x26x128xf32, #tpu.memory_space<vmem>>, vector<1x20x26x128xf32>,
      %cst_9 = arith.constant 0.000000e+00 : f32
      %16 = vector.broadcast %cst_9 : f32 to vector<1x128xf32>
      %c0_10 = arith.constant 0 : index
      %c0_11 = arith.constant 0 : index
      %17 = vector.load %arg10[%c0_10, %c0_11] : memref<1x128xf32, #tpu.memory_space<vmem>>, vector<1x128xf32>
      tpu.vector_store %arg10[%c0_10, %c0_11], %16 {strides = array<i32>} : memref<1x128xf32, #tpu.memory_space<vmem>>, vector<1x128xf32>,
      %cst_12 = arith.constant 0.000000e+00 : f32
      %18 = vector.broadcast %cst_12 : f32 to vector<1x128xf32>
      %c0_13 = arith.constant 0 : index
      %c0_14 = arith.constant 0 : index
      %19 = vector.load %arg11[%c0_13, %c0_14] : memref<1x128xf32, #tpu.memory_space<vmem>>, vector<1x128xf32>
      tpu.vector_store %arg11[%c0_13, %c0_14], %18 {strides = array<i32>} : memref<1x128xf32, #tpu.memory_space<vmem>>, vector<1x128xf32>,
    } else {
    }
    %c0_i32_2 = arith.constant 0 : i32
    %5 = arith.cmpi eq, %arg1, %c0_i32_2 : i32
    %6 = arith.extui %5 : i1 to i32
    %c0_i32_3 = arith.constant 0 : i32
    %7 = arith.cmpi ne, %6, %c0_i32_3 : i32
    scf.if %7 {
      %c0 = arith.constant 0 : index
      %c0_6 = arith.constant 0 : index
      %c0_7 = arith.constant 0 : index
      %c0_8 = arith.constant 0 : index
      %14 = vector.load %arg3[%c0, %c0_6, %c0_7, %c0_8] : memref<1x16x16x128xf32, #tpu.memory_space<vmem>>, vector<1x16x16x128xf32>
      %c0_9 = arith.constant 0 : index
      %c2 = arith.constant 2 : index
      %c8 = arith.constant 8 : index
      %c0_10 = arith.constant 0 : index
      %15 = vector.load %arg8[%c0_9, %c2, %c8, %c0_10] : memref<1x20x26x128xf32, #tpu.memory_space<vmem>>, vector<1x16x16x128xf32>
      tpu.vector_store %arg8[%c0_9, %c2, %c8, %c0_10], %14 {strides = array<i32>} : memref<1x20x26x128xf32, #tpu.memory_space<vmem>>, vector<1x16x16x128xf32>,
      %16 = arith.index_cast %arg2 : i32 to index
      %c0_11 = arith.constant 0 : index
      %c0_12 = arith.constant 0 : index
      %c0_13 = arith.constant 0 : index
      %17 = vector.load %arg9[%16, %c0_11, %c0_12, %c0_13] : memref<2x16x16x128xf32, #tpu.memory_space<vmem>>, vector<1x16x16x128xf32>
      tpu.vector_store %arg9[%16, %c0_11, %c0_12, %c0_13], %14 {strides = array<i32>} : memref<2x16x16x128xf32, #tpu.memory_space<vmem>>, vector<1x16x16x128xf32>,
      %cst = arith.constant 0.000000e+00 : f32
      %18 = vector.broadcast %cst : f32 to vector<1x16x16x128xf32>
      %c0_14 = arith.constant 0 : index
      %c0_15 = arith.constant 0 : index
      %c6 = arith.constant 6 : index
      %c0_16 = arith.constant 0 : index
      %19 = vector.load %arg8[%c0_14, %c0_15, %c6, %c0_16] : memref<1x20x26x128xf32, #tpu.memory_space<vmem>>, vector<1x20x16x128xf32>
      %20 = vector.extract_strided_slice %19 {offsets = [0, 0, 0, 0], sizes = [1, 16, 16, 128], strides = [1, 1, 1, 1]} : vector<1x20x16x128xf32> to vector<1x16x16x128xf32>
      %c0_17 = arith.constant 0 : index
      %c0_18 = arith.constant 0 : index
      %c0_19 = arith.constant 0 : index
      %21 = vector.load %arg4[%c0_17, %c0_18, %c0_19] : memref<25x16x128xf32, #tpu.memory_space<vmem>>, vector<1x16x128xf32>
      %22 = vector.shape_cast %21 : vector<1x16x128xf32> to vector<16x128xf32>
      %23 = vector.shape_cast %22 : vector<16x128xf32> to vector<1x1x16x128xf32>
      %24 = vector.broadcast %23 : vector<1x1x16x128xf32> to vector<1x16x16x128xf32>
      %25 = arith.mulf %20, %24 : vector<1x16x16x128xf32>
      %26 = arith.addf %18, %25 : vector<1x16x16x128xf32>
      %27 = vector.extract_strided_slice %19 {offsets = [0, 1, 0, 0], sizes = [1, 16, 16, 128], strides = [1, 1, 1, 1]} : vector<1x20x16x128xf32> to vector<1x16x16x128xf32>
      %c5 = arith.constant 5 : index
      %c0_20 = arith.constant 0 : index
      %c0_21 = arith.constant 0 : index
      %28 = vector.load %arg4[%c5, %c0_20, %c0_21] : memref<25x16x128xf32, #tpu.memory_space<vmem>>, vector<1x16x128xf32>
      %29 = vector.shape_cast %28 : vector<1x16x128xf32> to vector<16x128xf32>
      %30 = vector.shape_cast %29 : vector<16x128xf32> to vector<1x1x16x128xf32>
      %31 = vector.broadcast %30 : vector<1x1x16x128xf32> to vector<1x16x16x128xf32>
      %32 = arith.mulf %27, %31 : vector<1x16x16x128xf32>
      %33 = arith.addf %26, %32 : vector<1x16x16x128xf32>
      %34 = vector.extract_strided_slice %19 {offsets = [0, 2, 0, 0], sizes = [1, 16, 16, 128], strides = [1, 1, 1, 1]} : vector<1x20x16x128xf32> to vector<1x16x16x128xf32>
      %c10 = arith.constant 10 : index
      %c0_22 = arith.constant 0 : index
      %c0_23 = arith.constant 0 : index
      %35 = vector.load %arg4[%c10, %c0_22, %c0_23] : memref<25x16x128xf32, #tpu.memory_space<vmem>>, vector<1x16x128xf32>
      %36 = vector.shape_cast %35 : vector<1x16x128xf32> to vector<16x128xf32>
      %37 = vector.shape_cast %36 : vector<16x128xf32> to vector<1x1x16x128xf32>
      %38 = vector.broadcast %37 : vector<1x1x16x128xf32> to vector<1x16x16x128xf32>
      %39 = arith.mulf %34, %38 : vector<1x16x16x128xf32>
      %40 = arith.addf %33, %39 : vector<1x16x16x128xf32>
      %41 = vector.extract_strided_slice %19 {offsets = [0, 3, 0, 0], sizes = [1, 16, 16, 128], strides = [1, 1, 1, 1]} : vector<1x20x16x128xf32> to vector<1x16x16x128xf32>
      %c15 = arith.constant 15 : index
      %c0_24 = arith.constant 0 : index
      %c0_25 = arith.constant 0 : index
      %42 = vector.load %arg4[%c15, %c0_24, %c0_25] : memref<25x16x128xf32, #tpu.memory_space<vmem>>, vector<1x16x128xf32>
      %43 = vector.shape_cast %42 : vector<1x16x128xf32> to vector<16x128xf32>
      %44 = vector.shape_cast %43 : vector<16x128xf32> to vector<1x1x16x128xf32>
      %45 = vector.broadcast %44 : vector<1x1x16x128xf32> to vector<1x16x16x128xf32>
      %46 = arith.mulf %41, %45 : vector<1x16x16x128xf32>
      %47 = arith.addf %40, %46 : vector<1x16x16x128xf32>
      %48 = vector.extract_strided_slice %19 {offsets = [0, 4, 0, 0], sizes = [1, 16, 16, 128], strides = [1, 1, 1, 1]} : vector<1x20x16x128xf32> to vector<1x16x16x128xf32>
      %c20 = arith.constant 20 : index
      %c0_26 = arith.constant 0 : index
      %c0_27 = arith.constant 0 : index
      %49 = vector.load %arg4[%c20, %c0_26, %c0_27] : memref<25x16x128xf32, #tpu.memory_space<vmem>>, vector<1x16x128xf32>
      %50 = vector.shape_cast %49 : vector<1x16x128xf32> to vector<16x128xf32>
      %51 = vector.shape_cast %50 : vector<16x128xf32> to vector<1x1x16x128xf32>
      %52 = vector.broadcast %51 : vector<1x1x16x128xf32> to vector<1x16x16x128xf32>
      %53 = arith.mulf %48, %52 : vector<1x16x16x128xf32>
      %54 = arith.addf %47, %53 : vector<1x16x16x128xf32>
      %c0_28 = arith.constant 0 : index
      %c0_29 = arith.constant 0 : index
      %c7 = arith.constant 7 : index
      %c0_30 = arith.constant 0 : index
      %55 = vector.load %arg8[%c0_28, %c0_29, %c7, %c0_30] : memref<1x20x26x128xf32, #tpu.memory_space<vmem>>, vector<1x20x16x128xf32>
      %56 = vector.extract_strided_slice %55 {offsets = [0, 0, 0, 0], sizes = [1, 16, 16, 128], strides = [1, 1, 1, 1]} : vector<1x20x16x128xf32> to vector<1x16x16x128xf32>
      %c1 = arith.constant 1 : index
      %c0_31 = arith.constant 0 : index
      %c0_32 = arith.constant 0 : index
      %57 = vector.load %arg4[%c1, %c0_31, %c0_32] : memref<25x16x128xf32, #tpu.memory_space<vmem>>, vector<1x16x128xf32>
      %58 = vector.shape_cast %57 : vector<1x16x128xf32> to vector<16x128xf32>
      %59 = vector.shape_cast %58 : vector<16x128xf32> to vector<1x1x16x128xf32>
      %60 = vector.broadcast %59 : vector<1x1x16x128xf32> to vector<1x16x16x128xf32>
      %61 = arith.mulf %56, %60 : vector<1x16x16x128xf32>
      %62 = arith.addf %54, %61 : vector<1x16x16x128xf32>
      %63 = vector.extract_strided_slice %55 {offsets = [0, 1, 0, 0], sizes = [1, 16, 16, 128], strides = [1, 1, 1, 1]} : vector<1x20x16x128xf32> to vector<1x16x16x128xf32>
      %c6_33 = arith.constant 6 : index
      %c0_34 = arith.constant 0 : index
      %c0_35 = arith.constant 0 : index
      %64 = vector.load %arg4[%c6_33, %c0_34, %c0_35] : memref<25x16x128xf32, #tpu.memory_space<vmem>>, vector<1x16x128xf32>
      %65 = vector.shape_cast %64 : vector<1x16x128xf32> to vector<16x128xf32>
      %66 = vector.shape_cast %65 : vector<16x128xf32> to vector<1x1x16x128xf32>
      %67 = vector.broadcast %66 : vector<1x1x16x128xf32> to vector<1x16x16x128xf32>
      %68 = arith.mulf %63, %67 : vector<1x16x16x128xf32>
      %69 = arith.addf %62, %68 : vector<1x16x16x128xf32>
      %70 = vector.extract_strided_slice %55 {offsets = [0, 2, 0, 0], sizes = [1, 16, 16, 128], strides = [1, 1, 1, 1]} : vector<1x20x16x128xf32> to vector<1x16x16x128xf32>
      %c11 = arith.constant 11 : index
      %c0_36 = arith.constant 0 : index
      %c0_37 = arith.constant 0 : index
      %71 = vector.load %arg4[%c11, %c0_36, %c0_37] : memref<25x16x128xf32, #tpu.memory_space<vmem>>, vector<1x16x128xf32>
      %72 = vector.shape_cast %71 : vector<1x16x128xf32> to vector<16x128xf32>
      %73 = vector.shape_cast %72 : vector<16x128xf32> to vector<1x1x16x128xf32>
      %74 = vector.broadcast %73 : vector<1x1x16x128xf32> to vector<1x16x16x128xf32>
      %75 = arith.mulf %70, %74 : vector<1x16x16x128xf32>
      %76 = arith.addf %69, %75 : vector<1x16x16x128xf32>
      %77 = vector.extract_strided_slice %55 {offsets = [0, 3, 0, 0], sizes = [1, 16, 16, 128], strides = [1, 1, 1, 1]} : vector<1x20x16x128xf32> to vector<1x16x16x128xf32>
      %c16 = arith.constant 16 : index
      %c0_38 = arith.constant 0 : index
      %c0_39 = arith.constant 0 : index
      %78 = vector.load %arg4[%c16, %c0_38, %c0_39] : memref<25x16x128xf32, #tpu.memory_space<vmem>>, vector<1x16x128xf32>
      %79 = vector.shape_cast %78 : vector<1x16x128xf32> to vector<16x128xf32>
      %80 = vector.shape_cast %79 : vector<16x128xf32> to vector<1x1x16x128xf32>
      %81 = vector.broadcast %80 : vector<1x1x16x128xf32> to vector<1x16x16x128xf32>
      %82 = arith.mulf %77, %81 : vector<1x16x16x128xf32>
      %83 = arith.addf %76, %82 : vector<1x16x16x128xf32>
      %84 = vector.extract_strided_slice %55 {offsets = [0, 4, 0, 0], sizes = [1, 16, 16, 128], strides = [1, 1, 1, 1]} : vector<1x20x16x128xf32> to vector<1x16x16x128xf32>
      %c21 = arith.constant 21 : index
      %c0_40 = arith.constant 0 : index
      %c0_41 = arith.constant 0 : index
      %85 = vector.load %arg4[%c21, %c0_40, %c0_41] : memref<25x16x128xf32, #tpu.memory_space<vmem>>, vector<1x16x128xf32>
      %86 = vector.shape_cast %85 : vector<1x16x128xf32> to vector<16x128xf32>
      %87 = vector.shape_cast %86 : vector<16x128xf32> to vector<1x1x16x128xf32>
      %88 = vector.broadcast %87 : vector<1x1x16x128xf32> to vector<1x16x16x128xf32>
      %89 = arith.mulf %84, %88 : vector<1x16x16x128xf32>
      %90 = arith.addf %83, %89 : vector<1x16x16x128xf32>
      %c0_42 = arith.constant 0 : index
      %c0_43 = arith.constant 0 : index
      %c8_44 = arith.constant 8 : index
      %c0_45 = arith.constant 0 : index
      %91 = vector.load %arg8[%c0_42, %c0_43, %c8_44, %c0_45] : memref<1x20x26x128xf32, #tpu.memory_space<vmem>>, vector<1x20x16x128xf32>
      %92 = vector.extract_strided_slice %91 {offsets = [0, 0, 0, 0], sizes = [1, 16, 16, 128], strides = [1, 1, 1, 1]} : vector<1x20x16x128xf32> to vector<1x16x16x128xf32>
      %c2_46 = arith.constant 2 : index
      %c0_47 = arith.constant 0 : index
      %c0_48 = arith.constant 0 : index
      %93 = vector.load %arg4[%c2_46, %c0_47, %c0_48] : memref<25x16x128xf32, #tpu.memory_space<vmem>>, vector<1x16x128xf32>
      %94 = vector.shape_cast %93 : vector<1x16x128xf32> to vector<16x128xf32>
      %95 = vector.shape_cast %94 : vector<16x128xf32> to vector<1x1x16x128xf32>
      %96 = vector.broadcast %95 : vector<1x1x16x128xf32> to vector<1x16x16x128xf32>
      %97 = arith.mulf %92, %96 : vector<1x16x16x128xf32>
      %98 = arith.addf %90, %97 : vector<1x16x16x128xf32>
      %99 = vector.extract_strided_slice %91 {offsets = [0, 1, 0, 0], sizes = [1, 16, 16, 128], strides = [1, 1, 1, 1]} : vector<1x20x16x128xf32> to vector<1x16x16x128xf32>
      %c7_49 = arith.constant 7 : index
      %c0_50 = arith.constant 0 : index
      %c0_51 = arith.constant 0 : index
      %100 = vector.load %arg4[%c7_49, %c0_50, %c0_51] : memref<25x16x128xf32, #tpu.memory_space<vmem>>, vector<1x16x128xf32>
      %101 = vector.shape_cast %100 : vector<1x16x128xf32> to vector<16x128xf32>
      %102 = vector.shape_cast %101 : vector<16x128xf32> to vector<1x1x16x128xf32>
      %103 = vector.broadcast %102 : vector<1x1x16x128xf32> to vector<1x16x16x128xf32>
      %104 = arith.mulf %99, %103 : vector<1x16x16x128xf32>
      %105 = arith.addf %98, %104 : vector<1x16x16x128xf32>
      %106 = vector.extract_strided_slice %91 {offsets = [0, 2, 0, 0], sizes = [1, 16, 16, 128], strides = [1, 1, 1, 1]} : vector<1x20x16x128xf32> to vector<1x16x16x128xf32>
      %c12 = arith.constant 12 : index
      %c0_52 = arith.constant 0 : index
      %c0_53 = arith.constant 0 : index
      %107 = vector.load %arg4[%c12, %c0_52, %c0_53] : memref<25x16x128xf32, #tpu.memory_space<vmem>>, vector<1x16x128xf32>
      %108 = vector.shape_cast %107 : vector<1x16x128xf32> to vector<16x128xf32>
      %109 = vector.shape_cast %108 : vector<16x128xf32> to vector<1x1x16x128xf32>
      %110 = vector.broadcast %109 : vector<1x1x16x128xf32> to vector<1x16x16x128xf32>
      %111 = arith.mulf %106, %110 : vector<1x16x16x128xf32>
      %112 = arith.addf %105, %111 : vector<1x16x16x128xf32>
      %113 = vector.extract_strided_slice %91 {offsets = [0, 3, 0, 0], sizes = [1, 16, 16, 128], strides = [1, 1, 1, 1]} : vector<1x20x16x128xf32> to vector<1x16x16x128xf32>
      %c17 = arith.constant 17 : index
      %c0_54 = arith.constant 0 : index
      %c0_55 = arith.constant 0 : index
      %114 = vector.load %arg4[%c17, %c0_54, %c0_55] : memref<25x16x128xf32, #tpu.memory_space<vmem>>, vector<1x16x128xf32>
      %115 = vector.shape_cast %114 : vector<1x16x128xf32> to vector<16x128xf32>
      %116 = vector.shape_cast %115 : vector<16x128xf32> to vector<1x1x16x128xf32>
      %117 = vector.broadcast %116 : vector<1x1x16x128xf32> to vector<1x16x16x128xf32>
      %118 = arith.mulf %113, %117 : vector<1x16x16x128xf32>
      %119 = arith.addf %112, %118 : vector<1x16x16x128xf32>
      %120 = vector.extract_strided_slice %91 {offsets = [0, 4, 0, 0], sizes = [1, 16, 16, 128], strides = [1, 1, 1, 1]} : vector<1x20x16x128xf32> to vector<1x16x16x128xf32>
      %c22 = arith.constant 22 : index
      %c0_56 = arith.constant 0 : index
      %c0_57 = arith.constant 0 : index
      %121 = vector.load %arg4[%c22, %c0_56, %c0_57] : memref<25x16x128xf32, #tpu.memory_space<vmem>>, vector<1x16x128xf32>
      %122 = vector.shape_cast %121 : vector<1x16x128xf32> to vector<16x128xf32>
      %123 = vector.shape_cast %122 : vector<16x128xf32> to vector<1x1x16x128xf32>
      %124 = vector.broadcast %123 : vector<1x1x16x128xf32> to vector<1x16x16x128xf32>
      %125 = arith.mulf %120, %124 : vector<1x16x16x128xf32>
      %126 = arith.addf %119, %125 : vector<1x16x16x128xf32>
      %c0_58 = arith.constant 0 : index
      %c0_59 = arith.constant 0 : index
      %c9 = arith.constant 9 : index
      %c0_60 = arith.constant 0 : index
      %127 = vector.load %arg8[%c0_58, %c0_59, %c9, %c0_60] : memref<1x20x26x128xf32, #tpu.memory_space<vmem>>, vector<1x20x16x128xf32>
      %128 = vector.extract_strided_slice %127 {offsets = [0, 0, 0, 0], sizes = [1, 16, 16, 128], strides = [1, 1, 1, 1]} : vector<1x20x16x128xf32> to vector<1x16x16x128xf32>
      %c3 = arith.constant 3 : index
      %c0_61 = arith.constant 0 : index
      %c0_62 = arith.constant 0 : index
      %129 = vector.load %arg4[%c3, %c0_61, %c0_62] : memref<25x16x128xf32, #tpu.memory_space<vmem>>, vector<1x16x128xf32>
      %130 = vector.shape_cast %129 : vector<1x16x128xf32> to vector<16x128xf32>
      %131 = vector.shape_cast %130 : vector<16x128xf32> to vector<1x1x16x128xf32>
      %132 = vector.broadcast %131 : vector<1x1x16x128xf32> to vector<1x16x16x128xf32>
      %133 = arith.mulf %128, %132 : vector<1x16x16x128xf32>
      %134 = arith.addf %126, %133 : vector<1x16x16x128xf32>
      %135 = vector.extract_strided_slice %127 {offsets = [0, 1, 0, 0], sizes = [1, 16, 16, 128], strides = [1, 1, 1, 1]} : vector<1x20x16x128xf32> to vector<1x16x16x128xf32>
      %c8_63 = arith.constant 8 : index
      %c0_64 = arith.constant 0 : index
      %c0_65 = arith.constant 0 : index
      %136 = vector.load %arg4[%c8_63, %c0_64, %c0_65] : memref<25x16x128xf32, #tpu.memory_space<vmem>>, vector<1x16x128xf32>
      %137 = vector.shape_cast %136 : vector<1x16x128xf32> to vector<16x128xf32>
      %138 = vector.shape_cast %137 : vector<16x128xf32> to vector<1x1x16x128xf32>
      %139 = vector.broadcast %138 : vector<1x1x16x128xf32> to vector<1x16x16x128xf32>
      %140 = arith.mulf %135, %139 : vector<1x16x16x128xf32>
      %141 = arith.addf %134, %140 : vector<1x16x16x128xf32>
      %142 = vector.extract_strided_slice %127 {offsets = [0, 2, 0, 0], sizes = [1, 16, 16, 128], strides = [1, 1, 1, 1]} : vector<1x20x16x128xf32> to vector<1x16x16x128xf32>
      %c13 = arith.constant 13 : index
      %c0_66 = arith.constant 0 : index
      %c0_67 = arith.constant 0 : index
      %143 = vector.load %arg4[%c13, %c0_66, %c0_67] : memref<25x16x128xf32, #tpu.memory_space<vmem>>, vector<1x16x128xf32>
      %144 = vector.shape_cast %143 : vector<1x16x128xf32> to vector<16x128xf32>
      %145 = vector.shape_cast %144 : vector<16x128xf32> to vector<1x1x16x128xf32>
      %146 = vector.broadcast %145 : vector<1x1x16x128xf32> to vector<1x16x16x128xf32>
      %147 = arith.mulf %142, %146 : vector<1x16x16x128xf32>
      %148 = arith.addf %141, %147 : vector<1x16x16x128xf32>
      %149 = vector.extract_strided_slice %127 {offsets = [0, 3, 0, 0], sizes = [1, 16, 16, 128], strides = [1, 1, 1, 1]} : vector<1x20x16x128xf32> to vector<1x16x16x128xf32>
      %c18 = arith.constant 18 : index
      %c0_68 = arith.constant 0 : index
      %c0_69 = arith.constant 0 : index
      %150 = vector.load %arg4[%c18, %c0_68, %c0_69] : memref<25x16x128xf32, #tpu.memory_space<vmem>>, vector<1x16x128xf32>
      %151 = vector.shape_cast %150 : vector<1x16x128xf32> to vector<16x128xf32>
      %152 = vector.shape_cast %151 : vector<16x128xf32> to vector<1x1x16x128xf32>
      %153 = vector.broadcast %152 : vector<1x1x16x128xf32> to vector<1x16x16x128xf32>
      %154 = arith.mulf %149, %153 : vector<1x16x16x128xf32>
      %155 = arith.addf %148, %154 : vector<1x16x16x128xf32>
      %156 = vector.extract_strided_slice %127 {offsets = [0, 4, 0, 0], sizes = [1, 16, 16, 128], strides = [1, 1, 1, 1]} : vector<1x20x16x128xf32> to vector<1x16x16x128xf32>
      %c23 = arith.constant 23 : index
      %c0_70 = arith.constant 0 : index
      %c0_71 = arith.constant 0 : index
      %157 = vector.load %arg4[%c23, %c0_70, %c0_71] : memref<25x16x128xf32, #tpu.memory_space<vmem>>, vector<1x16x128xf32>
      %158 = vector.shape_cast %157 : vector<1x16x128xf32> to vector<16x128xf32>
      %159 = vector.shape_cast %158 : vector<16x128xf32> to vector<1x1x16x128xf32>
      %160 = vector.broadcast %159 : vector<1x1x16x128xf32> to vector<1x16x16x128xf32>
      %161 = arith.mulf %156, %160 : vector<1x16x16x128xf32>
      %162 = arith.addf %155, %161 : vector<1x16x16x128xf32>
      %c0_72 = arith.constant 0 : index
      %c0_73 = arith.constant 0 : index
      %c10_74 = arith.constant 10 : index
      %c0_75 = arith.constant 0 : index
      %163 = vector.load %arg8[%c0_72, %c0_73, %c10_74, %c0_75] : memref<1x20x26x128xf32, #tpu.memory_space<vmem>>, vector<1x20x16x128xf32>
      %164 = vector.extract_strided_slice %163 {offsets = [0, 0, 0, 0], sizes = [1, 16, 16, 128], strides = [1, 1, 1, 1]} : vector<1x20x16x128xf32> to vector<1x16x16x128xf32>
      %c4 = arith.constant 4 : index
      %c0_76 = arith.constant 0 : index
      %c0_77 = arith.constant 0 : index
      %165 = vector.load %arg4[%c4, %c0_76, %c0_77] : memref<25x16x128xf32, #tpu.memory_space<vmem>>, vector<1x16x128xf32>
      %166 = vector.shape_cast %165 : vector<1x16x128xf32> to vector<16x128xf32>
      %167 = vector.shape_cast %166 : vector<16x128xf32> to vector<1x1x16x128xf32>
      %168 = vector.broadcast %167 : vector<1x1x16x128xf32> to vector<1x16x16x128xf32>
      %169 = arith.mulf %164, %168 : vector<1x16x16x128xf32>
      %170 = arith.addf %162, %169 : vector<1x16x16x128xf32>
      %171 = vector.extract_strided_slice %163 {offsets = [0, 1, 0, 0], sizes = [1, 16, 16, 128], strides = [1, 1, 1, 1]} : vector<1x20x16x128xf32> to vector<1x16x16x128xf32>
      %c9_78 = arith.constant 9 : index
      %c0_79 = arith.constant 0 : index
      %c0_80 = arith.constant 0 : index
      %172 = vector.load %arg4[%c9_78, %c0_79, %c0_80] : memref<25x16x128xf32, #tpu.memory_space<vmem>>, vector<1x16x128xf32>
      %173 = vector.shape_cast %172 : vector<1x16x128xf32> to vector<16x128xf32>
      %174 = vector.shape_cast %173 : vector<16x128xf32> to vector<1x1x16x128xf32>
      %175 = vector.broadcast %174 : vector<1x1x16x128xf32> to vector<1x16x16x128xf32>
      %176 = arith.mulf %171, %175 : vector<1x16x16x128xf32>
      %177 = arith.addf %170, %176 : vector<1x16x16x128xf32>
      %178 = vector.extract_strided_slice %163 {offsets = [0, 2, 0, 0], sizes = [1, 16, 16, 128], strides = [1, 1, 1, 1]} : vector<1x20x16x128xf32> to vector<1x16x16x128xf32>
      %c14 = arith.constant 14 : index
      %c0_81 = arith.constant 0 : index
      %c0_82 = arith.constant 0 : index
      %179 = vector.load %arg4[%c14, %c0_81, %c0_82] : memref<25x16x128xf32, #tpu.memory_space<vmem>>, vector<1x16x128xf32>
      %180 = vector.shape_cast %179 : vector<1x16x128xf32> to vector<16x128xf32>
      %181 = vector.shape_cast %180 : vector<16x128xf32> to vector<1x1x16x128xf32>
      %182 = vector.broadcast %181 : vector<1x1x16x128xf32> to vector<1x16x16x128xf32>
      %183 = arith.mulf %178, %182 : vector<1x16x16x128xf32>
      %184 = arith.addf %177, %183 : vector<1x16x16x128xf32>
      %185 = vector.extract_strided_slice %163 {offsets = [0, 3, 0, 0], sizes = [1, 16, 16, 128], strides = [1, 1, 1, 1]} : vector<1x20x16x128xf32> to vector<1x16x16x128xf32>
      %c19 = arith.constant 19 : index
      %c0_83 = arith.constant 0 : index
      %c0_84 = arith.constant 0 : index
      %186 = vector.load %arg4[%c19, %c0_83, %c0_84] : memref<25x16x128xf32, #tpu.memory_space<vmem>>, vector<1x16x128xf32>
      %187 = vector.shape_cast %186 : vector<1x16x128xf32> to vector<16x128xf32>
      %188 = vector.shape_cast %187 : vector<16x128xf32> to vector<1x1x16x128xf32>
      %189 = vector.broadcast %188 : vector<1x1x16x128xf32> to vector<1x16x16x128xf32>
      %190 = arith.mulf %185, %189 : vector<1x16x16x128xf32>
      %191 = arith.addf %184, %190 : vector<1x16x16x128xf32>
      %192 = vector.extract_strided_slice %163 {offsets = [0, 4, 0, 0], sizes = [1, 16, 16, 128], strides = [1, 1, 1, 1]} : vector<1x20x16x128xf32> to vector<1x16x16x128xf32>
      %c24 = arith.constant 24 : index
      %c0_85 = arith.constant 0 : index
      %c0_86 = arith.constant 0 : index
      %193 = vector.load %arg4[%c24, %c0_85, %c0_86] : memref<25x16x128xf32, #tpu.memory_space<vmem>>, vector<1x16x128xf32>
      %194 = vector.shape_cast %193 : vector<1x16x128xf32> to vector<16x128xf32>
      %195 = vector.shape_cast %194 : vector<16x128xf32> to vector<1x1x16x128xf32>
      %196 = vector.broadcast %195 : vector<1x1x16x128xf32> to vector<1x16x16x128xf32>
      %197 = arith.mulf %192, %196 : vector<1x16x16x128xf32>
      %198 = arith.addf %191, %197 : vector<1x16x16x128xf32>
      %199 = arith.index_cast %arg2 : i32 to index
      %c0_87 = arith.constant 0 : index
      %c0_88 = arith.constant 0 : index
      %c0_89 = arith.constant 0 : index
      %200 = vector.load %arg7[%199, %c0_87, %c0_88, %c0_89] : memref<2x16x16x128xf32, #tpu.memory_space<vmem>>, vector<1x16x16x128xf32>
      tpu.vector_store %arg7[%199, %c0_87, %c0_88, %c0_89], %198 {strides = array<i32>} : memref<2x16x16x128xf32, #tpu.memory_space<vmem>>, vector<1x16x16x128xf32>,
      %c0_90 = arith.constant 0 : index
      %c0_91 = arith.constant 0 : index
      %201 = vector.load %arg10[%c0_90, %c0_91] : memref<1x128xf32, #tpu.memory_space<vmem>>, vector<1x128xf32>
      %cst_92 = arith.constant dense<0.000000e+00> : vector<1x16x128xf32>
      %202 = vector.multi_reduction <add>, %198, %cst_92 [1] : vector<1x16x16x128xf32> to vector<1x16x128xf32>
      %cst_93 = arith.constant dense<0.000000e+00> : vector<1x128xf32>
      %203 = vector.multi_reduction <add>, %202, %cst_93 [1] : vector<1x16x128xf32> to vector<1x128xf32>
      %204 = arith.addf %201, %203 : vector<1x128xf32>
      %c0_94 = arith.constant 0 : index
      %c0_95 = arith.constant 0 : index
      %205 = vector.load %arg10[%c0_94, %c0_95] : memref<1x128xf32, #tpu.memory_space<vmem>>, vector<1x128xf32>
      tpu.vector_store %arg10[%c0_94, %c0_95], %204 {strides = array<i32>} : memref<1x128xf32, #tpu.memory_space<vmem>>, vector<1x128xf32>,
    } else {
    }
    %c1_i32 = arith.constant 1 : i32
    %8 = arith.cmpi eq, %arg1, %c1_i32 : i32
    %9 = arith.extui %8 : i1 to i32
    %c0_i32_4 = arith.constant 0 : i32
    %10 = arith.cmpi ne, %9, %c0_i32_4 : i32
    scf.if %10 {
      %c0 = arith.constant 0 : index
      %c0_6 = arith.constant 0 : index
      %14 = vector.load %arg10[%c0, %c0_6] : memref<1x128xf32, #tpu.memory_space<vmem>>, vector<1x128xf32>
      %cst = arith.constant 0.001953125 : f32
      %15 = vector.broadcast %cst : f32 to vector<1x128xf32>
      %16 = arith.mulf %14, %15 : vector<1x128xf32>
      %17 = arith.index_cast %arg2 : i32 to index
      %c0_7 = arith.constant 0 : index
      %c0_8 = arith.constant 0 : index
      %c0_9 = arith.constant 0 : index
      %18 = vector.load %arg7[%17, %c0_7, %c0_8, %c0_9] : memref<2x16x16x128xf32, #tpu.memory_space<vmem>>, vector<1x16x16x128xf32>
      %19 = vector.shape_cast %16 : vector<1x128xf32> to vector<1x1x1x128xf32>
      %20 = vector.broadcast %19 : vector<1x1x1x128xf32> to vector<1x16x16x128xf32>
      %21 = arith.subf %18, %20 : vector<1x16x16x128xf32>
      %c0_10 = arith.constant 0 : index
      %c0_11 = arith.constant 0 : index
      %22 = vector.load %arg11[%c0_10, %c0_11] : memref<1x128xf32, #tpu.memory_space<vmem>>, vector<1x128xf32>
      %23 = arith.mulf %21, %21 : vector<1x16x16x128xf32>
      %cst_12 = arith.constant dense<0.000000e+00> : vector<1x16x128xf32>
      %24 = vector.multi_reduction <add>, %23, %cst_12 [1] : vector<1x16x16x128xf32> to vector<1x16x128xf32>
      %cst_13 = arith.constant dense<0.000000e+00> : vector<1x128xf32>
      %25 = vector.multi_reduction <add>, %24, %cst_13 [1] : vector<1x16x128xf32> to vector<1x128xf32>
      %26 = arith.addf %22, %25 : vector<1x128xf32>
      %c0_14 = arith.constant 0 : index
      %c0_15 = arith.constant 0 : index
      %27 = vector.load %arg11[%c0_14, %c0_15] : memref<1x128xf32, #tpu.memory_space<vmem>>, vector<1x128xf32>
      tpu.vector_store %arg11[%c0_14, %c0_15], %26 {strides = array<i32>} : memref<1x128xf32, #tpu.memory_space<vmem>>, vector<1x128xf32>,
    } else {
    }
    %c2_i32 = arith.constant 2 : i32
    %11 = arith.cmpi eq, %arg1, %c2_i32 : i32
    %12 = arith.extui %11 : i1 to i32
    %c0_i32_5 = arith.constant 0 : i32
    %13 = arith.cmpi ne, %12, %c0_i32_5 : i32
    scf.if %13 {
      %c0 = arith.constant 0 : index
      %c0_6 = arith.constant 0 : index
      %14 = vector.load %arg10[%c0, %c0_6] : memref<1x128xf32, #tpu.memory_space<vmem>>, vector<1x128xf32>
      %cst = arith.constant 0.001953125 : f32
      %15 = vector.broadcast %cst : f32 to vector<1x128xf32>
      %16 = arith.mulf %14, %15 : vector<1x128xf32>
      %c0_7 = arith.constant 0 : index
      %c0_8 = arith.constant 0 : index
      %17 = vector.load %arg11[%c0_7, %c0_8] : memref<1x128xf32, #tpu.memory_space<vmem>>, vector<1x128xf32>
      %cst_9 = arith.constant 0.001953125 : f32
      %18 = vector.broadcast %cst_9 : f32 to vector<1x128xf32>
      %19 = arith.mulf %17, %18 : vector<1x128xf32>
      %c0_10 = arith.constant 0 : index
      %c0_11 = arith.constant 0 : index
      %20 = vector.load %arg5[%c0_10, %c0_11] : memref<1x128xf32, #tpu.memory_space<vmem>>, vector<1x128xf32>
      %cst_12 = arith.constant 9.99999974E-6 : f32
      %21 = vector.broadcast %cst_12 : f32 to vector<1x128xf32>
      %22 = arith.addf %19, %21 : vector<1x128xf32>
      %23 = math.rsqrt %22 : vector<1x128xf32>
      %24 = arith.mulf %20, %23 : vector<1x128xf32>
      %c0_13 = arith.constant 0 : index
      %c0_14 = arith.constant 0 : index
      %25 = vector.load %arg6[%c0_13, %c0_14] : memref<1x128xf32, #tpu.memory_space<vmem>>, vector<1x128xf32>
      %26 = arith.mulf %16, %24 : vector<1x128xf32>
      %27 = arith.subf %25, %26 : vector<1x128xf32>
      %28 = arith.index_cast %arg2 : i32 to index
      %c0_15 = arith.constant 0 : index
      %c0_16 = arith.constant 0 : index
      %c0_17 = arith.constant 0 : index
      %29 = vector.load %arg7[%28, %c0_15, %c0_16, %c0_17] : memref<2x16x16x128xf32, #tpu.memory_space<vmem>>, vector<1x16x16x128xf32>
      %30 = arith.index_cast %arg2 : i32 to index
      %c0_18 = arith.constant 0 : index
      %c0_19 = arith.constant 0 : index
      %c0_20 = arith.constant 0 : index
      %31 = vector.load %arg9[%30, %c0_18, %c0_19, %c0_20] : memref<2x16x16x128xf32, #tpu.memory_space<vmem>>, vector<1x16x16x128xf32>
      %32 = vector.shape_cast %24 : vector<1x128xf32> to vector<1x1x1x128xf32>
      %33 = vector.broadcast %32 : vector<1x1x1x128xf32> to vector<1x16x16x128xf32>
      %34 = arith.mulf %29, %33 : vector<1x16x16x128xf32>
      %35 = vector.shape_cast %27 : vector<1x128xf32> to vector<1x1x1x128xf32>
      %36 = vector.broadcast %35 : vector<1x1x1x128xf32> to vector<1x16x16x128xf32>
      %37 = arith.addf %34, %36 : vector<1x16x16x128xf32>
      %38 = arith.maximumf %31, %37 : vector<1x16x16x128xf32>
      %39 = arith.index_cast %arg2 : i32 to index
      %c0_21 = arith.constant 0 : index
      %c0_22 = arith.constant 0 : index
      %c0_23 = arith.constant 0 : index
      %40 = vector.load %arg7[%39, %c0_21, %c0_22, %c0_23] : memref<2x16x16x128xf32, #tpu.memory_space<vmem>>, vector<1x16x16x128xf32>
      tpu.vector_store %arg7[%39, %c0_21, %c0_22, %c0_23], %38 {strides = array<i32>} : memref<2x16x16x128xf32, #tpu.memory_space<vmem>>, vector<1x16x16x128xf32>,
    } else {
    }
    return
  }
  func.func @transform_0(%arg0: i32, %arg1: i32, %arg2: i32) -> (i32, i32, i32, i32) {
    %c2_i32 = arith.constant 2 : i32
    %0 = arith.muli %arg1, %c2_i32 : i32
    %1 = arith.addi %arg2, %0 : i32
    %c1_i32 = arith.constant 1 : i32
    %2 = arith.minsi %1, %c1_i32 : i32
    %c0_i32 = arith.constant 0 : i32
    %c0_i32_0 = arith.constant 0 : i32
    %c0_i32_1 = arith.constant 0 : i32
    return %2, %c0_i32, %c0_i32_0, %arg0 : i32, i32, i32, i32
  }
  func.func @transform_1(%arg0: i32, %arg1: i32, %arg2: i32) -> (i32, i32, i32) {
    %c0_i32 = arith.constant 0 : i32
    %c0_i32_0 = arith.constant 0 : i32
    %c0_i32_1 = arith.constant 0 : i32
    return %c0_i32, %c0_i32_0, %arg0 : i32, i32, i32
  }
  func.func @transform_2(%arg0: i32, %arg1: i32, %arg2: i32) -> (i32, i32) {
    %c0_i32 = arith.constant 0 : i32
    %c0_i32_0 = arith.constant 0 : i32
    return %c0_i32, %arg0 : i32, i32
  }
  func.func @transform_3(%arg0: i32, %arg1: i32, %arg2: i32) -> (i32, i32) {
    %c0_i32 = arith.constant 0 : i32
    %c0_i32_0 = arith.constant 0 : i32
    return %c0_i32, %arg0 : i32, i32
  }
  func.func @transform_4(%arg0: i32, %arg1: i32, %arg2: i32) -> (i32, i32, i32, i32) {
    %c0_i32 = arith.constant 0 : i32
    %c0_i32_0 = arith.constant 0 : i32
    %c0_i32_1 = arith.constant 0 : i32
    %c0_i32_2 = arith.constant 0 : i32
    return %c0_i32, %c0_i32_0, %c0_i32_1, %arg0 : i32, i32, i32, i32
  }
}

</mosaic_0001>

<bundles_post_ra>
// kernel: vrelu_nhwc.1
= control target key start
LH: loop header
LB: loop body
LE: loop exit
PB: predicated region body
PF: predicated region fallthrough
CT: control target
= control target key end

     0   :  { %9 = vsyncpa [#allocation7], 0  ;;  %s3285_s15 = smov 0   ;;  %s3287_s16 = smov 0   ;;  %s6589_s0 = inlined_call_operand.vmem [shape: f32[2,16,16,128], index: 0, kind: input, shape index: {}]   ;;  %s6590_s1 = inlined_call_operand.vmem [shape: f32[25,16,128], index: 1, kind: input, shape index: {}]   ;;  %s6591_s2 = inlined_call_operand.vmem [shape: f32[1,128], index: 2, kind: input, shape index: {}]   ;;  %s6592_s3 = inlined_call_operand.vmem [shape: f32[1,128], index: 3, kind: input, shape index: {}]   ;;  %s6593_s4 = inlined_call_operand.hbm [shape: f32[2,16,16,128], index: 4, kind: output, shape index: {}]  }
   0x1   :  { %s3289_s17 = smov 0   ;;  %s3291_s18 = smov 0  }
   0x2   :  { %s3293_s19 = smov 0  }
   0x3 LB: > { %s2923_s20 = sadd.s32 4294967295, %s3254_s19   ;;  %s27_s21 = sadd.s32 1, %s3246_s17  ;;  %s3254_s19 = sphi %s3293_s19, %s15_s19   ;;  %s3250_s18 = sphi %s3291_s18, %s7580_s18   ;;  %s3246_s17 = sphi %s3289_s17, %s7579_s17   ;;  %s3242_s16 = sphi %s3287_s16, %s7578_s16   ;;  %s3238_s15 = sphi %s3285_s15, %s7577_s15  }
   0x4   : > { %p28_p0 = scmp.ge.s32.totalorder %s27_s21, 2  ;;  %s30_s22 = sadd.s32 1, %s3250_s18 }
   0x5   : > { %p2931_p1 = scmp.ge.s32.totalorder %s3254_s19, 1  ;;  %p228_p2 = scmp.lt.s32.totalorder %s3254_s19, 7 }
   0x6   : > { %s7582_s21 = smov (%p28_p0, %s27_s21), 0  ;;  %s7584_s22 = smov (!%p28_p0, %s30_s22), %s3250_s18 }
   0x7   : > { %p229_p3 = pnand %p2931_p1, %p228_p2  ;;  %p32_p4 = scmp.ge.s32.totalorder %s7584_s22, 3 }
   0x8   : > { %s2932_s23 = sshll.u32 (!%p229_p3), %s3242_s16, 1  ;;  %p292_p5 = scmp.eq.s32.totalorder (!%p229_p3), %s3242_s16, 0 }
   0x9   : > { %s7586_s22 = smov (%p32_p4, %s7584_s22), 0  ;;  %232 = sbr.rel (%p229_p3) target bundleno = 708 (0x2c4), region = 36 }
   0xa   : > { %s267_s24 = sadd.s32 (!%p229_p3), %s3238_s15, %s2932_s23  ;;  %p293_p6 = scmp.eq.s32.totalorder (!%p229_p3), %s3238_s15, 0 }
   0xb   : > { %p268_p7 = scmp.lt.s32.totalorder (!%p229_p3), %s267_s24, 1 }
   0xc   : > { %p294_p8 = pnand (!%p229_p3), %p293_p6, %p292_p5 }
  0x10   : > { %s7588_s24 = smov (!%p268_p7, %s267_s24), 1  ;;  %297 = sbr.rel (%p294_p8) target bundleno = 59 (0x3b), region = 40 }
  0x11   : > { %s7590_s24 = smov (!%p268_p7, %s7588_s24), 1  ;;  %v3256_v0 = vmov (!%p294_p8), 0.0  }
  0x12   : > { %s2996_s25 = sshll.u32 %s7590_s24, 8  ;;  %298 = vst [vmem:[#allocation2] sm:$0xff] (!%p294_p8), %v3256_v0  ;;  %299 = vst [vmem:[#allocation2 + $0x8] sm:$0xff] (!%p294_p8), %v3256_v0 }
  0x13   : > { %s3327_s28 = scalar_lea.vmem %s6589_s0, %s2996_s25  ;;  %300 = vst [vmem:[#allocation2 + $0x10] sm:$0xff] (!%p294_p8), %v3256_v0  ;;  %301 = vst [vmem:[#allocation2 + $0x18] sm:$0x3] (!%p294_p8), %v3256_v0 }
  0x14   : > { %302 = vst [vmem:[#allocation2 + $0x20] sm:$0xff] (!%p294_p8), %v3256_v0  ;;  %303 = vst [vmem:[#allocation2 + $0x28] sm:$0xff] (!%p294_p8), %v3256_v0 }
  0x15   : > { %304 = vst [vmem:[#allocation2 + $0x30] sm:$0xff] (!%p294_p8), %v3256_v0  ;;  %305 = vst [vmem:[#allocation2 + $0x38] sm:$0x3] (!%p294_p8), %v3256_v0 }
  0x16   : > { %306 = vst [vmem:[#allocation2 + $0x40] sm:$0xff] (!%p294_p8), %v3256_v0  ;;  %307 = vst [vmem:[#allocation2 + $0x48] sm:$0xff] (!%p294_p8), %v3256_v0 }
  0x17   : > { %308 = vst [vmem:[#allocation2 + $0x50] sm:$0xff] %v3256_v0  ;;  %309 = vst [vmem:[#allocation2 + $0x58] sm:$0x3] %v3256_v0 }
  0x18   : > { %310 = vst [vmem:[#allocation2 + $0x60] sm:$0xff] %v3256_v0  ;;  %311 = vst [vmem:[#allocation2 + $0x68] sm:$0xff] %v3256_v0 }
  0x19   : > { %312 = vst [vmem:[#allocation2 + $0x70] sm:$0xff] %v3256_v0  ;;  %313 = vst [vmem:[#allocation2 + $0x78] sm:$0x3] %v3256_v0 }
  0x1a   : > { %314 = vst [vmem:[#allocation2 + $0x80] sm:$0xff] %v3256_v0  ;;  %315 = vst [vmem:[#allocation2 + $0x88] sm:$0xff] %v3256_v0 }
  0x1b   : > { %316 = vst [vmem:[#allocation2 + $0x90] sm:$0xff] %v3256_v0  ;;  %317 = vst [vmem:[#allocation2 + $0x98] sm:$0x3] %v3256_v0 }
  0x1c   : > { %318 = vst [vmem:[#allocation2 + $0xa0] sm:$0xff] %v3256_v0  ;;  %319 = vst [vmem:[#allocation2 + $0xa8] sm:$0xff] %v3256_v0 }
  0x1d   : > { %320 = vst [vmem:[#allocation2 + $0xb0] sm:$0xff] %v3256_v0  ;;  %321 = vst [vmem:[#allocation2 + $0xb8] sm:$0x3] %v3256_v0 }
  0x1e   : > { %322 = vst [vmem:[#allocation2 + $0xc0] sm:$0xff] %v3256_v0  ;;  %323 = vst [vmem:[#allocation2 + $0xc8] sm:$0xff] %v3256_v0 }
  0x1f   : > { %324 = vst [vmem:[#allocation2 + $0xd0] sm:$0xff] %v3256_v0  ;;  %325 = vst [vmem:[#allocation2 + $0xd8] sm:$0x3] %v3256_v0 }
  0x20   : > { %326 = vst [vmem:[#allocation2 + $0xe0] sm:$0xff] %v3256_v0  ;;  %327 = vst [vmem:[#allocation2 + $0xe8] sm:$0xff] %v3256_v0 }
  0x21   : > { %328 = vst [vmem:[#allocation2 + $0xf0] sm:$0xff] %v3256_v0  ;;  %329 = vst [vmem:[#allocation2 + $0xf8] sm:$0x3] %v3256_v0 }
  0x22   : > { %330 = vst [vmem:[#allocation2 + $0x100] sm:$0xff] %v3256_v0  ;;  %331 = vst [vmem:[#allocation2 + $0x108] sm:$0xff] %v3256_v0 }
  0x23   : > { %332 = vst [vmem:[#allocation2 + $0x110] sm:$0xff] %v3256_v0  ;;  %333 = vst [vmem:[#allocation2 + $0x118] sm:$0x3] %v3256_v0 }
  0x24   : > { %334 = vst [vmem:[#allocation2 + $0x120] sm:$0xff] %v3256_v0  ;;  %335 = vst [vmem:[#allocation2 + $0x128] sm:$0xff] %v3256_v0 }
  0x25   : > { %336 = vst [vmem:[#allocation2 + $0x130] sm:$0xff] %v3256_v0  ;;  %337 = vst [vmem:[#allocation2 + $0x138] sm:$0x3] %v3256_v0 }
  0x26   : > { %338 = vst [vmem:[#allocation2 + $0x140] sm:$0xff] %v3256_v0  ;;  %339 = vst [vmem:[#allocation2 + $0x148] sm:$0xff] %v3256_v0 }
  0x27   : > { %340 = vst [vmem:[#allocation2 + $0x150] sm:$0xff] %v3256_v0  ;;  %341 = vst [vmem:[#allocation2 + $0x158] sm:$0x3] %v3256_v0 }
  0x28   : > { %342 = vst [vmem:[#allocation2 + $0x160] sm:$0xff] %v3256_v0  ;;  %343 = vst [vmem:[#allocation2 + $0x168] sm:$0xff] %v3256_v0 }
  0x29   : > { %344 = vst [vmem:[#allocation2 + $0x170] sm:$0xff] %v3256_v0  ;;  %345 = vst [vmem:[#allocation2 + $0x178] sm:$0x3] %v3256_v0 }
  0x2a   : > { %346 = vst [vmem:[#allocation2 + $0x180] sm:$0xff] %v3256_v0  ;;  %347 = vst [vmem:[#allocation2 + $0x188] sm:$0xff] %v3256_v0 }
  0x2b   : > { %348 = vst [vmem:[#allocation2 + $0x190] sm:$0xff] %v3256_v0  ;;  %349 = vst [vmem:[#allocation2 + $0x198] sm:$0x3] %v3256_v0 }
  0x2c   : > { %350 = vst [vmem:[#allocation2 + $0x1a0] sm:$0xff] %v3256_v0  ;;  %351 = vst [vmem:[#allocation2 + $0x1a8] sm:$0xff] %v3256_v0 }
  0x2d   : > { %352 = vst [vmem:[#allocation2 + $0x1b0] sm:$0xff] %v3256_v0  ;;  %353 = vst [vmem:[#allocation2 + $0x1b8] sm:$0x3] %v3256_v0 }
  0x2e   : > { %354 = vst [vmem:[#allocation2 + $0x1c0] sm:$0xff] %v3256_v0  ;;  %355 = vst [vmem:[#allocation2 + $0x1c8] sm:$0xff] %v3256_v0 }
  0x2f   : > { %356 = vst [vmem:[#allocation2 + $0x1d0] sm:$0xff] %v3256_v0  ;;  %357 = vst [vmem:[#allocation2 + $0x1d8] sm:$0x3] %v3256_v0 }
  0x30   : > { %358 = vst [vmem:[#allocation2 + $0x1e0] sm:$0xff] %v3256_v0  ;;  %359 = vst [vmem:[#allocation2 + $0x1e8] sm:$0xff] %v3256_v0 }
  0x31   : > { %360 = vst [vmem:[#allocation2 + $0x1f0] sm:$0xff] %v3256_v0  ;;  %361 = vst [vmem:[#allocation2 + $0x1f8] sm:$0x3] %v3256_v0 }
  0x32   : > { %362 = vst [vmem:[#allocation2 + $0x200] sm:$0xff] %v3256_v0  ;;  %363 = vst [vmem:[#allocation2 + $0x208] sm:$0xff] %v3256_v0 }
  0x33   : > { %364 = vst [vmem:[#allocation2 + $0x210] sm:$0xff] %v3256_v0  ;;  %365 = vst [vmem:[#allocation2 + $0x218] sm:$0x3] %v3256_v0 }
  0x34   : > { %366 = vst [vmem:[#allocation2 + $0x220] sm:$0xff] %v3256_v0  ;;  %367 = vst [vmem:[#allocation2 + $0x228] sm:$0xff] %v3256_v0 }
  0x35   : > { %368 = vst [vmem:[#allocation2 + $0x230] sm:$0xff] %v3256_v0  ;;  %369 = vst [vmem:[#allocation2 + $0x238] sm:$0x3] %v3256_v0 }
  0x36   : > { %370 = vst [vmem:[#allocation2 + $0x240] sm:$0xff] %v3256_v0  ;;  %371 = vst [vmem:[#allocation2 + $0x248] sm:$0xff] %v3256_v0 }
  0x37   : > { %372 = vst [vmem:[#allocation2 + $0x250] sm:$0xff] %v3256_v0  ;;  %373 = vst [vmem:[#allocation2 + $0x258] sm:$0x3] %v3256_v0 }
  0x38   : > { %374 = vst [vmem:[#allocation2 + $0x260] sm:$0xff] %v3256_v0  ;;  %375 = vst [vmem:[#allocation2 + $0x268] sm:$0xff] %v3256_v0 }
  0x39   : > { %376 = vst [vmem:[#allocation2 + $0x270] sm:$0xff] %v3256_v0  ;;  %377 = vst [vmem:[#allocation2 + $0x278] sm:$0x3] %v3256_v0 }
  0x3a   : > { %378 = vst [vmem:[#allocation4] sm:$0x1] %v3256_v0  ;;  %379 = vst [vmem:[#allocation5] sm:$0x1] %v3256_v0 }
  0x3b PF: > { %p2938_p9 = scmp.ne.s32.totalorder %s3242_s16, 0 }
  0x3d   : > { %382 = sbr.rel (%p2938_p9) target bundleno = 562 (0x232), region = 44 }
  0x44   : > { %v383_v1 = vld [vmem:[%s3327_s28] sm:$0xff]  ;;  %v384_v2 = vld [vmem:[%s3327_s28 + $0x8] sm:$0xff]  ;;  %v385_v3 = vld [vmem:[%s3327_s28 + $0x10] sm:$0xff]  ;;  %s2939_s27 = sshll.u32 %s3238_s15, 8 }
  0x45   : > { %416 = vst [vmem:[#allocation2 + $0x48] sm:$0xff] %v383_v1  ;;  %417 = vst [vmem:[#allocation2 + $0x50] sm:$0xff] %v384_v2  ;;  %v386_v4 = vld [vmem:[%s3327_s28 + $0x18] sm:$0xff]  ;;  %v482_v5 = vld [vmem:[#allocation2 + $0x6] sm:$0xff]  ;;  %s4454_s29 = scalar_lea.vmem [#allocation6], %s2939_s27  ;;  %s5558_s14 = scalar_lea.vmem [#allocation3], %s2939_s27 }
  0x46   : > { %v484_v6 = vld [vmem:[#allocation2 + $0x26] sm:$0xff]  ;;  %418 = vst [vmem:[#allocation2 + $0x68] sm:$0xff] %v385_v3  ;;  %419 = vst [vmem:[#allocation2 + $0x70] sm:$0xff] %v386_v4  ;;  %v3425_v9 = vld [vmem:[%s6590_s1 + $0x50] sm:$0xff] }
  0x47   : > { %v387_v7 = vld [vmem:[%s3327_s28 + $0x20] sm:$0xff]  ;;  %v388_v10 = vld [vmem:[%s3327_s28 + $0x28] sm:$0xff]  ;;  %v389_v14 = vld [vmem:[%s3327_s28 + $0x30] sm:$0xff]  ;;  %v591_v22 = vmul.f32 %v3425_v9, %v484_v6 }
  0x48   : > { %v3420_v8 = vld [vmem:[%s6590_s1] sm:$0xff]  ;;  %420 = vst [vmem:[#allocation2 + $0x88] sm:$0xff] %v387_v7  ;;  %v483_v11 = vld [vmem:[#allocation2 + $0xe] sm:$0xff]  ;;  %421 = vst [vmem:[#allocation2 + $0x90] sm:$0xff] %v388_v10 }
  0x49   : > { %v485_v12 = vld [vmem:[#allocation2 + $0x2e] sm:$0xff]  ;;  %v390_v15 = vld [vmem:[%s3327_s28 + $0x38] sm:$0xff]  ;;  %v3438_v16 = vld [vmem:[%s6590_s1 + $0xa0] sm:$0xff]  ;;  %422 = vst [vmem:[#allocation2 + $0xa8] sm:$0xff] %v389_v14  ;;  %v524_v21 = vmul.f32 %v3420_v8, %v482_v5  ;;  %v526_v34 = vmul.f32 %v3420_v8, %v484_v6 }
  0x4a   : > { %v3431_v13 = vld [vmem:[%s6590_s1 + $0x8] sm:$0xff]  ;;  %423 = vst [vmem:[#allocation2 + $0xb0] sm:$0xff] %v390_v15  ;;  %v391_v17 = vld [vmem:[%s3327_s28 + $0x40] sm:$0xff]  ;;  %v393_v19 = vld [vmem:[%s3327_s28 + $0x50] sm:$0xff] }
  0x4b   : > { %v392_v18 = vld [vmem:[%s3327_s28 + $0x48] sm:$0xff]  ;;  %v3448_v23 = vld [vmem:[%s6590_s1 + $0x58] sm:$0xff]  ;;  %424 = vst [vmem:[#allocation2 + $0xc8] sm:$0xff] %v391_v17  ;;  %426 = vst [vmem:[#allocation2 + $0xe8] sm:$0xff] %v393_v19  ;;  %v525_v32 = vmul.f32 %v3431_v13, %v483_v11  ;;  %v623_v36 = vadd.f32 %v591_v22, %v524_v21  ;;  %v527_v44 = vmul.f32 %v3431_v13, %v485_v12 }
  0x4c   : > { %v486_v20 = vld [vmem:[#allocation2 + $0x46] sm:$0xff]  ;;  %425 = vst [vmem:[#allocation2 + $0xd0] sm:$0xff] %v392_v18  ;;  %v394_v24 = vld [vmem:[%s3327_s28 + $0x58] sm:$0xff]  ;;  %v397_v27 = vld [vmem:[%s3327_s28 + $0x70] sm:$0xff]  ;;  %v592_v33 = vmul.f32 %v3448_v23, %v485_v12 }
  0x4d   : > { %427 = vst [vmem:[#allocation2 + $0xf0] sm:$0xff] %v394_v24  ;;  %v395_v25 = vld [vmem:[%s3327_s28 + $0x60] sm:$0xff]  ;;  %v396_v26 = vld [vmem:[%s3327_s28 + $0x68] sm:$0xff]  ;;  %430 = vst [vmem:[#allocation2 + $0x128] sm:$0xff] %v397_v27  ;;  %v593_v35 = vmul.f32 %v3425_v9, %v486_v20  ;;  %v658_v37 = vmul.f32 %v3438_v16, %v486_v20  ;;  %v528_v49 = vmul.f32 %v3420_v8, %v486_v20 }
  0x4e   : > { %428 = vst [vmem:[#allocation2 + $0x108] sm:$0xff] %v395_v25  ;;  %429 = vst [vmem:[#allocation2 + $0x110] sm:$0xff] %v396_v26  ;;  %v398_v28 = vld [vmem:[%s3327_s28 + $0x78] sm:$0xff]  ;;  %v399_v29 = vld [vmem:[%s3327_s28 + $0x80] sm:$0xff]  ;;  %v624_v51 = vadd.f32 %v592_v33, %v525_v32 }
  0x4f   : > { %v400_v30 = vld [vmem:[%s3327_s28 + $0x88] sm:$0xff]  ;;  %431 = vst [vmem:[#allocation2 + $0x130] sm:$0xff] %v398_v28  ;;  %432 = vst [vmem:[#allocation2 + $0x148] sm:$0xff] %v399_v29  ;;  %v3465_v39 = vld [vmem:[%s6590_s1 + $0x10] sm:$0xff]  ;;  %v625_v56 = vadd.f32 %v593_v35, %v526_v34  ;;  %v690_v57 = vadd.f32 %v658_v37, %v623_v36 }
  0x50   : > { %v487_v31 = vld [vmem:[#allocation2 + $0x4e] sm:$0xff]  ;;  %433 = vst [vmem:[#allocation2 + $0x150] sm:$0xff] %v400_v30  ;;  %v3475_v41 = vld [vmem:[%s6590_s1 + $0x60] sm:$0xff]  ;;  %v3488_v47 = vld [vmem:[%s6590_s1 + $0x18] sm:$0xff] }
  0x51   : > { %v860_v38 = vld [vmem:[#allocation2 + $0x47] sm:$0xff]  ;;  %v3480_v42 = vld [vmem:[%s6590_s1 + $0xb0] sm:$0xff]  ;;  %v594_v45 = vmul.f32 %v3448_v23, %v487_v31  ;;  %v3503_v54 = vld [vmem:[%s6590_s1 + $0xb8] sm:$0xff]  ;;  %v529_v62 = vmul.f32 %v3431_v13, %v487_v31 }
  0x52   : > { %v3470_v40 = vld [vmem:[%s6590_s1 + $0xa8] sm:$0xff]  ;;  %v401_v43 = vld [vmem:[%s3327_s28 + $0x90] sm:$0xff]  ;;  %v3492_v50 = vmul.f32 %v3465_v39, %v860_v38  ;;  %v3511_v58 = vmul.f32 %v3475_v41, %v860_v38  ;;  %v3514_v59 = vmul.f32 %v3480_v42, %v860_v38  ;;  %v3527_v2 = vld [vmem:[%s6590_s1 + $0xf8] sm:$0xff] }
  0x53   : > { %v861_v46 = vld [vmem:[#allocation2 + $0x4f] sm:$0xff]  ;;  %v488_v48 = vld [vmem:[#allocation2 + $0x66] sm:$0xff]  ;;  %434 = vst [vmem:[#allocation2 + $0x168] sm:$0xff] %v401_v43  ;;  %v659_v52 = vmul.f32 %v3470_v40, %v487_v31  ;;  %v626_v3 = vadd.f32 %v594_v45, %v527_v44  ;;  %v402_v35 = vld [vmem:[%s3327_s28 + $0x98] sm:$0xff] }
  0x54   : > { %6924 = vst [vmem:[#allocation9_spill] sm:$0xff] %v3492_v50  ;;  %v3498_v53 = vld [vmem:[%s6590_s1 + $0x68] sm:$0xff]  ;;  %v3508_v55 = vld [vmem:[%s6590_s1 + $0xf0] sm:$0xff]  ;;  %v3520_v63 = vmul.f32 %v3488_v47, %v861_v46  ;;  %v595_v0 = vmul.f32 %v3425_v9, %v488_v48  ;;  %v660_v1 = vmul.f32 %v3438_v16, %v488_v48  ;;  %v3533_v5 = vmul.f32 %v3503_v54, %v861_v46  ;;  %v3557_v21 = vld [vmem:[%s6590_s1 + $0x140] sm:$0xff] }
  0x55   : > { %v3516_v60 = vld [vmem:[#allocation2 + $0x67] sm:$0xff]  ;;  %v3530_v4 = vmul.f32 %v3498_v53, %v861_v46  ;;  %v725_v6 = vmul.f32 %v3508_v55, %v488_v48  ;;  %v691_v10 = vadd.f32 %v659_v52, %v624_v51  ;;  %v530_v11 = vmul.f32 %v3420_v8, %v488_v48  ;;  %v3542_v15 = vld [vmem:[#allocation2 + $0x6f] sm:$0xff]  ;;  %435 = vst [vmem:[#allocation2 + $0x170] sm:$0xff] %v402_v35 }
  0x56   : > { %v489_v61 = vld [vmem:[#allocation2 + $0x6e] sm:$0xff]  ;;  %6925 = vst [vmem:[#allocation10_spill] sm:$0xff] %v3520_v63  ;;  %v490_v7 = vld [vmem:[#allocation2 + $0x86] sm:$0xff]  ;;  %v3539_v12 = vmul.f32 %v3465_v39, %v3516_v60  ;;  %v3546_v17 = vmul.f32 %v3475_v41, %v3516_v60  ;;  %v3550_v18 = vmul.f32 %v3480_v42, %v3516_v60  ;;  %v627_v24 = vadd.f32 %v595_v0, %v528_v49 }
  0x57   : > { %v596_v14 = vmul.f32 %v3448_v23, %v489_v61  ;;  %v661_v19 = vmul.f32 %v3470_v40, %v489_v61  ;;  %v726_v20 = vmul.f32 %v3527_v2, %v489_v61  ;;  %v491_v22 = vld [vmem:[#allocation2 + $0x8e] sm:$0xff]  ;;  %v692_v25 = vadd.f32 %v660_v1, %v625_v56  ;;  %v492_v34 = vld [vmem:[#allocation2 + $0xa6] sm:$0xff] }
  0x58   : > { %6926 = vst [vmem:[#allocation11_spill] sm:$0xff] %v3539_v12  ;;  %6927 = vst [vmem:[#allocation12_spill] sm:$0xff] %v3546_v17  ;;  %v531_v26 = vmul.f32 %v3431_v13, %v489_v61  ;;  %v597_v27 = vmul.f32 %v3425_v9, %v490_v7  ;;  %v3564_v28 = vld [vmem:[%s6590_s1 + $0x148] sm:$0xff]  ;;  %v757_v29 = vadd.f32 %v725_v6, %v690_v57  ;;  %v403_v45 = vld [vmem:[%s3327_s28 + $0xa0] sm:$0xff] }
  0x59   : > { %v3568_v30 = vmul.f32 %v3488_v47, %v3542_v15  ;;  %v662_v31 = vmul.f32 %v3438_v16, %v490_v7  ;;  %v727_v32 = vmul.f32 %v3508_v55, %v490_v7  ;;  %v3572_v33 = vld [vmem:[#allocation2 + $0x87] sm:$0xff]  ;;  %v628_v36 = vadd.f32 %v596_v14, %v529_v62  ;;  %v3581_v44 = vld [vmem:[#allocation2 + $0x8f] sm:$0xff]  ;;  %436 = vst [vmem:[#allocation2 + $0x188] sm:$0xff] %v403_v45  ;;  %v406_v57 = vld [vmem:[%s3327_s28 + $0xb8] sm:$0xff] }
  0x5a   : > { %v3577_v37 = vmul.f32 %v3498_v53, %v3542_v15  ;;  %v792_v38 = vmul.f32 %v3557_v21, %v490_v7  ;;  %v598_v43 = vmul.f32 %v3448_v23, %v491_v22  ;;  %v404_v46 = vld [vmem:[%s3327_s28 + $0xa8] sm:$0xff]  ;;  %v405_v48 = vld [vmem:[%s3327_s28 + $0xb0] sm:$0xff]  ;;  %v693_v49 = vadd.f32 %v661_v19, %v626_v3  ;;  %v407_v61 = vld [vmem:[%s3327_s28 + $0xc0] sm:$0xff]  ;;  %439 = vst [vmem:[#allocation2 + $0x1b0] sm:$0xff] %v406_v57 }
  0x5b   : > { %6928 = vst [vmem:[#allocation13_spill] sm:$0xff] %v3568_v30  ;;  %v758_v51 = vadd.f32 %v726_v20, %v691_v10  ;;  %v3588_v52 = vmul.f32 %v3503_v54, %v3542_v15  ;;  %v532_v56 = vmul.f32 %v3420_v8, %v490_v7  ;;  %437 = vst [vmem:[#allocation2 + $0x190] sm:$0xff] %v404_v46  ;;  %v408_v62 = vld [vmem:[%s3327_s28 + $0xc8] sm:$0xff]  ;;  %v409_v7 = vld [vmem:[%s3327_s28 + $0xd0] sm:$0xff] }
  0x5c   : > { %6929 = vst [vmem:[#allocation14_spill] sm:$0xff] %v3577_v37  ;;  %438 = vst [vmem:[#allocation2 + $0x1a8] sm:$0xff] %v405_v48  ;;  %v629_v0 = vadd.f32 %v597_v27, %v530_v11  ;;  %v3596_v1 = vmul.f32 %v3465_v39, %v3572_v33  ;;  %v3600_v3 = vmul.f32 %v3475_v41, %v3572_v33  ;;  %v410_v10 = vld [vmem:[%s3327_s28 + $0xd8] sm:$0xff]  ;;  %v411_v14 = vld [vmem:[%s3327_s28 + $0xe0] sm:$0xff] }
  0x5d   : > { %6930 = vst [vmem:[#allocation15_spill] sm:$0xff] %v3588_v52  ;;  %v663_v6 = vmul.f32 %v3470_v40, %v491_v22  ;;  %440 = vst [vmem:[#allocation2 + $0x1c8] sm:$0xff] %v407_v61  ;;  %v694_v19 = vadd.f32 %v662_v31, %v627_v24  ;;  %v759_v11 = vadd.f32 %v727_v32, %v692_v25  ;;  %v493_v35 = vld [vmem:[#allocation2 + $0xae] sm:$0xff]  ;;  %v414_v25 = vld [vmem:[%s3327_s28 + $0xf8] sm:$0xff] }
  0x5e   : > { %6931 = vst [vmem:[#allocation16_spill] sm:$0xff] %v3596_v1  ;;  %6932 = vst [vmem:[#allocation17_spill] sm:$0xff] %v3600_v3  ;;  %v728_v20 = vmul.f32 %v3527_v2, %v491_v22  ;;  %v793_v27 = vmul.f32 %v3564_v28, %v491_v22  ;;  %v412_v45 = vld [vmem:[%s3327_s28 + $0xe8] sm:$0xff]  ;;  %v413_v46 = vld [vmem:[%s3327_s28 + $0xf0] sm:$0xff]  ;;  %v3610_v48 = vadd.f32 %v792_v38, %v757_v29 }
  0x5f   : > { %441 = vst [vmem:[#allocation2 + $0x1d0] sm:$0xff] %v408_v62  ;;  %442 = vst [vmem:[#allocation2 + $0x1e8] sm:$0xff] %v409_v7  ;;  %v533_v57 = vmul.f32 %v3431_v13, %v491_v22  ;;  %v630_v61 = vadd.f32 %v598_v43, %v531_v26  ;;  %v599_v62 = vmul.f32 %v3425_v9, %v492_v34  ;;  %v3614_v24 = vld [vmem:[#allocation2 + $0xa7] sm:$0xff] }
  0x60   : > { %443 = vst [vmem:[#allocation2 + $0x1f0] sm:$0xff] %v410_v10  ;;  %444 = vst [vmem:[#allocation2 + $0x208] sm:$0xff] %v411_v14  ;;  %v3619_v31 = vmul.f32 %v3488_v47, %v3581_v44  ;;  %v3623_v32 = vmul.f32 %v3498_v53, %v3581_v44  ;;  %v664_v29 = vmul.f32 %v3438_v16, %v492_v34  ;;  %v494_v10 = vld [vmem:[#allocation2 + $0xc6] sm:$0xff]  ;;  %v499_v17 = vld [vmem:[#allocation2 + $0x10e] sm:$0xff] }
  0x61   : > { %445 = vst [vmem:[#allocation2 + $0x210] sm:$0xff] %v412_v45  ;;  %446 = vst [vmem:[#allocation2 + $0x228] sm:$0xff] %v413_v46  ;;  %v729_v22 = vmul.f32 %v3508_v55, %v492_v34  ;;  %v695_v26 = vadd.f32 %v663_v6, %v628_v36  ;;  %v534_v38 = vmul.f32 %v3420_v8, %v492_v34  ;;  %v3651_v30 = vld [vmem:[#allocation2 + $0xc7] sm:$0xff] }
  0x62   : > { %6933 = vst [vmem:[#allocation18_spill] sm:$0xff] %v3619_v31  ;;  %6934 = vst [vmem:[#allocation19_spill] sm:$0xff] %v3623_v32  ;;  %v794_v43 = vmul.f32 %v3557_v21, %v492_v34  ;;  %v600_v7 = vmul.f32 %v3448_v23, %v493_v35  ;;  %v760_v14 = vadd.f32 %v728_v20, %v693_v49  ;;  %v495_v49 = vld [vmem:[#allocation2 + $0xce] sm:$0xff] }
  0x63   : > { %447 = vst [vmem:[#allocation2 + $0x230] sm:$0xff] %v414_v25  ;;  %v3630_v45 = vadd.f32 %v793_v27, %v758_v51  ;;  %v3634_v46 = vmul.f32 %v3465_v39, %v3614_v24  ;;  %v665_v31 = vmul.f32 %v3470_v40, %v493_v35  ;;  %v631_v1 = vadd.f32 %v599_v62, %v532_v56  ;;  %v3643_v25 = vld [vmem:[#allocation2 + $0xaf] sm:$0xff]  ;;  %v870_v37 = vld [vmem:[#allocation2 + $0xe7] sm:$0xff] }
  0x64   : > { %v3639_v36 = vmul.f32 %v3475_v41, %v3614_v24  ;;  %v730_v6 = vmul.f32 %v3527_v2, %v493_v35  ;;  %v795_v34 = vmul.f32 %v3564_v28, %v493_v35  ;;  %6937 = vst [vmem:[#allocation22_spill] sm:$0xff] %v3643_v25  ;;  %v696_v51 = vadd.f32 %v664_v29, %v629_v0 }
  0x65   : > { %6935 = vst [vmem:[#allocation20_spill] sm:$0xff] %v3634_v46  ;;  %v761_v20 = vadd.f32 %v729_v22, %v694_v19  ;;  %v535_v27 = vmul.f32 %v3431_v13, %v493_v35  ;;  %v601_v46 = vmul.f32 %v3425_v9, %v494_v10  ;;  %v3647_v32 = vadd.f32 %v794_v43, %v759_v11  ;;  %v496_v22 = vld [vmem:[#allocation2 + $0xe6] sm:$0xff] }
  0x66   : > { %6936 = vst [vmem:[#allocation21_spill] sm:$0xff] %v3639_v36  ;;  %v632_v56 = vadd.f32 %v600_v7, %v533_v57  ;;  %v666_v62 = vmul.f32 %v3438_v16, %v494_v10  ;;  %v731_v36 = vmul.f32 %v3508_v55, %v494_v10  ;;  %6938 = vst [vmem:[#allocation23_spill] sm:$0xff] %v3651_v30  ;;  %v869_v7 = vld [vmem:[#allocation2 + $0xcf] sm:$0xff] }
  0x67   : > { %v697_v3 = vadd.f32 %v665_v31, %v630_v61  ;;  %v3655_v12 = vmul.f32 %v3488_v47, %v3643_v25  ;;  %v796_v0 = vmul.f32 %v3557_v21, %v494_v10  ;;  %v602_v19 = vmul.f32 %v3448_v23, %v495_v49 }
  0x68   : > { %v762_v35 = vadd.f32 %v730_v6, %v695_v26  ;;  %v3659_v29 = vadd.f32 %v795_v34, %v760_v14  ;;  %v3663_v11 = vmul.f32 %v3498_v53, %v3643_v25  ;;  %v536_v57 = vmul.f32 %v3420_v8, %v494_v10  ;;  %v497_v10 = vld [vmem:[#allocation2 + $0xee] sm:$0xff] }
  0x69   : > { %6939 = vst [vmem:[#allocation24_spill] sm:$0xff] %v3655_v12  ;;  %v633_v43 = vadd.f32 %v601_v46, %v534_v38  ;;  %v3668_v61 = vmul.f32 %v3465_v39, %v3651_v30  ;;  %v3672_v31 = vmul.f32 %v3475_v41, %v3651_v30  ;;  %v667_v26 = vmul.f32 %v3470_v40, %v495_v49 }
  0x6a   : > { %6940 = vst [vmem:[#allocation25_spill] sm:$0xff] %v3663_v11  ;;  %v698_v14 = vadd.f32 %v666_v62, %v631_v1  ;;  %v763_v6 = vadd.f32 %v731_v36, %v696_v51  ;;  %v732_v34 = vmul.f32 %v3527_v2, %v495_v49  ;;  %v797_v12 = vmul.f32 %v3564_v28, %v495_v49 }
  0x6b   : > { %6941 = vst [vmem:[#allocation26_spill] sm:$0xff] %v3668_v61  ;;  %6942 = vst [vmem:[#allocation27_spill] sm:$0xff] %v3672_v31  ;;  %v3677_v11 = vadd.f32 %v796_v0, %v761_v20  ;;  %v537_v38 = vmul.f32 %v3431_v13, %v495_v49  ;;  %v634_v46 = vadd.f32 %v602_v19, %v535_v27  ;;  %v498_v27 = vld [vmem:[#allocation2 + $0x106] sm:$0xff] }
  0x6c   : > { %v603_v61 = vmul.f32 %v3425_v9, %v496_v22  ;;  %v3682_v31 = vmul.f32 %v3488_v47, %v869_v7  ;;  %v3685_v63 = vmul.f32 %v3498_v53, %v869_v7  ;;  %v668_v1 = vmul.f32 %v3438_v16, %v496_v22 }
  0x6d   : > { %6943 = vst [vmem:[#allocation28_spill] sm:$0xff] %v3677_v11  ;;  %v733_v36 = vmul.f32 %v3508_v55, %v496_v22  ;;  %v699_v51 = vadd.f32 %v667_v26, %v632_v56  ;;  %v538_v20 = vmul.f32 %v3420_v8, %v496_v22  ;;  %v798_v62 = vmul.f32 %v3557_v21, %v496_v22  ;;  %v871_v22 = vld [vmem:[#allocation2 + $0xef] sm:$0xff] }
  0x6e   : > { %6944 = vst [vmem:[#allocation29_spill] sm:$0xff] %v3682_v31  ;;  %6945 = vst [vmem:[#allocation30_spill] sm:$0xff] %v3685_v63  ;;  %v604_v49 = vmul.f32 %v3448_v23, %v497_v10  ;;  %v764_v0 = vadd.f32 %v732_v34, %v697_v3  ;;  %v3692_v19 = vadd.f32 %v797_v12, %v762_v35 }
  0x6f   : > { %v3695_v31 = vmul.f32 %v3465_v39, %v870_v37  ;;  %v669_v7 = vmul.f32 %v3470_v40, %v497_v10  ;;  %v635_v63 = vadd.f32 %v603_v61, %v536_v57  ;;  %v3699_v30 = vmul.f32 %v3475_v41, %v870_v37  ;;  %v872_v61 = vld [vmem:[#allocation2 + $0x107] sm:$0xff] }
  0x70   : > { %6946 = vst [vmem:[#allocation31_spill] sm:$0xff] %v3692_v19  ;;  %v734_v56 = vmul.f32 %v3527_v2, %v497_v10  ;;  %v799_v26 = vmul.f32 %v3564_v28, %v497_v10  ;;  %v700_v50 = vadd.f32 %v668_v1, %v633_v43  ;;  %v765_v11 = vadd.f32 %v733_v36, %v698_v14  ;;  %v500_v1 = vld [vmem:[#allocation2 + $0x126] sm:$0xff] }
  0x71   : > { %6947 = vst [vmem:[#allocation32_spill] sm:$0xff] %v3695_v31  ;;  %6948 = vst [vmem:[#allocation33_spill] sm:$0xff] %v3699_v30  ;;  %v539_v12 = vmul.f32 %v3431_v13, %v497_v10  ;;  %v605_v3 = vmul.f32 %v3425_v9, %v498_v27  ;;  %v3705_v35 = vadd.f32 %v798_v62, %v763_v6 }
  0x72   : > { %v636_v34 = vadd.f32 %v604_v49, %v537_v38  ;;  %v670_v57 = vmul.f32 %v3438_v16, %v498_v27  ;;  %v735_v37 = vmul.f32 %v3508_v55, %v498_v27  ;;  %v701_v31 = vadd.f32 %v669_v7, %v634_v46  ;;  %v873_v7 = vld [vmem:[#allocation2 + $0x10f] sm:$0xff] }
  0x73   : > { %6949 = vst [vmem:[#allocation34_spill] sm:$0xff] %v3705_v35  ;;  %v3710_v30 = vmul.f32 %v3488_v47, %v871_v22  ;;  %v800_v19 = vmul.f32 %v3557_v21, %v498_v27  ;;  %v606_v43 = vmul.f32 %v3448_v23, %v499_v17  ;;  %v766_v14 = vadd.f32 %v734_v56, %v699_v51 }
  0x74   : > { %v3714_v10 = vadd.f32 %v799_v26, %v764_v0  ;;  %v3717_v6 = vmul.f32 %v3498_v53, %v871_v22  ;;  %v540_v38 = vmul.f32 %v3420_v8, %v498_v27  ;;  %v637_v36 = vadd.f32 %v605_v3, %v538_v20  ;;  %v501_v26 = vld [vmem:[#allocation2 + $0x12e] sm:$0xff] }
  0x75   : > { %6950 = vst [vmem:[#allocation35_spill] sm:$0xff] %v3710_v30  ;;  %v3721_v62 = vmul.f32 %v3465_v39, %v872_v61  ;;  %v3724_v46 = vmul.f32 %v3475_v41, %v872_v61  ;;  %v671_v49 = vmul.f32 %v3470_v40, %v499_v17  ;;  %v702_v30 = vadd.f32 %v670_v57, %v635_v63 }
  0x76   : > { %6951 = vst [vmem:[#allocation36_spill] sm:$0xff] %v3714_v10  ;;  %6952 = vst [vmem:[#allocation37_spill] sm:$0xff] %v3717_v6  ;;  %v767_v51 = vadd.f32 %v735_v37, %v700_v50  ;;  %v736_v0 = vmul.f32 %v3527_v2, %v499_v17  ;;  %v801_v56 = vmul.f32 %v3564_v28, %v499_v17 }
  0x77   : > { %6953 = vst [vmem:[#allocation38_spill] sm:$0xff] %v3721_v62  ;;  %6954 = vst [vmem:[#allocation39_spill] sm:$0xff] %v3724_v46  ;;  %v3729_v22 = vadd.f32 %v800_v19, %v765_v11  ;;  %v541_v20 = vmul.f32 %v3431_v13, %v499_v17  ;;  %v638_v27 = vadd.f32 %v606_v43, %v539_v12  ;;  %v874_v62 = vld [vmem:[#allocation2 + $0x127] sm:$0xff] }
  0x78   : > { %v607_v3 = vmul.f32 %v3425_v9, %v500_v1  ;;  %v3734_v61 = vmul.f32 %v3488_v47, %v873_v7  ;;  %v3737_v46 = vmul.f32 %v3498_v53, %v873_v7  ;;  %v672_v50 = vmul.f32 %v3438_v16, %v500_v1  ;;  %v502_v12 = vld [vmem:[#allocation2 + $0x146] sm:$0xff] }
  0x79   : > { %6955 = vst [vmem:[#allocation40_spill] sm:$0xff] %v3729_v22  ;;  %v737_v63 = vmul.f32 %v3508_v55, %v500_v1  ;;  %v703_v57 = vadd.f32 %v671_v49, %v636_v34  ;;  %v542_v11 = vmul.f32 %v3420_v8, %v500_v1  ;;  %v802_v19 = vmul.f32 %v3557_v21, %v500_v1  ;;  %v875_v1 = vld [vmem:[#allocation2 + $0x12f] sm:$0xff] }
  0x7a   : > { %6956 = vst [vmem:[#allocation41_spill] sm:$0xff] %v3734_v61  ;;  %6957 = vst [vmem:[#allocation42_spill] sm:$0xff] %v3737_v46  ;;  %v608_v17 = vmul.f32 %v3448_v23, %v501_v26  ;;  %v768_v37 = vadd.f32 %v736_v0, %v701_v31  ;;  %v3744_v43 = vadd.f32 %v801_v56, %v766_v14  ;;  %v503_v22 = vld [vmem:[#allocation2 + $0x14e] sm:$0xff] }
  0x7b   : > { %v3747_v61 = vmul.f32 %v3465_v39, %v874_v62  ;;  %v673_v7 = vmul.f32 %v3470_v40, %v501_v26  ;;  %v639_v46 = vadd.f32 %v607_v3, %v540_v38  ;;  %v3751_v6 = vmul.f32 %v3475_v41, %v874_v62  ;;  %v876_v3 = vld [vmem:[#allocation2 + $0x147] sm:$0xff] }
  0x7c   : > { %6958 = vst [vmem:[#allocation43_spill] sm:$0xff] %v3744_v43  ;;  %v738_v34 = vmul.f32 %v3527_v2, %v501_v26  ;;  %v803_v49 = vmul.f32 %v3564_v28, %v501_v26  ;;  %v704_v10 = vadd.f32 %v672_v50, %v637_v36  ;;  %v769_v35 = vadd.f32 %v737_v63, %v702_v30  ;;  %v504_v50 = vld [vmem:[#allocation2 + $0x166] sm:$0xff] }
  0x7d   : > { %6959 = vst [vmem:[#allocation44_spill] sm:$0xff] %v3747_v61  ;;  %6960 = vst [vmem:[#allocation45_spill] sm:$0xff] %v3751_v6  ;;  %v543_v31 = vmul.f32 %v3431_v13, %v501_v26  ;;  %v609_v14 = vmul.f32 %v3425_v9, %v502_v12  ;;  %v3757_v0 = vadd.f32 %v802_v19, %v767_v51 }
  0x7e   : > { %v640_v56 = vadd.f32 %v608_v17, %v541_v20  ;;  %v674_v38 = vmul.f32 %v3438_v16, %v502_v12  ;;  %v739_v62 = vmul.f32 %v3508_v55, %v502_v12  ;;  %v705_v61 = vadd.f32 %v673_v7, %v638_v27  ;;  %v877_v7 = vld [vmem:[#allocation2 + $0x14f] sm:$0xff] }
  0x7f   : > { %6961 = vst [vmem:[#allocation46_spill] sm:$0xff] %v3757_v0  ;;  %v3762_v6 = vmul.f32 %v3488_v47, %v875_v1  ;;  %v804_v43 = vmul.f32 %v3557_v21, %v502_v12  ;;  %v610_v30 = vmul.f32 %v3448_v23, %v503_v22  ;;  %v770_v36 = vadd.f32 %v738_v34, %v703_v57 }
  0x80   : > { %v3766_v26 = vadd.f32 %v803_v49, %v768_v37  ;;  %v3769_v51 = vmul.f32 %v3498_v53, %v875_v1  ;;  %v544_v20 = vmul.f32 %v3420_v8, %v502_v12  ;;  %v641_v63 = vadd.f32 %v609_v14, %v542_v11  ;;  %v505_v49 = vld [vmem:[#allocation2 + $0x16e] sm:$0xff] }
  0x81   : > { %6962 = vst [vmem:[#allocation47_spill] sm:$0xff] %v3762_v6  ;;  %v3773_v19 = vmul.f32 %v3465_v39, %v876_v3  ;;  %v3776_v27 = vmul.f32 %v3475_v41, %v876_v3  ;;  %v675_v17 = vmul.f32 %v3470_v40, %v503_v22  ;;  %v706_v6 = vadd.f32 %v674_v38, %v639_v46 }
  0x82   : > { %6963 = vst [vmem:[#allocation48_spill] sm:$0xff] %v3766_v26  ;;  %6964 = vst [vmem:[#allocation49_spill] sm:$0xff] %v3769_v51  ;;  %v771_v57 = vadd.f32 %v739_v62, %v704_v10  ;;  %v740_v37 = vmul.f32 %v3527_v2, %v503_v22  ;;  %v805_v34 = vmul.f32 %v3564_v28, %v503_v22 }
  0x83   : > { %6965 = vst [vmem:[#allocation50_spill] sm:$0xff] %v3773_v19  ;;  %6966 = vst [vmem:[#allocation51_spill] sm:$0xff] %v3776_v27  ;;  %v3781_v1 = vadd.f32 %v804_v43, %v769_v35  ;;  %v545_v11 = vmul.f32 %v3431_v13, %v503_v22  ;;  %v642_v12 = vadd.f32 %v610_v30, %v543_v31  ;;  %v878_v19 = vld [vmem:[#allocation2 + $0x167] sm:$0xff] }
  0x84   : > { %v611_v14 = vmul.f32 %v3425_v9, %v504_v50  ;;  %v3786_v3 = vmul.f32 %v3488_v47, %v877_v7  ;;  %v3789_v27 = vmul.f32 %v3498_v53, %v877_v7  ;;  %v676_v10 = vmul.f32 %v3438_v16, %v504_v50  ;;  %v506_v31 = vld [vmem:[#allocation2 + $0x186] sm:$0xff] }
  0x85   : > { %6967 = vst [vmem:[#allocation52_spill] sm:$0xff] %v3781_v1  ;;  %v741_v46 = vmul.f32 %v3508_v55, %v504_v50  ;;  %v707_v38 = vadd.f32 %v675_v17, %v640_v56  ;;  %v546_v35 = vmul.f32 %v3420_v8, %v504_v50  ;;  %v806_v43 = vmul.f32 %v3557_v21, %v504_v50  ;;  %v879_v50 = vld [vmem:[#allocation2 + $0x16f] sm:$0xff] }
  0x86   : > { %6968 = vst [vmem:[#allocation53_spill] sm:$0xff] %v3786_v3  ;;  %6969 = vst [vmem:[#allocation54_spill] sm:$0xff] %v3789_v27  ;;  %v612_v22 = vmul.f32 %v3448_v23, %v505_v49  ;;  %v772_v62 = vadd.f32 %v740_v37, %v705_v61  ;;  %v3796_v30 = vadd.f32 %v805_v34, %v770_v36  ;;  %v507_v1 = vld [vmem:[#allocation2 + $0x18e] sm:$0xff] }
  0x87   : > { %v3799_v3 = vmul.f32 %v3465_v39, %v878_v19  ;;  %v677_v7 = vmul.f32 %v3470_v40, %v505_v49  ;;  %v643_v27 = vadd.f32 %v611_v14, %v544_v20  ;;  %v3803_v51 = vmul.f32 %v3475_v41, %v878_v19  ;;  %v880_v14 = vld [vmem:[#allocation2 + $0x187] sm:$0xff] }
  0x88   : > { %6970 = vst [vmem:[#allocation55_spill] sm:$0xff] %v3796_v30  ;;  %v742_v56 = vmul.f32 %v3527_v2, %v505_v49  ;;  %v807_v17 = vmul.f32 %v3564_v28, %v505_v49  ;;  %v708_v26 = vadd.f32 %v676_v10, %v641_v63  ;;  %v773_v0 = vadd.f32 %v741_v46, %v706_v6  ;;  %v508_v10 = vld [vmem:[#allocation2 + $0x1a6] sm:$0xff] }
  0x89   : > { %6971 = vst [vmem:[#allocation56_spill] sm:$0xff] %v3799_v3  ;;  %6972 = vst [vmem:[#allocation57_spill] sm:$0xff] %v3803_v51  ;;  %v547_v61 = vmul.f32 %v3431_v13, %v505_v49  ;;  %v613_v36 = vmul.f32 %v3425_v9, %v506_v31  ;;  %v3809_v37 = vadd.f32 %v806_v43, %v771_v57 }
  0x8a   : > { %v644_v34 = vadd.f32 %v612_v22, %v545_v11  ;;  %v678_v20 = vmul.f32 %v3438_v16, %v506_v31  ;;  %v743_v19 = vmul.f32 %v3508_v55, %v506_v31  ;;  %v709_v3 = vadd.f32 %v677_v7, %v642_v12  ;;  %v881_v7 = vld [vmem:[#allocation2 + $0x18f] sm:$0xff] }
  0x8b   : > { %6973 = vst [vmem:[#allocation58_spill] sm:$0xff] %v3809_v37  ;;  %v3814_v51 = vmul.f32 %v3488_v47, %v879_v50  ;;  %v808_v30 = vmul.f32 %v3557_v21, %v506_v31  ;;  %v614_v6 = vmul.f32 %v3448_v23, %v507_v1  ;;  %v774_v63 = vadd.f32 %v742_v56, %v707_v38 }
  0x8c   : > { %v3818_v49 = vadd.f32 %v807_v17, %v772_v62  ;;  %v3821_v57 = vmul.f32 %v3498_v53, %v879_v50  ;;  %v548_v11 = vmul.f32 %v3420_v8, %v506_v31  ;;  %v645_v46 = vadd.f32 %v613_v36, %v546_v35  ;;  %v509_v17 = vld [vmem:[#allocation2 + $0x1ae] sm:$0xff] }
  0x8d   : > { %6974 = vst [vmem:[#allocation59_spill] sm:$0xff] %v3814_v51  ;;  %v3825_v43 = vmul.f32 %v3465_v39, %v880_v14  ;;  %v3828_v12 = vmul.f32 %v3475_v41, %v880_v14  ;;  %v679_v22 = vmul.f32 %v3470_v40, %v507_v1  ;;  %v710_v51 = vadd.f32 %v678_v20, %v643_v27 }
  0x8e   : > { %6975 = vst [vmem:[#allocation60_spill] sm:$0xff] %v3818_v49  ;;  %6976 = vst [vmem:[#allocation61_spill] sm:$0xff] %v3821_v57  ;;  %v775_v38 = vadd.f32 %v743_v19, %v708_v26  ;;  %v744_v62 = vmul.f32 %v3527_v2, %v507_v1  ;;  %v809_v56 = vmul.f32 %v3564_v28, %v507_v1 }
  0x8f   : > { %6977 = vst [vmem:[#allocation62_spill] sm:$0xff] %v3825_v43  ;;  %6978 = vst [vmem:[#allocation63_spill] sm:$0xff] %v3828_v12  ;;  %v3833_v50 = vadd.f32 %v808_v30, %v773_v0  ;;  %v549_v35 = vmul.f32 %v3431_v13, %v507_v1  ;;  %v646_v31 = vadd.f32 %v614_v6, %v547_v61  ;;  %v882_v43 = vld [vmem:[#allocation2 + $0x1a7] sm:$0xff] }
  0x90   : > { %v615_v36 = vmul.f32 %v3425_v9, %v508_v10  ;;  %v3838_v14 = vmul.f32 %v3488_v47, %v881_v7  ;;  %v3841_v12 = vmul.f32 %v3498_v53, %v881_v7  ;;  %v680_v26 = vmul.f32 %v3438_v16, %v508_v10  ;;  %v510_v61 = vld [vmem:[#allocation2 + $0x1c6] sm:$0xff] }
  0x91   : > { %6979 = vst [vmem:[#allocation64_spill] sm:$0xff] %v3833_v50  ;;  %v745_v27 = vmul.f32 %v3508_v55, %v508_v10  ;;  %v711_v20 = vadd.f32 %v679_v22, %v644_v34  ;;  %v550_v0 = vmul.f32 %v3420_v8, %v508_v10  ;;  %v810_v30 = vmul.f32 %v3557_v21, %v508_v10  ;;  %v883_v10 = vld [vmem:[#allocation2 + $0x1af] sm:$0xff] }
  0x92   : > { %6980 = vst [vmem:[#allocation65_spill] sm:$0xff] %v3838_v14  ;;  %6981 = vst [vmem:[#allocation66_spill] sm:$0xff] %v3841_v12  ;;  %v616_v1 = vmul.f32 %v3448_v23, %v509_v17  ;;  %v776_v19 = vadd.f32 %v744_v62, %v709_v3  ;;  %v3848_v6 = vadd.f32 %v809_v56, %v774_v63  ;;  %v511_v50 = vld [vmem:[#allocation2 + $0x1ce] sm:$0xff] }
  0x93   : > { %v3851_v14 = vmul.f32 %v3465_v39, %v882_v43  ;;  %v681_v7 = vmul.f32 %v3470_v40, %v509_v17  ;;  %v647_v12 = vadd.f32 %v615_v36, %v548_v11  ;;  %v3855_v57 = vmul.f32 %v3475_v41, %v882_v43  ;;  %v884_v36 = vld [vmem:[#allocation2 + $0x1c7] sm:$0xff] }
  0x94   : > { %6982 = vst [vmem:[#allocation67_spill] sm:$0xff] %v3848_v6  ;;  %v746_v34 = vmul.f32 %v3527_v2, %v509_v17  ;;  %v811_v22 = vmul.f32 %v3564_v28, %v509_v17  ;;  %v712_v49 = vadd.f32 %v680_v26, %v645_v46  ;;  %v777_v37 = vadd.f32 %v745_v27, %v710_v51  ;;  %v512_v26 = vld [vmem:[#allocation2 + $0x1e6] sm:$0xff] }
  0x95   : > { %6983 = vst [vmem:[#allocation68_spill] sm:$0xff] %v3855_v57  ;;  %v551_v3 = vmul.f32 %v3431_v13, %v509_v17  ;;  %v617_v63 = vmul.f32 %v3425_v9, %v510_v61  ;;  %v3861_v62 = vadd.f32 %v810_v30, %v775_v38  ;;  %v648_v56 = vadd.f32 %v616_v1, %v549_v35 }
  0x96   : > { %v682_v11 = vmul.f32 %v3438_v16, %v510_v61  ;;  %v747_v43 = vmul.f32 %v3508_v55, %v510_v61  ;;  %v713_v57 = vadd.f32 %v681_v7, %v646_v31  ;;  %v3866_v6 = vmul.f32 %v3488_v47, %v883_v10  ;;  %v885_v7 = vld [vmem:[#allocation2 + $0x1cf] sm:$0xff] }
  0x97   : > { %6984 = vst [vmem:[#allocation69_spill] sm:$0xff] %v3861_v62  ;;  %v812_v25 = vmul.f32 %v3557_v21, %v510_v61  ;;  %v618_v51 = vmul.f32 %v3448_v23, %v511_v50  ;;  %v778_v46 = vadd.f32 %v746_v34, %v711_v20  ;;  %v3870_v17 = vadd.f32 %v811_v22, %v776_v19 }
  0x98   : > { %6985 = vst [vmem:[#allocation70_spill] sm:$0xff] %v3866_v6  ;;  %v3873_v38 = vmul.f32 %v3498_v53, %v883_v10  ;;  %v552_v35 = vmul.f32 %v3420_v8, %v510_v61  ;;  %v649_v27 = vadd.f32 %v617_v63, %v550_v0  ;;  %v3877_v30 = vmul.f32 %v3465_v39, %v884_v36  ;;  %v886_v10 = vld [vmem:[#allocation2 + $0x1e7] sm:$0xff] }
  0x99   : > { %6986 = vst [vmem:[#allocation71_spill] sm:$0xff] %v3870_v17  ;;  %v683_v31 = vmul.f32 %v3470_v40, %v511_v50  ;;  %v748_v1 = vmul.f32 %v3527_v2, %v511_v50  ;;  %v714_v6 = vadd.f32 %v682_v11, %v647_v12  ;;  %v779_v62 = vadd.f32 %v747_v43, %v712_v49  ;;  %v514_v63 = vld [vmem:[#allocation2 + $0x206] sm:$0xff]  ;;  %v513_v43 = vld [vmem:[#allocation2 + $0x1ee] sm:$0xff] }
  0x9a   : > { %6987 = vst [vmem:[#allocation72_spill] sm:$0xff] %v3873_v38  ;;  %6988 = vst [vmem:[#allocation73_spill] sm:$0xff] %v3877_v30  ;;  %v3882_v20 = vmul.f32 %v3475_v41, %v884_v36  ;;  %v813_v19 = vmul.f32 %v3564_v28, %v511_v50  ;;  %v3885_v34 = vadd.f32 %v812_v25, %v777_v37 }
  0x9b   : > { %v553_v61 = vmul.f32 %v3431_v13, %v511_v50  ;;  %v650_v0 = vadd.f32 %v618_v51, %v551_v3  ;;  %v619_v22 = vmul.f32 %v3425_v9, %v512_v26  ;;  %v3890_v30 = vmul.f32 %v3488_v47, %v885_v7 }
  0x9c   : > { %6989 = vst [vmem:[#allocation74_spill] sm:$0xff] %v3882_v20  ;;  %6990 = vst [vmem:[#allocation75_spill] sm:$0xff] %v3885_v34  ;;  %v3893_v12 = vmul.f32 %v3498_v53, %v885_v7  ;;  %v554_v49 = vmul.f32 %v3420_v8, %v512_v26  ;;  %v684_v11 = vmul.f32 %v3438_v16, %v512_v26  ;;  %v887_v7 = vld [vmem:[#allocation2 + $0x1ef] sm:$0xff] }
  0x9d   : > { %6991 = vst [vmem:[#allocation76_spill] sm:$0xff] %v3890_v30  ;;  %v715_v25 = vadd.f32 %v683_v31, %v648_v56  ;;  %v780_v37 = vadd.f32 %v748_v1, %v713_v57  ;;  %v749_v50 = vmul.f32 %v3508_v55, %v512_v26  ;;  %v814_v3 = vmul.f32 %v3557_v21, %v512_v26  ;;  %v515_v1 = vld [vmem:[#allocation2 + $0x20e] sm:$0xff]  ;;  %v516_v26 = vld [vmem:[#allocation2 + $0x226] sm:$0xff] }
  0x9e   : > { %6992 = vst [vmem:[#allocation77_spill] sm:$0xff] %v3893_v12  ;;  %v3899_v36 = vadd.f32 %v813_v19, %v778_v46  ;;  %v3902_v51 = vmul.f32 %v3465_v39, %v886_v10  ;;  %v3905_v30 = vmul.f32 %v3475_v41, %v886_v10  ;;  %v621_v8 = vmul.f32 %v3425_v9, %v514_v63 }
  0x9f   : > { %v555_v12 = vmul.f32 %v3431_v13, %v513_v43  ;;  %v815_v56 = vmul.f32 %v3564_v28, %v513_v43  ;;  %v651_v57 = vadd.f32 %v619_v22, %v552_v35  ;;  %v686_v31 = vmul.f32 %v3438_v16, %v514_v63 }
  0xa0   : > { %6993 = vst [vmem:[#allocation78_spill] sm:$0xff] %v3899_v36  ;;  %6994 = vst [vmem:[#allocation79_spill] sm:$0xff] %v3902_v51  ;;  %v620_v46 = vmul.f32 %v3448_v23, %v513_v43  ;;  %v685_v19 = vmul.f32 %v3470_v40, %v513_v43  ;;  %v716_v51 = vadd.f32 %v684_v11, %v649_v27 }
  0xa1   : > { %6995 = vst [vmem:[#allocation80_spill] sm:$0xff] %v3905_v30  ;;  %v751_v10 = vmul.f32 %v3508_v55, %v514_v63  ;;  %v888_v30 = vld [vmem:[#allocation2 + $0x207] sm:$0xff]  ;;  %v3914_v20 = vadd.f32 %v814_v3, %v779_v62  ;;  %v750_v9 = vmul.f32 %v3527_v2, %v513_v43  ;;  %v3918_v13 = vmul.f32 %v3488_v47, %v887_v7 }
  0xa2   : > { %v781_v35 = vadd.f32 %v749_v50, %v714_v6  ;;  %v653_v22 = vadd.f32 %v621_v8, %v554_v49  ;;  %v816_v38 = vmul.f32 %v3557_v21, %v514_v63  ;;  %v622_v36 = vmul.f32 %v3448_v23, %v515_v1  ;;  %v518_v43 = vld [vmem:[#allocation2 + $0x246] sm:$0xff]  ;;  %v889_v49 = vld [vmem:[#allocation2 + $0x20f] sm:$0xff] }
  0xa3   : > { %6996 = vst [vmem:[#allocation81_spill] sm:$0xff] %v3914_v20  ;;  %6997 = vst [vmem:[#allocation82_spill] sm:$0xff] %v3918_v13  ;;  %v688_v34 = vmul.f32 %v3438_v16, %v516_v26  ;;  %v3923_v17 = vadd.f32 %v815_v56, %v780_v37  ;;  %v3926_v27 = vmul.f32 %v3498_v53, %v887_v7  ;;  %v856_v16 = vld [vmem:[#allocation2 + $0x7] sm:$0xff]  ;;  %v4149_v20 = vld [vmem:[#allocation2 + $0x70] sm:$0xff] }
  0xa4   : > { %v718_v62 = vadd.f32 %v686_v31, %v651_v57  ;;  %v3929_v11 = vmul.f32 %v3475_v41, %v888_v30  ;;  %v783_v3 = vadd.f32 %v751_v10, %v716_v51  ;;  %v3932_v6 = vmul.f32 %v3480_v42, %v888_v30  ;;  %v3938_v56 = vld [vmem:[#allocation2 + $0x27] sm:$0xff] }
  0xa5   : > { %6998 = vst [vmem:[#allocation83_spill] sm:$0xff] %v3923_v17  ;;  %6999 = vst [vmem:[#allocation84_spill] sm:$0xff] %v3926_v27  ;;  %v753_v63 = vmul.f32 %v3508_v55, %v516_v26  ;;  %v818_v23 = vmul.f32 %v3557_v21, %v516_v26  ;;  %v652_v37 = vadd.f32 %v620_v46, %v553_v61  ;;  %v517_v10 = vld [vmem:[#allocation2 + $0x22e] sm:$0xff]  ;;  %v520_v61 = vld [vmem:[#allocation2 + $0x266] sm:$0xff] }
  0xa6   : > { %7000 = vst [vmem:[#allocation85_spill] sm:$0xff] %v3929_v11  ;;  %7001 = vst [vmem:[#allocation86_spill] sm:$0xff] %v3932_v6  ;;  %v687_v50 = vmul.f32 %v3470_v40, %v515_v1  ;;  %v717_v7 = vadd.f32 %v685_v19, %v650_v0  ;;  %v752_v8 = vmul.f32 %v3527_v2, %v515_v1  ;;  %v4110_v6 = vld [vmem:[#allocation2 + $0x68] sm:$0xff]  ;;  %v4147_v17 = vld [vmem:[#allocation2 + $0x50] sm:$0xff] }
  0xa7   : > { %v3940_v57 = vadd.f32 %v816_v38, %v781_v35  ;;  %v654_v51 = vadd.f32 %v622_v36, %v555_v12  ;;  %v720_v31 = vadd.f32 %v688_v34, %v653_v22  ;;  %v755_v30 = vmul.f32 %v3508_v55, %v518_v43  ;;  %v890_v38 = vld [vmem:[#allocation2 + $0x227] sm:$0xff] }
  0xa8   : > { %v782_v13 = vadd.f32 %v750_v9, %v715_v25  ;;  %v817_v11 = vmul.f32 %v3564_v28, %v515_v1  ;;  %v3945_v26 = vmul.f32 %v3498_v53, %v889_v49  ;;  %v899_v0 = vmul.f32 %v3465_v39, %v856_v16  ;;  %v3954_v25 = vld [vmem:[%s6590_s1 + $0x100] sm:$0xff]  ;;  %v519_v36 = vld [vmem:[#allocation2 + $0x24e] sm:$0xff] }
  0xa9   : > { %7002 = vst [vmem:[#allocation87_spill] sm:$0xff] %v3940_v57  ;;  %v785_v46 = vadd.f32 %v753_v63, %v718_v62  ;;  %v820_v19 = vmul.f32 %v3557_v21, %v518_v43  ;;  %v850_v27 = vadd.f32 %v818_v23, %v783_v3  ;;  %v966_v34 = vmul.f32 %v3475_v41, %v3938_v56  ;;  %v521_v62 = vld [vmem:[#allocation2 + $0x26e] sm:$0xff] }
  0xaa   : > { %7003 = vst [vmem:[#allocation88_spill] sm:$0xff] %v3945_v26  ;;  %v719_v12 = vadd.f32 %v687_v50, %v652_v37  ;;  %v784_v55 = vadd.f32 %v752_v8, %v717_v7  ;;  %7004 = vst [vmem:[#allocation89_spill] sm:$0xff] %v3954_v25  ;;  %v689_v1 = vmul.f32 %v3470_v40, %v517_v10  ;;  %v3966_v43 = vld [vmem:[%s6590_s1 + $0x150] sm:$0xff]  ;;  %v1231_v3 = vld [vmem:[#allocation2 + $0x8] sm:$0xff] }
  0xab   : > { %v931_v39 = vadd.f32 %v899_v0, %v3610_v48  ;;  %v3959_v9 = vmul.f32 %v3503_v54, %v889_v49  ;;  %v787_v35 = vadd.f32 %v755_v30, %v720_v31  ;;  %v822_v22 = vmul.f32 %v3557_v21, %v520_v61  ;;  %7006 = vst [vmem:[#allocation91_spill] sm:$0xff] %v3966_v43  ;;  %v3976_v49 = vld [vmem:[#allocation2 + $0x28] sm:$0xff]  ;;  %v3999_v7 = vld [vmem:[%s6590_s1 + $0xc0] sm:$0xff]  ;;  %v4012_v30 = vld [vmem:[%s6590_s1 + $0x70] sm:$0xff] }
  0xac   : > { %v754_v41 = vmul.f32 %v3527_v2, %v517_v10  ;;  %v3968_v63 = vadd.f32 %v817_v11, %v782_v13  ;;  %v3971_v40 = vmul.f32 %v3480_v42, %v890_v38  ;;  %v3974_v54 = vmul.f32 %v3954_v25, %v890_v38  ;;  %v3978_v21 = vld [vmem:[#allocation2 + $0x48] sm:$0xff]  ;;  %v3994_v11 = vld [vmem:[%s6590_s1 + $0x20] sm:$0xff]  ;;  %7014 = vst [vmem:[#allocation99_spill] sm:$0xff] %v3999_v7  ;;  %v4039_v38 = vld [vmem:[%s6590_s1 + $0x30] sm:$0xff] }
  0xad   : > { %7005 = vst [vmem:[#allocation90_spill] sm:$0xff] %v3959_v9  ;;  %v998_v48 = vadd.f32 %v966_v34, %v931_v39  ;;  %v857_v23 = vld [vmem:[#allocation2 + $0xf] sm:$0xff]  ;;  %v3982_v37 = vadd.f32 %v820_v19, %v785_v46  ;;  %v3985_v50 = vadd.f32 %v3851_v14, %v850_v27  ;;  %v3988_v13 = vmul.f32 %v3527_v2, %v519_v36 }
  0xae   : > { %7007 = vst [vmem:[#allocation92_spill] sm:$0xff] %v3968_v63  ;;  %7008 = vst [vmem:[#allocation93_spill] sm:$0xff] %v3971_v40  ;;  %v3980_v16 = vld [vmem:[#allocation2 + $0x2f] sm:$0xff]  ;;  %v819_v42 = vmul.f32 %v3564_v28, %v517_v10  ;;  %v4001_v31 = vadd.f32 %v689_v1, %v654_v51  ;;  %v4004_v14 = vmul.f32 %v3564_v28, %v519_v36  ;;  %v4126_v63 = vld [vmem:[%s6590_s1 + $0x180] sm:$0xff] }
  0xaf   : > { %7009 = vst [vmem:[#allocation94_spill] sm:$0xff] %v3974_v54  ;;  %7010 = vst [vmem:[#allocation95_spill] sm:$0xff] %v3982_v37  ;;  %v1606_v8 = vld [vmem:[#allocation2 + $0x9] sm:$0xff]  ;;  %v1065_v2 = vadd.f32 %v3514_v59, %v998_v48  ;;  %v1100_v27 = vmul.f32 %v3954_v25, %v3516_v60  ;;  %v4020_v51 = vadd.f32 %v822_v22, %v787_v35  ;;  %v4032_v60 = vld [vmem:[%s6590_s1 + $0x160] sm:$0xff] }
  0xb0   : > { %7011 = vst [vmem:[#allocation96_spill] sm:$0xff] %v3985_v50  ;;  %7012 = vst [vmem:[#allocation97_spill] sm:$0xff] %v3988_v13  ;;  %v4014_v10 = vld [vmem:[#allocation2 + $0x29] sm:$0xff]  ;;  %v4022_v46 = vadd.f32 %v754_v41, %v719_v12  ;;  %v4049_v12 = vld [vmem:[%s6590_s1 + $0x120] sm:$0xff]  ;;  %v900_v1 = vmul.f32 %v3488_v47, %v857_v23  ;;  %v967_v39 = vmul.f32 %v3498_v53, %v3980_v16 }
  0xb1   : > { %7013 = vst [vmem:[#allocation98_spill] sm:$0xff] %v3994_v11  ;;  %7015 = vst [vmem:[#allocation100_spill] sm:$0xff] %v4001_v31  ;;  %v4016_v61 = vld [vmem:[#allocation2 + $0x49] sm:$0xff]  ;;  %v4060_v35 = vmul.f32 %v3564_v28, %v521_v62  ;;  %v1132_v41 = vadd.f32 %v1100_v27, %v1065_v2  ;;  %v1167_v48 = vmul.f32 %v3966_v43, %v3572_v33  ;;  %v4073_v47 = vld [vmem:[%s6590_s1 + $0x80] sm:$0xff] }
  0xb2   : > { %7016 = vst [vmem:[#allocation101_spill] sm:$0xff] %v4004_v14  ;;  %7017 = vst [vmem:[#allocation102_spill] sm:$0xff] %v4012_v30  ;;  %v4018_v0 = vld [vmem:[#allocation2 + $0x69] sm:$0xff]  ;;  %v1274_v26 = vmul.f32 %v3994_v11, %v1231_v3  ;;  %v4079_v62 = vadd.f32 %v819_v42, %v784_v55  ;;  %v1341_v2 = vmul.f32 %v4012_v30, %v3976_v49  ;;  %v4102_v42 = vld [vmem:[%s6590_s1 + $0xe0] sm:$0xff] }
  0xb3   : > { %7018 = vst [vmem:[#allocation103_spill] sm:$0xff] %v4018_v0  ;;  %7019 = vst [vmem:[#allocation104_spill] sm:$0xff] %v4020_v51  ;;  %v4027_v59 = vld [vmem:[%s6590_s1 + $0x110] sm:$0xff]  ;;  %v4065_v22 = vld [vmem:[%s6590_s1 + $0x108] sm:$0xff]  ;;  %v1408_v27 = vmul.f32 %v3999_v7, %v3978_v21  ;;  %v1199_v54 = vadd.f32 %v1167_v48, %v1132_v41  ;;  %v4121_v50 = vmul.f32 %v4039_v38, %v1606_v8 }
  0xb4   : > { %7020 = vst [vmem:[#allocation105_spill] sm:$0xff] %v4022_v46  ;;  %7021 = vst [vmem:[#allocation106_spill] sm:$0xff] %v4027_v59  ;;  %v4034_v19 = vld [vmem:[#allocation2 + $0x89] sm:$0xff]  ;;  %v4092_v51 = vld [vmem:[%s6590_s1 + $0x40] sm:$0xff]  ;;  %v1475_v14 = vmul.f32 %v4110_v6, %v4027_v59  ;;  %v4135_v41 = vmul.f32 %v4073_v47, %v4014_v10  ;;  %v4143_v8 = vmul.f32 %v4049_v12, %v4018_v0 }
  0xb5   : > { %7022 = vst [vmem:[#allocation107_spill] sm:$0xff] %v4032_v60  ;;  %7023 = vst [vmem:[#allocation108_spill] sm:$0xff] %v4034_v19  ;;  %v4044_v34 = vld [vmem:[%s6590_s1 + $0xd0] sm:$0xff]  ;;  %v4114_v46 = vld [vmem:[#allocation2 + $0x88] sm:$0xff]  ;;  %v1306_v13 = vadd.f32 %v1274_v26, %v1199_v54 }
  0xb6   : > { %7024 = vst [vmem:[#allocation109_spill] sm:$0xff] %v4039_v38  ;;  %7025 = vst [vmem:[#allocation110_spill] sm:$0xff] %v4044_v34  ;;  %v4054_v36 = vld [vmem:[%s6590_s1 + $0x170] sm:$0xff]  ;;  %v4118_v37 = vmul.f32 %v4114_v46, %v4032_v60  ;;  %v4139_v48 = vmul.f32 %v4044_v34, %v4016_v61  ;;  %v4170_v26 = vld [vmem:[%s6590_s1 + $0x78] sm:$0xff] }
  0xb7   : > { %7026 = vst [vmem:[#allocation111_spill] sm:$0xff] %v4049_v12  ;;  %7027 = vst [vmem:[#allocation112_spill] sm:$0xff] %v4054_v36  ;;  %v1981_v53 = vld [vmem:[#allocation2 + $0xa] sm:$0xff]  ;;  %v4153_v31 = vmul.f32 %v4054_v36, %v4034_v19 }
  0xb8   : > { %7028 = vst [vmem:[#allocation113_spill] sm:$0xff] %v4060_v35  ;;  %7029 = vst [vmem:[#allocation114_spill] sm:$0xff] %v4065_v22  ;;  %v4075_v23 = vld [vmem:[#allocation2 + $0x2a] sm:$0xff]  ;;  %v932_v35 = vadd.f32 %v900_v1, %v3630_v45  ;;  %v4131_v45 = vld [vmem:[%s6590_s1 + $0x158] sm:$0xff]  ;;  %v4156_v52 = vmul.f32 %v4092_v51, %v1981_v53 }
  0xb9   : > { %7030 = vst [vmem:[#allocation115_spill] sm:$0xff] %v4073_v47  ;;  %7031 = vst [vmem:[#allocation116_spill] sm:$0xff] %v4075_v23  ;;  %v4077_v28 = vld [vmem:[#allocation2 + $0x4a] sm:$0xff] }
  0xba   : > { %7032 = vst [vmem:[#allocation117_spill] sm:$0xff] %v4077_v28  ;;  %7033 = vst [vmem:[#allocation118_spill] sm:$0xff] %v4079_v62  ;;  %v4085_v40 = vld [vmem:[#allocation2 + $0x6a] sm:$0xff]  ;;  %v999_v62 = vadd.f32 %v967_v39, %v932_v35  ;;  %v4180_v35 = vld [vmem:[%s6590_s1 + $0x118] sm:$0xff]  ;;  %v4184_v53 = vmul.f32 %v4102_v42, %v4077_v28 }
  0xbb   : > { %7034 = vst [vmem:[#allocation119_spill] sm:$0xff] %v4085_v40  ;;  %v4087_v3 = vld [vmem:[#allocation2 + $0x8a] sm:$0xff]  ;;  %7036 = vst [vmem:[#allocation121_spill] sm:$0xff] %v4092_v51 }
  0xbc   : > { %7035 = vst [vmem:[#allocation120_spill] sm:$0xff] %v4087_v3  ;;  %v4097_v55 = vld [vmem:[%s6590_s1 + $0x90] sm:$0xff]  ;;  %7038 = vst [vmem:[#allocation123_spill] sm:$0xff] %v4102_v42  ;;  %v4165_v39 = vld [vmem:[%s6590_s1 + $0x28] sm:$0xff] }
  0xbd   : > { %7037 = vst [vmem:[#allocation122_spill] sm:$0xff] %v4097_v55  ;;  %v4107_v9 = vld [vmem:[%s6590_s1 + $0x130] sm:$0xff]  ;;  %7040 = vst [vmem:[#allocation125_spill] sm:$0xff] %v4126_v63  ;;  %v4160_v34 = vmul.f32 %v4097_v55, %v4075_v23  ;;  %v4175_v54 = vld [vmem:[%s6590_s1 + $0xc8] sm:$0xff] }
  0xbe   : > { %7039 = vst [vmem:[#allocation124_spill] sm:$0xff] %v4107_v9  ;;  %7041 = vst [vmem:[#allocation126_spill] sm:$0xff] %v4131_v45  ;;  %v1232_v1 = vld [vmem:[#allocation2 + $0x10] sm:$0xff]  ;;  %v4192_v55 = vld [vmem:[%s6590_s1 + $0x168] sm:$0xff] }
  0xbf   : > { %7042 = vst [vmem:[#allocation127_spill] sm:$0xff] %v4143_v8  ;;  %v4145_v57 = vld [vmem:[#allocation2 + $0x30] sm:$0xff]  ;;  %7043 = vst [vmem:[#allocation128_spill] sm:$0xff] %v4153_v31 }
  0xc0   : > { %7044 = vst [vmem:[#allocation129_spill] sm:$0xff] %v4156_v52  ;;  %7045 = vst [vmem:[#allocation130_spill] sm:$0xff] %v4160_v34  ;;  %v1066_v34 = vadd.f32 %v3533_v5, %v999_v62  ;;  %v1101_v52 = vmul.f32 %v4065_v22, %v3542_v15  ;;  %v1607_v31 = vld [vmem:[#allocation2 + $0x11] sm:$0xff]  ;;  %v4202_v5 = vmul.f32 %v4107_v9, %v4085_v40 }
  0xc1   : > { %7046 = vst [vmem:[#allocation131_spill] sm:$0xff] %v4165_v39  ;;  %7047 = vst [vmem:[#allocation132_spill] sm:$0xff] %v4170_v26  ;;  %v4194_v51 = vld [vmem:[#allocation2 + $0x31] sm:$0xff]  ;;  %v4206_v15 = vmul.f32 %v4126_v63, %v4087_v3  ;;  %v1168_v62 = vmul.f32 %v4131_v45, %v3581_v44  ;;  %v4227_v44 = vld [vmem:[%s6590_s1 + $0x128] sm:$0xff] }
  0xc2   : > { %7048 = vst [vmem:[#allocation133_spill] sm:$0xff] %v4175_v54  ;;  %7049 = vst [vmem:[#allocation134_spill] sm:$0xff] %v4180_v35  ;;  %v3049_v23 = vld [vmem:[%s6590_s1 + $0x10] sm:$0xff]  ;;  %v1133_v12 = vadd.f32 %v1101_v52, %v1066_v34  ;;  %v4246_v3 = vld [vmem:[%s6590_s1 + $0x38] sm:$0xff] }
  0xc3   : > { %7050 = vst [vmem:[#allocation135_spill] sm:$0xff] %v4184_v53  ;;  %7051 = vst [vmem:[#allocation136_spill] sm:$0xff] %v4192_v55  ;;  %v901_v42 = vmul.f32 %v3049_v23, %v3938_v56  ;;  %v1373_v53 = vadd.f32 %v1341_v2, %v1306_v13  ;;  %v4210_v28 = vld [vmem:[#allocation2 + $0x51] sm:$0xff]  ;;  %v1275_v56 = vmul.f32 %v4165_v39, %v1232_v1 }
  0xc4   : > { %7052 = vst [vmem:[#allocation137_spill] sm:$0xff] %v4202_v5  ;;  %7053 = vst [vmem:[#allocation138_spill] sm:$0xff] %v4206_v15  ;;  %v4212_v36 = vld [vmem:[#allocation2 + $0x71] sm:$0xff]  ;;  %v1342_v13 = vmul.f32 %v4170_v26, %v4145_v57  ;;  %v1409_v1 = vmul.f32 %v4175_v54, %v4147_v17  ;;  %v1476_v15 = vmul.f32 %v4180_v35, %v4149_v20 }
  0xc5   : > { %7054 = vst [vmem:[#allocation139_spill] sm:$0xff] %v4212_v36  ;;  %v4214_v8 = vld [vmem:[#allocation2 + $0x91] sm:$0xff]  ;;  %7057 = vst [vmem:[#allocation142_spill] sm:$0xff] %v4227_v44  ;;  %v933_v52 = vadd.f32 %v901_v42, %v3647_v32  ;;  %v1440_v34 = vadd.f32 %v1408_v27, %v1373_v53  ;;  %v4251_v32 = vld [vmem:[%s6590_s1 + $0x88] sm:$0xff]  ;;  %v1200_v42 = vadd.f32 %v1168_v62, %v1133_v12 }
  0xc6   : > { %7055 = vst [vmem:[#allocation140_spill] sm:$0xff] %v4214_v8  ;;  %v4222_v23 = vld [vmem:[%s6590_s1 + $0xd8] sm:$0xff]  ;;  %v4239_v63 = vld [vmem:[#allocation2 + $0x90] sm:$0xff]  ;;  %7060 = vst [vmem:[#allocation145_spill] sm:$0xff] %v4246_v3  ;;  %v1650_v53 = vmul.f32 %v4246_v3, %v1607_v31  ;;  %v4256_v5 = vmul.f32 %v4251_v32, %v4194_v51  ;;  %v4274_v31 = vmul.f32 %v4227_v44, %v4212_v36 }
  0xc7   : > { %7056 = vst [vmem:[#allocation141_spill] sm:$0xff] %v4222_v23  ;;  %v4232_v2 = vld [vmem:[%s6590_s1 + $0x178] sm:$0xff]  ;;  %7059 = vst [vmem:[#allocation144_spill] sm:$0xff] %v4239_v63  ;;  %v1543_v9 = vmul.f32 %v4239_v63, %v4192_v55  ;;  %v4265_v63 = vld [vmem:[%s6590_s1 + $0xe8] sm:$0xff]  ;;  %v1000_v35 = vadd.f32 %v3511_v58, %v933_v52  ;;  %v1507_v54 = vadd.f32 %v1475_v14, %v1440_v34 }
  0xc8   : > { %7058 = vst [vmem:[#allocation143_spill] sm:$0xff] %v4232_v2  ;;  %7061 = vst [vmem:[#allocation146_spill] sm:$0xff] %v4251_v32  ;;  %v1982_v27 = vld [vmem:[#allocation2 + $0x12] sm:$0xff]  ;;  %v4270_v12 = vmul.f32 %v4222_v23, %v4210_v28  ;;  %v4278_v62 = vmul.f32 %v4232_v2, %v4214_v8  ;;  %v4287_v58 = vld [vmem:[%s6590_s1 + $0x48] sm:$0xff]  ;;  %v1307_v14 = vadd.f32 %v1275_v56, %v1200_v42 }
  0xc9   : > { %v4258_v40 = vld [vmem:[#allocation2 + $0x32] sm:$0xff]  ;;  %7063 = vst [vmem:[#allocation148_spill] sm:$0xff] %v4265_v63  ;;  %7066 = vst [vmem:[#allocation151_spill] sm:$0xff] %v4287_v58  ;;  %v4290_v52 = vmul.f32 %v4287_v58, %v1982_v27  ;;  %v4305_v44 = vld [vmem:[%s6590_s1 + $0x188] sm:$0xff]  ;;  %v1067_v56 = vadd.f32 %v3550_v18, %v1000_v35  ;;  %v1102_v27 = vmul.f32 %v3954_v25, %v3572_v33 }
  0xca   : > { %v4260_v55 = vld [vmem:[#allocation2 + $0x52] sm:$0xff]  ;;  %7069 = vst [vmem:[#allocation154_spill] sm:$0xff] %v4305_v44  ;;  %v1574_v42 = vadd.f32 %v4118_v37, %v1507_v54  ;;  %v1374_v18 = vadd.f32 %v1342_v13, %v1307_v14  ;;  %v1169_v33 = vmul.f32 %v3966_v43, %v3614_v24  ;;  %v4325_v37 = vld [vmem:[#allocation2 + $0xa8] sm:$0xff]  ;;  %v1276_v54 = vmul.f32 %v3994_v11, %v3976_v49 }
  0xcb   : > { %7062 = vst [vmem:[#allocation147_spill] sm:$0xff] %v4260_v55  ;;  %v4280_v32 = vld [vmem:[#allocation2 + $0x72] sm:$0xff]  ;;  %v4317_v8 = vmul.f32 %v4265_v63, %v4260_v55  ;;  %v1134_v35 = vadd.f32 %v1102_v27, %v1067_v56  ;;  %v1343_v24 = vmul.f32 %v4012_v30, %v3978_v21  ;;  %v1410_v49 = vmul.f32 %v4110_v6, %v3999_v7 }
  0xcc   : > { %7064 = vst [vmem:[#allocation149_spill] sm:$0xff] %v4280_v32  ;;  %v4282_v3 = vld [vmem:[#allocation2 + $0x92] sm:$0xff]  ;;  %v1441_v13 = vadd.f32 %v1409_v1, %v1374_v18  ;;  %v1477_v14 = vmul.f32 %v4114_v46, %v4027_v59  ;;  %v1544_v56 = vmul.f32 %v4032_v60, %v4325_v37  ;;  %v1718_v1 = vmul.f32 %v4073_v47, %v4016_v61 }
  0xcd   : > { %7065 = vst [vmem:[#allocation150_spill] sm:$0xff] %v4282_v3  ;;  %v4295_v34 = vld [vmem:[%s6590_s1 + $0x98] sm:$0xff]  ;;  %v4336_v55 = vmul.f32 %v4305_v44, %v4282_v3 }
  0xce   : > { %7067 = vst [vmem:[#allocation152_spill] sm:$0xff] %v4295_v34  ;;  %v4300_v2 = vld [vmem:[%s6590_s1 + $0x138] sm:$0xff]  ;;  %v4313_v58 = vmul.f32 %v4295_v34, %v4258_v40  ;;  %v1681_v34 = vadd.f32 %v4121_v50, %v1574_v42  ;;  %v1508_v42 = vadd.f32 %v1476_v15, %v1441_v13  ;;  %v7074_v13 = vld [vmem:[#allocation22_spill] sm:$0xff] }
  0xcf   : > { %7068 = vst [vmem:[#allocation153_spill] sm:$0xff] %v4300_v2  ;;  %v3051_v23 = vld [vmem:[%s6590_s1 + $0x18] sm:$0xff]  ;;  %v4332_v63 = vmul.f32 %v4300_v2, %v4280_v32  ;;  %v4359_v2 = vld [vmem:[#allocation2 + $0x8f] sm:$0xff] }
  0xd0   : > { %v902_v36 = vmul.f32 %v3051_v23, %v3980_v16  ;;  %v1201_v23 = vadd.f32 %v1169_v33, %v1134_v35  ;;  %v1748_v50 = vadd.f32 %v4135_v41, %v1681_v34  ;;  %v4354_v35 = vld [vmem:[#allocation2 + $0xa9] sm:$0xff]  ;;  %v7072_v33 = vld [vmem:[#allocation15_spill] sm:$0xff]  ;;  %v1575_v15 = vadd.f32 %v1543_v9, %v1508_v42  ;;  %v7078_v9 = vld [vmem:[#allocation112_spill] sm:$0xff] }
  0xd1   : > { %7070 = vst [vmem:[#allocation155_spill] sm:$0xff] %v4354_v35  ;;  %v7071_v41 = vld [vmem:[#allocation110_spill] sm:$0xff]  ;;  %v7079_v42 = vld [vmem:[#allocation116_spill] sm:$0xff] }
  0xd2   : > { %v934_v16 = vadd.f32 %v902_v36, %v3659_v29  ;;  %v1308_v29 = vadd.f32 %v1276_v54, %v1201_v23  ;;  %v1651_v36 = vmul.f32 %v4039_v38, %v4014_v10  ;;  %v1815_v18 = vadd.f32 %v4139_v48, %v1748_v50  ;;  %v7073_v10 = vld [vmem:[#allocation111_spill] sm:$0xff] }
  0xd3   : > { %v1785_v34 = vmul.f32 %v7071_v41, %v4018_v0  ;;  %v1170_v48 = vmul.f32 %v4131_v45, %v7074_v13  ;;  %v7075_v23 = vld [vmem:[#allocation127_spill] sm:$0xff]  ;;  %v1277_v41 = vmul.f32 %v4165_v39, %v4145_v57  ;;  %v1682_v47 = vadd.f32 %v1650_v53, %v1575_v15  ;;  %v7081_v13 = vld [vmem:[#allocation128_spill] sm:$0xff]  ;;  %v3054_v53 = vld [vmem:[#allocation2 + $0x87] sm:$0xff] }
  0xd4   : > { %v1001_v27 = vadd.f32 %v3530_v4, %v934_v16  ;;  %v1103_v4 = vmul.f32 %v4359_v2, %v4065_v22  ;;  %v1375_v54 = vadd.f32 %v1343_v24, %v1308_v29  ;;  %v1852_v16 = vmul.f32 %v7073_v10, %v4034_v19  ;;  %v7080_v29 = vld [vmem:[#allocation121_spill] sm:$0xff]  ;;  %v4385_v57 = vld [vmem:[%s6590_s1 + $0xb0] sm:$0xff] }
  0xd5   : > { %v1882_v50 = vadd.f32 %v7075_v23, %v1815_v18  ;;  %v4374_v24 = vmul.f32 %v7078_v9, %v4354_v35  ;;  %v4378_v10 = vmul.f32 %v7080_v29, %v7079_v42  ;;  %7083 = vst [vmem:[#allocation15_spill] sm:$0xff] %v4385_v57  ;;  %v1749_v15 = vadd.f32 %v4256_v5, %v1682_v47  ;;  %v7084_v23 = vld [vmem:[#allocation117_spill] sm:$0xff] }
  0xd6   : > { %v1068_v44 = vadd.f32 %v7072_v33, %v1001_v27  ;;  %v7076_v27 = vld [vmem:[#allocation28_spill] sm:$0xff]  ;;  %v7077_v33 = vld [vmem:[#allocation9_spill] sm:$0xff]  ;;  %v1442_v0 = vadd.f32 %v1410_v49, %v1375_v54  ;;  %v1037_v49 = vmul.f32 %v3054_v53, %v4385_v57  ;;  %v7088_v53 = vld [vmem:[#allocation134_spill] sm:$0xff] }
  0xd7   : > { %v935_v32 = vadd.f32 %v7077_v33, %v7076_v27  ;;  %v1949_v19 = vadd.f32 %v7081_v13, %v1882_v50  ;;  %v7085_v27 = vld [vmem:[#allocation122_spill] sm:$0xff]  ;;  %v1816_v47 = vadd.f32 %v4270_v12, %v1749_v15  ;;  %v7087_v5 = vld [vmem:[#allocation133_spill] sm:$0xff]  ;;  %v7092_v12 = vld [vmem:[#allocation119_spill] sm:$0xff] }
  0xd8   : > { %v1135_v3 = vadd.f32 %v1103_v4, %v1068_v44  ;;  %v7082_v44 = vld [vmem:[#allocation12_spill] sm:$0xff]  ;;  %v1509_v54 = vadd.f32 %v1477_v14, %v1442_v0  ;;  %v4391_v33 = vmul.f32 %v7085_v27, %v7084_v23  ;;  %v4396_v13 = vld [vmem:[#allocation2 + $0xa7] sm:$0xff]  ;;  %v1411_v14 = vmul.f32 %v7087_v5, %v4149_v20 }
  0xd9   : > { %v1002_v4 = vadd.f32 %v7082_v44, %v935_v32  ;;  %v1104_v44 = vmul.f32 %v4396_v13, %v3954_v25  ;;  %v7089_v27 = vld [vmem:[#allocation144_spill] sm:$0xff]  ;;  %v7090_v23 = vld [vmem:[#allocation130_spill] sm:$0xff] }
  0xda   : > { %v1202_v18 = vadd.f32 %v1170_v48, %v1135_v3  ;;  %v1344_v3 = vmul.f32 %v4170_v26, %v4147_v17  ;;  %v7086_v48 = vld [vmem:[#allocation129_spill] sm:$0xff]  ;;  %v1576_v0 = vadd.f32 %v1544_v56, %v1509_v54  ;;  %v1478_v29 = vmul.f32 %v7089_v27, %v7088_v53  ;;  %v7093_v56 = vld [vmem:[#allocation123_spill] sm:$0xff] }
  0xdb   : > { %v2056_v32 = vadd.f32 %v7086_v48, %v1949_v19  ;;  %v1069_v42 = vadd.f32 %v1037_v49, %v1002_v4  ;;  %v4406_v19 = vld [vmem:[#allocation2 + $0xb0] sm:$0xff]  ;;  %v1883_v48 = vadd.f32 %v4274_v31, %v1816_v47  ;;  %v4413_v15 = vmul.f32 %v7093_v56, %v7092_v12 }
  0xdc   : > { %v1309_v50 = vadd.f32 %v1277_v41, %v1202_v18  ;;  %v7091_v4 = vld [vmem:[#allocation23_spill] sm:$0xff]  ;;  %v1683_v25 = vadd.f32 %v1651_v36, %v1576_v0  ;;  %v1278_v54 = vmul.f32 %v3994_v11, %v3978_v21  ;;  %v7097_v0 = vld [vmem:[#allocation145_spill] sm:$0xff] }
  0xdd   : > { %v2123_v57 = vadd.f32 %v7090_v23, %v2056_v32  ;;  %v1136_v18 = vadd.f32 %v1104_v44, %v1069_v42  ;;  %v1171_v49 = vmul.f32 %v3966_v43, %v7091_v4  ;;  %v7094_v53 = vld [vmem:[#allocation135_spill] sm:$0xff]  ;;  %v4419_v32 = vld [vmem:[#allocation2 + $0xaa] sm:$0xff]  ;;  %v1345_v42 = vmul.f32 %v4110_v6, %v4012_v30  ;;  %v7096_v44 = vld [vmem:[#allocation136_spill] sm:$0xff] }
  0xde   : > { %v1376_v41 = vadd.f32 %v1344_v3, %v1309_v50  ;;  %7095 = vst [vmem:[#allocation22_spill] sm:$0xff] %v4419_v32  ;;  %v1950_v31 = vadd.f32 %v4278_v62, %v1883_v48  ;;  %v1750_v36 = vadd.f32 %v1718_v1, %v1683_v25  ;;  %v1545_v47 = vmul.f32 %v7096_v44, %v4406_v19  ;;  %v7098_v21 = vld [vmem:[#allocation137_spill] sm:$0xff]  ;;  %v7100_v62 = vld [vmem:[#allocation124_spill] sm:$0xff]  ;;  %v7102_v48 = vld [vmem:[#allocation138_spill] sm:$0xff] }
  0xdf   : > { %v2190_v23 = vadd.f32 %v7094_v53, %v2123_v57  ;;  %v1203_v50 = vadd.f32 %v1171_v49, %v1136_v18  ;;  %v1652_v4 = vmul.f32 %v7097_v0, %v4194_v51  ;;  %v7099_v18 = vld [vmem:[#allocation120_spill] sm:$0xff]  ;;  %v7101_v1 = vld [vmem:[#allocation125_spill] sm:$0xff] }
  0xe0   : > { %v1443_v3 = vadd.f32 %v1411_v14, %v1376_v41  ;;  %v1412_v14 = vmul.f32 %v4114_v46, %v3999_v7  ;;  %v2057_v53 = vadd.f32 %v4290_v52, %v1950_v31  ;;  %v1817_v41 = vadd.f32 %v1785_v34, %v1750_v36  ;;  %v4444_v52 = vld [vmem:[#allocation2 + $0xb1] sm:$0xff]  ;;  %v7106_v31 = vld [vmem:[#allocation141_spill] sm:$0xff] }
  0xe1   : > { %v2257_v56 = vadd.f32 %v7098_v21, %v2190_v23  ;;  %v1310_v57 = vadd.f32 %v1278_v54, %v1203_v50  ;;  %v2227_v25 = vmul.f32 %v7100_v62, %v7099_v18  ;;  %v4436_v49 = vmul.f32 %v7101_v1, %v4419_v32  ;;  %7104 = vst [vmem:[#allocation127_spill] sm:$0xff] %v4444_v52  ;;  %v7105_v34 = vld [vmem:[#allocation139_spill] sm:$0xff]  ;;  %v4448_v7 = vld [vmem:[#allocation2 + $0xc8] sm:$0xff] }
  0xe2   : > { %v1510_v11 = vadd.f32 %v1478_v29, %v1443_v3  ;;  %v7103_v29 = vld [vmem:[#allocation146_spill] sm:$0xff]  ;;  %v2124_v50 = vadd.f32 %v4313_v58, %v2057_v53  ;;  %v1884_v21 = vadd.f32 %v1852_v16, %v1817_v41  ;;  %v1786_v36 = vmul.f32 %v7106_v31, %v7105_v34  ;;  %v7107_v1 = vld [vmem:[#allocation31_spill] sm:$0xff] }
  0xe3   : > { %v4439_v51 = vadd.f32 %v7102_v48, %v2257_v56  ;;  %v1719_v54 = vmul.f32 %v7103_v29, %v4210_v28  ;;  %v1377_v3 = vadd.f32 %v1345_v42, %v1310_v57  ;;  %v7108_v62 = vld [vmem:[#allocation10_spill] sm:$0xff]  ;;  %v7109_v56 = vld [vmem:[#allocation140_spill] sm:$0xff] }
  0xe4   : > { %v1577_v23 = vadd.f32 %v1545_v47, %v1510_v11  ;;  %v936_v32 = vadd.f32 %v7108_v62, %v7107_v1  ;;  %v7110_v58 = vld [vmem:[#allocation142_spill] sm:$0xff]  ;;  %v1479_v47 = vmul.f32 %v4027_v59, %v4325_v37  ;;  %v2191_v57 = vadd.f32 %v4317_v8, %v2124_v50  ;;  %v4468_v1 = vld [vmem:[%s6590_s1 + $0xb8] sm:$0xff] }
  0xe5   : > { %2357 = vst [vmem:[%s4454_s29] sm:$0xff] %v4439_v51  ;;  %v1853_v16 = vmul.f32 %v7110_v58, %v7109_v56  ;;  %v1444_v42 = vadd.f32 %v1412_v14, %v1377_v3  ;;  %v1951_v53 = vadd.f32 %v4374_v24, %v1884_v21  ;;  %v7111_v41 = vld [vmem:[#allocation14_spill] sm:$0xff]  ;;  %7112 = vst [vmem:[#allocation28_spill] sm:$0xff] %v4468_v1  ;;  %v7113_v14 = vld [vmem:[#allocation143_spill] sm:$0xff] }
  0xe6   : > { %v1684_v11 = vadd.f32 %v1652_v4, %v1577_v23  ;;  %v1003_v62 = vadd.f32 %v7111_v41, %v936_v32  ;;  %v1038_v4 = vmul.f32 %v4468_v1, %v4359_v2  ;;  %v1920_v23 = vmul.f32 %v7113_v14, %v4444_v52  ;;  %v4478_v21 = vld [vmem:[#allocation2 + $0xaf] sm:$0xff] }
  0xe7   : > { %v1511_v3 = vadd.f32 %v1479_v47, %v1444_v42  ;;  %v1546_v8 = vmul.f32 %v4032_v60, %v4448_v7  ;;  %v2258_v24 = vadd.f32 %v4332_v63, %v2191_v57  ;;  %v2058_v32 = vadd.f32 %v4378_v10, %v1951_v53  ;;  %v4490_v57 = vld [vmem:[#allocation2 + $0xcf] sm:$0xff] }
  0xe8   : > { %v1751_v48 = vadd.f32 %v1719_v54, %v1684_v11  ;;  %v1070_v50 = vadd.f32 %v1038_v4, %v1003_v62  ;;  %v1105_v41 = vmul.f32 %v4478_v21, %v4065_v22  ;;  %v7114_v54 = vld [vmem:[#allocation151_spill] sm:$0xff]  ;;  %v1653_v42 = vmul.f32 %v4039_v38, %v4016_v61  ;;  %v7116_v4 = vld [vmem:[#allocation152_spill] sm:$0xff]  ;;  %v7123_v38 = vld [vmem:[#allocation153_spill] sm:$0xff] }
  0xe9   : > { %v2027_v11 = vmul.f32 %v7114_v54, %v4258_v40  ;;  %v1578_v59 = vadd.f32 %v1546_v8, %v1511_v3  ;;  %v4487_v47 = vadd.f32 %v4336_v55, %v2258_v24  ;;  %v2125_v63 = vadd.f32 %v4391_v33, %v2058_v32  ;;  %v7117_v3 = vld [vmem:[#allocation103_spill] sm:$0xff]  ;;  %v7119_v55 = vld [vmem:[#allocation149_spill] sm:$0xff]  ;;  %v7120_v33 = vld [vmem:[#allocation148_spill] sm:$0xff] }
  0xea   : > { %v1818_v2 = vadd.f32 %v1786_v36, %v1751_v48  ;;  %v1137_v10 = vadd.f32 %v1105_v41, %v1070_v50  ;;  %v1172_v53 = vmul.f32 %v4490_v57, %v4131_v45  ;;  %v7115_v36 = vld [vmem:[#allocation147_spill] sm:$0xff]  ;;  %v2161_v24 = vmul.f32 %v7120_v33, %v7119_v55  ;;  %v7125_v45 = vld [vmem:[#allocation110_spill] sm:$0xff] }
  0xeb   : > { %v2094_v48 = vmul.f32 %v7116_v4, %v7115_v36  ;;  %v1685_v40 = vadd.f32 %v1653_v42, %v1578_v59  ;;  %v7118_v8 = vld [vmem:[#allocation115_spill] sm:$0xff]  ;;  %2358 = vst [vmem:[%s4454_s29 + $0x8] sm:$0xff] %v4487_v47  ;;  %v2192_v61 = vadd.f32 %v4413_v15, %v2125_v63  ;;  %v1279_v50 = vmul.f32 %v4165_v39, %v4147_v17  ;;  %v4509_v42 = vld [vmem:[#allocation2 + $0xc9] sm:$0xff] }
  0xec   : > { %v1885_v62 = vadd.f32 %v1853_v16, %v1818_v2  ;;  %v1720_v60 = vmul.f32 %v7118_v8, %v7117_v3  ;;  %v1204_v32 = vadd.f32 %v1172_v53, %v1137_v10  ;;  %v4505_v16 = vld [vmem:[#allocation2 + $0xb2] sm:$0xff]  ;;  %v7122_v2 = vld [vmem:[#allocation150_spill] sm:$0xff]  ;;  %v7124_v3 = vld [vmem:[#allocation108_spill] sm:$0xff]  ;;  %v1346_v10 = vmul.f32 %v4170_v26, %v4149_v20 }
  0xed   : > { %7121 = vst [vmem:[#allocation9_spill] sm:$0xff] %v4505_v16  ;;  %v2228_v59 = vmul.f32 %v7123_v38, %v7122_v2  ;;  %v1787_v4 = vmul.f32 %v7125_v45, %v7124_v3  ;;  %v2259_v15 = vadd.f32 %v2227_v25, %v2192_v61  ;;  %v1413_v17 = vmul.f32 %v7089_v27, %v7087_v5  ;;  %v7127_v38 = vld [vmem:[#allocation34_spill] sm:$0xff]  ;;  %v7128_v33 = vld [vmem:[#allocation11_spill] sm:$0xff] }
  0xee   : > { %v1952_v41 = vadd.f32 %v1920_v23, %v1885_v62  ;;  %v1752_v8 = vadd.f32 %v1720_v60, %v1685_v40  ;;  %v1311_v63 = vadd.f32 %v1279_v50, %v1204_v32  ;;  %v7126_v62 = vld [vmem:[#allocation111_spill] sm:$0xff]  ;;  %v937_v60 = vadd.f32 %v7128_v33, %v7127_v38  ;;  %v7129_v25 = vld [vmem:[#allocation154_spill] sm:$0xff]  ;;  %v7134_v33 = vld [vmem:[#allocation121_spill] sm:$0xff] }
  0xef   : > { %v1854_v39 = vmul.f32 %v7126_v62, %v4354_v35  ;;  %v2326_v40 = vadd.f32 %v4436_v49, %v2259_v15  ;;  %v2295_v61 = vmul.f32 %v7129_v25, %v4505_v16  ;;  %v1921_v32 = vmul.f32 %v7078_v9, %v4509_v42  ;;  %v4526_v5 = vld [vmem:[#allocation2 + $0xd0] sm:$0xff]  ;;  %v7133_v49 = vld [vmem:[#allocation117_spill] sm:$0xff] }
  0xf0   : > { %v2059_v23 = vadd.f32 %v2027_v11, %v1952_v41  ;;  %v1819_v53 = vadd.f32 %v1787_v4, %v1752_v8  ;;  %v1378_v50 = vadd.f32 %v1346_v10, %v1311_v63  ;;  %7130 = vst [vmem:[#allocation116_spill] sm:$0xff] %v4526_v5  ;;  %v7131_v11 = vld [vmem:[#allocation17_spill] sm:$0xff]  ;;  %v7132_v8 = vld [vmem:[#allocation15_spill] sm:$0xff]  ;;  %v2028_v15 = vmul.f32 %v7134_v33, %v7133_v49  ;;  %v7135_v35 = vld [vmem:[#allocation134_spill] sm:$0xff] }
  0xf1   : > { %v1004_v4 = vadd.f32 %v7131_v11, %v937_v60  ;;  %v1039_v41 = vmul.f32 %v4396_v13, %v7132_v8  ;;  %2359 = vst [vmem:[%s4454_s29 + $0x10] sm:$0xff] %v2326_v40  ;;  %v2390_v38 = vadd.f32 %v2326_v40, %v4439_v51  ;;  %v1480_v9 = vmul.f32 %v7135_v35, %v4406_v19  ;;  %v4537_v10 = vld [vmem:[#allocation2 + $0xc7] sm:$0xff] }
  0xf2   : > { %v2126_v45 = vadd.f32 %v2094_v48, %v2059_v23  ;;  %v1886_v3 = vadd.f32 %v1854_v39, %v1819_v53  ;;  %v1445_v62 = vadd.f32 %v1413_v17, %v1378_v50  ;;  %v7136_v23 = vld [vmem:[#allocation89_spill] sm:$0xff]  ;;  %v7137_v13 = vld [vmem:[#allocation122_spill] sm:$0xff]  ;;  %v1547_v51 = vmul.f32 %v7096_v44, %v4526_v5 }
  0xf3   : > { %v1071_v39 = vadd.f32 %v1039_v41, %v1004_v4  ;;  %v1106_v53 = vmul.f32 %v4537_v10, %v7136_v23  ;;  %v2095_v60 = vmul.f32 %v7137_v13, %v7092_v12  ;;  %v4545_v40 = vld [vmem:[#allocation2 + $0xe7] sm:$0xff]  ;;  %v7140_v41 = vld [vmem:[#allocation100_spill] sm:$0xff] }
  0xf4   : > { %v2193_v63 = vadd.f32 %v2161_v24, %v2126_v45  ;;  %v1953_v48 = vadd.f32 %v1921_v32, %v1886_v3  ;;  %v1512_v11 = vadd.f32 %v1480_v9, %v1445_v62  ;;  %v1173_v17 = vmul.f32 %v4545_v40, %v3966_v43  ;;  %v4549_v3 = vld [vmem:[#allocation2 + $0xca] sm:$0xff]  ;;  %v7141_v49 = vld [vmem:[#allocation97_spill] sm:$0xff]  ;;  %v7143_v62 = vld [vmem:[#allocation123_spill] sm:$0xff] }
  0xf5   : > { %7138 = vst [vmem:[#allocation128_spill] sm:$0xff] %v4549_v3  ;;  %v1138_v32 = vadd.f32 %v1106_v53, %v1071_v39  ;;  %v7139_v50 = vld [vmem:[#allocation98_spill] sm:$0xff]  ;;  %v4555_v9 = vadd.f32 %v7141_v49, %v7140_v41  ;;  %v2162_v44 = vmul.f32 %v7143_v62, %v7099_v18  ;;  %v1654_v43 = vmul.f32 %v7097_v0, %v4210_v28  ;;  %v7145_v39 = vld [vmem:[#allocation124_spill] sm:$0xff]  ;;  %v7146_v53 = vld [vmem:[#allocation125_spill] sm:$0xff] }
  0xf6   : > { %v2260_v45 = vadd.f32 %v2228_v59, %v2193_v63  ;;  %v2060_v24 = vadd.f32 %v2028_v15, %v1953_v48  ;;  %v1280_v4 = vmul.f32 %v4110_v6, %v7139_v50  ;;  %v1579_v35 = vadd.f32 %v1547_v51, %v1512_v11  ;;  %v7144_v48 = vld [vmem:[#allocation22_spill] sm:$0xff]  ;;  %v7148_v51 = vld [vmem:[#allocation36_spill] sm:$0xff] }
  0xf7   : > { %7142 = vst [vmem:[#allocation12_spill] sm:$0xff] %v4555_v9  ;;  %v1205_v5 = vadd.f32 %v1173_v17, %v1138_v32  ;;  %v1347_v15 = vmul.f32 %v4114_v46, %v4012_v30  ;;  %v2229_v6 = vmul.f32 %v7145_v39, %v7144_v48  ;;  %v2296_v41 = vmul.f32 %v7146_v53, %v4549_v3  ;;  %v7149_v17 = vld [vmem:[#allocation13_spill] sm:$0xff] }
  0xf8   : > { %v2327_v59 = vadd.f32 %v2295_v61, %v2260_v45  ;;  %v2127_v63 = vadd.f32 %v2095_v60, %v2060_v24  ;;  %v1686_v49 = vadd.f32 %v1654_v43, %v1579_v35  ;;  %v1721_v9 = vmul.f32 %v7103_v29, %v7105_v34  ;;  %v4573_v61 = vld [vmem:[#allocation2 + $0xd1] sm:$0xff] }
  0xf9   : > { %7147 = vst [vmem:[#allocation129_spill] sm:$0xff] %v4573_v61  ;;  %v1312_v60 = vadd.f32 %v1280_v4, %v1205_v5  ;;  %v938_v45 = vadd.f32 %v7149_v17, %v7148_v51  ;;  %v1788_v32 = vmul.f32 %v7106_v31, %v7109_v56  ;;  %v1855_v43 = vmul.f32 %v7110_v58, %v4444_v52  ;;  %v7150_v35 = vld [vmem:[#allocation99_spill] sm:$0xff]  ;;  %v7153_v51 = vld [vmem:[#allocation106_spill] sm:$0xff] }
  0xfa   : > { %2360 = vst [vmem:[%s4454_s29 + $0x18] sm:$0xff] %v2327_v59  ;;  %v4571_v11 = vadd.f32 %v2327_v59, %v4487_v47  ;;  %v2194_v28 = vadd.f32 %v2162_v44, %v2127_v63  ;;  %v1753_v24 = vadd.f32 %v1721_v9, %v1686_v49  ;;  %v1414_v30 = vmul.f32 %v7150_v35, %v4325_v37  ;;  %v4583_v47 = vld [vmem:[#allocation2 + $0xe8] sm:$0xff]  ;;  %v7152_v59 = vld [vmem:[#allocation19_spill] sm:$0xff] }
  0xfb   : > { %7151 = vst [vmem:[#allocation144_spill] sm:$0xff] %v4583_v47  ;;  %v1379_v44 = vadd.f32 %v1347_v15, %v1312_v60  ;;  %v1005_v5 = vadd.f32 %v7152_v59, %v938_v45  ;;  %v1040_v4 = vmul.f32 %v4478_v21, %v4468_v1  ;;  %v1922_v63 = vmul.f32 %v7113_v14, %v4573_v61  ;;  %v7155_v21 = vld [vmem:[#allocation152_spill] sm:$0xff] }
  0xfc   : > { %v2261_v29 = vadd.f32 %v2229_v6, %v2194_v28  ;;  %v1820_v9 = vadd.f32 %v1788_v32, %v1753_v24  ;;  %v2029_v49 = vmul.f32 %v7114_v54, %v7115_v36  ;;  %v1481_v17 = vmul.f32 %v7153_v51, %v4448_v7  ;;  %v4594_v28 = vld [vmem:[#allocation2 + $0xd2] sm:$0xff]  ;;  %v7156_v32 = vld [vmem:[#allocation148_spill] sm:$0xff] }
  0xfd   : > { %7154 = vst [vmem:[#allocation130_spill] sm:$0xff] %v4594_v28  ;;  %v1446_v15 = vadd.f32 %v1414_v30, %v1379_v44  ;;  %v1072_v60 = vadd.f32 %v1040_v4, %v1005_v5  ;;  %v1107_v45 = vmul.f32 %v4490_v57, %v4065_v22  ;;  %v2096_v24 = vmul.f32 %v7155_v21, %v7119_v55  ;;  %v7157_v36 = vld [vmem:[#allocation107_spill] sm:$0xff]  ;;  %v7160_v44 = vld [vmem:[#allocation126_spill] sm:$0xff]  ;;  %v7161_v4 = vld [vmem:[#allocation153_spill] sm:$0xff] }
  0xfe   : > { %v2328_v6 = vadd.f32 %v2296_v41, %v2261_v29  ;;  %v1887_v59 = vadd.f32 %v1855_v43, %v1820_v9  ;;  %v2163_v35 = vmul.f32 %v7156_v32, %v7122_v2  ;;  %v1548_v54 = vmul.f32 %v7157_v36, %v4583_v47  ;;  %v4607_v30 = vld [vmem:[#allocation2 + $0xef] sm:$0xff]  ;;  %v7163_v47 = vld [vmem:[#allocation109_spill] sm:$0xff]  ;;  %v7170_v2 = vld [vmem:[#allocation16_spill] sm:$0xff] }
  0xff   : > { %v1513_v29 = vadd.f32 %v1481_v17, %v1446_v15  ;;  %v1139_v41 = vadd.f32 %v1107_v45, %v1072_v60  ;;  %7159 = vst [vmem:[#allocation119_spill] sm:$0xff] %v4607_v30  ;;  %v1174_v5 = vmul.f32 %v4607_v30, %v7160_v44  ;;  %v2230_v9 = vmul.f32 %v7161_v4, %v4505_v16  ;;  %v4615_v21 = vld [vmem:[#allocation2 + $0xe9] sm:$0xff]  ;;  %v7162_v36 = vld [vmem:[#allocation103_spill] sm:$0xff] }
 0x100   : > { %2361 = vst [vmem:[%s4454_s29 + $0x20] sm:$0xff] %v2328_v6  ;;  %v4605_v51 = vadd.f32 %v2390_v38, %v2328_v6  ;;  %v1954_v43 = vadd.f32 %v1922_v63, %v1887_v59  ;;  %v2297_v32 = vmul.f32 %v7129_v25, %v4594_v28  ;;  %v1655_v38 = vmul.f32 %v7163_v47, %v7162_v36  ;;  %v7164_v15 = vld [vmem:[#allocation131_spill] sm:$0xff]  ;;  %v7165_v59 = vld [vmem:[#allocation108_spill] sm:$0xff]  ;;  %v7168_v44 = vld [vmem:[#allocation110_spill] sm:$0xff] }
 0x101   : > { %v1580_v6 = vadd.f32 %v1548_v54, %v1513_v29  ;;  %v1206_v17 = vadd.f32 %v1174_v5, %v1139_v41  ;;  %v1281_v60 = vmul.f32 %v7164_v15, %v4149_v20  ;;  %v1348_v45 = vmul.f32 %v7089_v27, %v4170_v26  ;;  %v7167_v16 = vld [vmem:[#allocation155_spill] sm:$0xff]  ;;  %v7169_v28 = vld [vmem:[#allocation40_spill] sm:$0xff] }
 0x102   : > { %7158 = vst [vmem:[#allocation23_spill] sm:$0xff] %v4605_v51  ;;  %v2061_v63 = vadd.f32 %v2029_v49, %v1954_v43  ;;  %v7166_v51 = vld [vmem:[#allocation115_spill] sm:$0xff]  ;;  %v1789_v25 = vmul.f32 %v7168_v44, %v7167_v16  ;;  %v939_v30 = vadd.f32 %v7170_v2, %v7169_v28  ;;  %v7172_v29 = vld [vmem:[#allocation112_spill] sm:$0xff]  ;;  %v2030_v49 = vmul.f32 %v7134_v33, %v7092_v12  ;;  %v7173_v43 = vld [vmem:[#allocation21_spill] sm:$0xff] }
 0x103   : > { %v1722_v4 = vmul.f32 %v7166_v51, %v7165_v59  ;;  %v1687_v22 = vadd.f32 %v1655_v38, %v1580_v6  ;;  %v7171_v54 = vld [vmem:[#allocation111_spill] sm:$0xff]  ;;  %v1923_v20 = vmul.f32 %v7172_v29, %v4615_v21  ;;  %v1313_v41 = vadd.f32 %v1281_v60, %v1206_v17  ;;  %v7174_v38 = vld [vmem:[#allocation133_spill] sm:$0xff]  ;;  %v4642_v29 = vld [vmem:[#allocation2 + $0xea] sm:$0xff] }
 0x104   : > { %v1856_v36 = vmul.f32 %v7171_v54, %v4509_v42  ;;  %v2128_v5 = vadd.f32 %v2096_v24, %v2061_v63  ;;  %v1006_v26 = vadd.f32 %v7173_v43, %v939_v30  ;;  %v1041_v44 = vmul.f32 %v4537_v10, %v7132_v8  ;;  %v4646_v12 = vld [vmem:[#allocation2 + $0xf0] sm:$0xff]  ;;  %v7175_v60 = vld [vmem:[#allocation116_spill] sm:$0xff] }
 0x105   : > { %v1754_v51 = vadd.f32 %v1722_v4, %v1687_v22  ;;  %v2097_v2 = vmul.f32 %v7137_v13, %v7099_v18  ;;  %v1380_v28 = vadd.f32 %v1348_v45, %v1313_v41  ;;  %v1415_v6 = vmul.f32 %v7174_v38, %v4406_v19  ;;  %v7176_v45 = vld [vmem:[#allocation134_spill] sm:$0xff]  ;;  %v7177_v43 = vld [vmem:[#allocation91_spill] sm:$0xff] }
 0x106   : > { %v2195_v54 = vadd.f32 %v2163_v35, %v2128_v5  ;;  %v2164_v24 = vmul.f32 %v7143_v62, %v7144_v48  ;;  %v1073_v30 = vadd.f32 %v1041_v44, %v1006_v26  ;;  %v1108_v10 = vmul.f32 %v4545_v40, %v7136_v23  ;;  %v4654_v5 = vld [vmem:[#allocation2 + $0x107] sm:$0xff]  ;;  %v4668_v13 = vld [vmem:[#allocation2 + $0xf1] sm:$0xff] }
 0x107   : > { %v1821_v22 = vadd.f32 %v1789_v25, %v1754_v51  ;;  %v2231_v4 = vmul.f32 %v7145_v39, %v4549_v3  ;;  %v1447_v17 = vadd.f32 %v1415_v6, %v1380_v28  ;;  %v1482_v63 = vmul.f32 %v7176_v45, %v7175_v60  ;;  %v7178_v28 = vld [vmem:[#allocation136_spill] sm:$0xff]  ;;  %7180 = vst [vmem:[#allocation135_spill] sm:$0xff] %v4668_v13 }
 0x108   : > { %v2262_v35 = vadd.f32 %v2230_v9, %v2195_v54  ;;  %v1140_v41 = vadd.f32 %v1108_v10, %v1073_v30  ;;  %v1175_v62 = vmul.f32 %v4654_v5, %v7177_v43  ;;  %v1282_v26 = vmul.f32 %v4114_v46, %v7139_v50  ;;  %v7179_v54 = vld [vmem:[#allocation146_spill] sm:$0xff] }
 0x109   : > { %v1888_v44 = vadd.f32 %v1856_v36, %v1821_v22  ;;  %v2298_v25 = vmul.f32 %v7146_v53, %v4642_v29  ;;  %v1514_v51 = vadd.f32 %v1482_v63, %v1447_v17  ;;  %v1549_v6 = vmul.f32 %v7178_v28, %v4646_v12  ;;  %v7181_v36 = vld [vmem:[#allocation43_spill] sm:$0xff]  ;;  %v7182_v22 = vld [vmem:[#allocation18_spill] sm:$0xff] }
 0x10a   : > { %v2329_v39 = vadd.f32 %v2297_v32, %v2262_v35  ;;  %v1656_v9 = vmul.f32 %v7097_v0, %v7105_v34  ;;  %v1723_v30 = vmul.f32 %v7179_v54, %v7109_v56  ;;  %v1207_v10 = vadd.f32 %v1175_v62, %v1140_v41  ;;  %v7184_v62 = vld [vmem:[#allocation102_spill] sm:$0xff] }
 0x10b   : > { %v1955_v3 = vadd.f32 %v1923_v20, %v1888_v44  ;;  %v1581_v43 = vadd.f32 %v1549_v6, %v1514_v51  ;;  %v1790_v46 = vmul.f32 %v7106_v31, %v4444_v52  ;;  %v940_v17 = vadd.f32 %v7182_v22, %v7181_v36  ;;  %v7185_v44 = vld [vmem:[#allocation25_spill] sm:$0xff] }
 0x10c   : > { %2362 = vst [vmem:[%s4454_s29 + $0x28] sm:$0xff] %v2329_v39  ;;  %v4676_v32 = vadd.f32 %v4571_v11, %v2329_v39  ;;  %v1857_v34 = vmul.f32 %v7110_v58, %v4573_v61  ;;  %v1314_v63 = vadd.f32 %v1282_v26, %v1207_v10  ;;  %v1349_v20 = vmul.f32 %v7184_v62, %v4325_v37  ;;  %v7186_v39 = vld [vmem:[#allocation151_spill] sm:$0xff]  ;;  %v4691_v31 = vld [vmem:[#allocation2 + $0x108] sm:$0xff] }
 0x10d   : > { %v2062_v35 = vadd.f32 %v2030_v49, %v1955_v3  ;;  %v1688_v41 = vadd.f32 %v1656_v9, %v1581_v43  ;;  %v1007_v51 = vadd.f32 %v7185_v44, %v940_v17  ;;  %v1042_v6 = vmul.f32 %v4490_v57, %v4468_v1  ;;  %v7187_v58 = vld [vmem:[#allocation99_spill] sm:$0xff]  ;;  %v7188_v49 = vld [vmem:[#allocation114_spill] sm:$0xff]  ;;  %v7191_v44 = vld [vmem:[#allocation152_spill] sm:$0xff] }
 0x10e   : > { %7183 = vst [vmem:[#allocation137_spill] sm:$0xff] %v4676_v32  ;;  %v1924_v36 = vmul.f32 %v7113_v14, %v4668_v13  ;;  %v2031_v11 = vmul.f32 %v7186_v39, %v7119_v55  ;;  %v1381_v22 = vadd.f32 %v1349_v20, %v1314_v63  ;;  %v1416_v26 = vmul.f32 %v7187_v58, %v4448_v7  ;;  %v7189_v43 = vld [vmem:[#allocation119_spill] sm:$0xff]  ;;  %v7190_v57 = vld [vmem:[#allocation150_spill] sm:$0xff]  ;;  %v7192_v1 = vld [vmem:[#allocation144_spill] sm:$0xff] }
 0x10f   : > { %v2129_v10 = vadd.f32 %v2097_v2, %v2062_v35  ;;  %v1755_v32 = vadd.f32 %v1723_v30, %v1688_v41  ;;  %v1074_v3 = vadd.f32 %v1042_v6, %v1007_v51  ;;  %v1109_v9 = vmul.f32 %v7189_v43, %v7188_v49  ;;  %v4695_v17 = vld [vmem:[#allocation2 + $0xf2] sm:$0xff]  ;;  %v7193_v55 = vld [vmem:[#allocation106_spill] sm:$0xff]  ;;  %v7195_v6 = vld [vmem:[#allocation9_spill] sm:$0xff] }
 0x110   : > { %v2098_v14 = vmul.f32 %v7191_v44, %v7190_v57  ;;  %v1448_v13 = vadd.f32 %v1416_v26, %v1381_v22  ;;  %v1483_v63 = vmul.f32 %v7193_v55, %v7192_v1  ;;  %v4701_v20 = vld [vmem:[#allocation2 + $0x10f] sm:$0xff]  ;;  %v1283_v51 = vmul.f32 %v7089_v27, %v7164_v15  ;;  %v7196_v49 = vld [vmem:[#allocation148_spill] sm:$0xff]  ;;  %v7198_v44 = vld [vmem:[#allocation153_spill] sm:$0xff] }
 0x111   : > { %v7194_v39 = vld [vmem:[#allocation126_spill] sm:$0xff]  ;;  %v2196_v30 = vadd.f32 %v2164_v24, %v2129_v10  ;;  %v1822_v35 = vadd.f32 %v1790_v46, %v1755_v32  ;;  %v1141_v41 = vadd.f32 %v1109_v9, %v1074_v3  ;;  %v2165_v43 = vmul.f32 %v7196_v49, %v7195_v6  ;;  %v7199_v57 = vld [vmem:[#allocation107_spill] sm:$0xff]  ;;  %v7202_v9 = vld [vmem:[#allocation132_spill] sm:$0xff] }
 0x112   : > { %v1176_v2 = vmul.f32 %v4701_v20, %v7194_v39  ;;  %v7197_v58 = vld [vmem:[#allocation130_spill] sm:$0xff]  ;;  %v1515_v26 = vadd.f32 %v1483_v63, %v1448_v13  ;;  %v1550_v55 = vmul.f32 %v7199_v57, %v4691_v31  ;;  %v1657_v27 = vmul.f32 %v7163_v47, %v7165_v59  ;;  %v7201_v10 = vld [vmem:[#allocation115_spill] sm:$0xff] }
 0x113   : > { %v2232_v22 = vmul.f32 %v7198_v44, %v7197_v58  ;;  %v2263_v1 = vadd.f32 %v2231_v4, %v2196_v30  ;;  %v1889_v61 = vadd.f32 %v1857_v34, %v1822_v35  ;;  %v7200_v39 = vld [vmem:[#allocation154_spill] sm:$0xff]  ;;  %v1724_v3 = vmul.f32 %v7201_v10, %v7167_v16  ;;  %v7204_v30 = vld [vmem:[#allocation20_spill] sm:$0xff] }
 0x114   : > { %v2299_v24 = vmul.f32 %v7200_v39, %v4695_v17  ;;  %v1208_v46 = vadd.f32 %v1176_v2, %v1141_v41  ;;  %v1582_v32 = vadd.f32 %v1550_v55, %v1515_v26  ;;  %v1350_v13 = vmul.f32 %v7202_v9, %v4406_v19  ;;  %v4721_v44 = vld [vmem:[#allocation2 + $0x109] sm:$0xff]  ;;  %v7206_v26 = vld [vmem:[#allocation23_spill] sm:$0xff] }
 0x115   : > { %v2330_v63 = vadd.f32 %v2298_v25, %v2263_v1  ;;  %v1956_v15 = vadd.f32 %v1924_v36, %v1889_v61  ;;  %v7203_v34 = vld [vmem:[#allocation46_spill] sm:$0xff]  ;;  %v1417_v59 = vmul.f32 %v7174_v38, %v7175_v60  ;;  %v1043_v41 = vmul.f32 %v4545_v40, %v7132_v8 }
 0x116   : > { %v1315_v4 = vadd.f32 %v1283_v51, %v1208_v46  ;;  %v941_v35 = vadd.f32 %v7204_v30, %v7203_v34  ;;  %v1689_v39 = vadd.f32 %v1657_v27, %v1582_v32  ;;  %v7205_v55 = vld [vmem:[#allocation110_spill] sm:$0xff]  ;;  %v7207_v51 = vld [vmem:[#allocation27_spill] sm:$0xff]  ;;  %v7209_v30 = vld [vmem:[#allocation112_spill] sm:$0xff]  ;;  %v1484_v40 = vmul.f32 %v7176_v45, %v4646_v12 }
 0x117   : > { %v1791_v2 = vmul.f32 %v7205_v55, %v4509_v42  ;;  %2363 = vst [vmem:[%s4454_s29 + $0x30] sm:$0xff] %v2330_v63  ;;  %v4733_v1 = vadd.f32 %v7206_v26, %v2330_v63  ;;  %v2063_v61 = vadd.f32 %v2031_v11, %v1956_v15  ;;  %v4735_v25 = vld [vmem:[#allocation2 + $0x110] sm:$0xff]  ;;  %v1925_v38 = vmul.f32 %v7209_v30, %v4721_v44 }
 0x118   : > { %v1382_v36 = vadd.f32 %v1350_v13, %v1315_v4  ;;  %v1008_v46 = vadd.f32 %v7207_v51, %v941_v35  ;;  %v1756_v32 = vadd.f32 %v1724_v3, %v1689_v39  ;;  %v7208_v27 = vld [vmem:[#allocation111_spill] sm:$0xff]  ;;  %v1110_v15 = vmul.f32 %v4654_v5, %v7136_v23  ;;  %v7210_v39 = vld [vmem:[#allocation122_spill] sm:$0xff] }
 0x119   : > { %v1858_v34 = vmul.f32 %v7208_v27, %v4615_v21  ;;  %v2130_v8 = vadd.f32 %v2098_v14, %v2063_v61  ;;  %v2032_v13 = vmul.f32 %v7134_v33, %v7099_v18  ;;  %v2099_v3 = vmul.f32 %v7210_v39, %v7144_v48  ;;  %v4752_v26 = vld [vmem:[#allocation2 + $0x10a] sm:$0xff]  ;;  %v7212_v61 = vld [vmem:[#allocation128_spill] sm:$0xff] }
 0x11a   : > { %v1449_v9 = vadd.f32 %v1417_v59, %v1382_v36  ;;  %v1075_v63 = vadd.f32 %v1043_v41, %v1008_v46  ;;  %v1823_v11 = vadd.f32 %v1791_v2, %v1756_v32  ;;  %v1551_v4 = vmul.f32 %v7178_v28, %v4735_v25  ;;  %v4754_v59 = vld [vmem:[#allocation2 + $0x127] sm:$0xff]  ;;  %v7211_v41 = vld [vmem:[#allocation91_spill] sm:$0xff]  ;;  %v7214_v46 = vld [vmem:[#allocation124_spill] sm:$0xff] }
 0x11b   : > { %v2197_v35 = vadd.f32 %v2165_v43, %v2130_v8  ;;  %v1177_v23 = vmul.f32 %v4754_v59, %v7211_v41  ;;  %v7213_v36 = vld [vmem:[#allocation123_spill] sm:$0xff]  ;;  %v2233_v32 = vmul.f32 %v7214_v46, %v4642_v29  ;;  %v1658_v28 = vmul.f32 %v7097_v0, %v7109_v56  ;;  %v7222_v0 = vld [vmem:[#allocation28_spill] sm:$0xff] }
 0x11c   : > { %v1516_v51 = vadd.f32 %v1484_v40, %v1449_v9  ;;  %v1142_v14 = vadd.f32 %v1110_v15, %v1075_v63  ;;  %v1890_v2 = vadd.f32 %v1858_v34, %v1823_v11  ;;  %v2166_v18 = vmul.f32 %v7213_v36, %v7212_v61  ;;  %v4772_v46 = vld [vmem:[#allocation2 + $0x111] sm:$0xff] }
 0x11d   : > { %v2264_v8 = vadd.f32 %v2232_v22, %v2197_v35  ;;  %v1284_v40 = vmul.f32 %v7139_v50, %v4325_v37  ;;  %v2300_v34 = vmul.f32 %v7146_v53, %v4752_v26  ;;  %v1725_v15 = vmul.f32 %v7179_v54, %v4444_v52  ;;  %7215 = vst [vmem:[#allocation120_spill] sm:$0xff] %v4772_v46  ;;  %v7217_v35 = vld [vmem:[#allocation24_spill] sm:$0xff]  ;;  %v7218_v37 = vld [vmem:[#allocation129_spill] sm:$0xff]  ;;  %v7223_v54 = vld [vmem:[#allocation119_spill] sm:$0xff] }
 0x11e   : > { %v1583_v43 = vadd.f32 %v1551_v4, %v1516_v51  ;;  %v1209_v9 = vadd.f32 %v1177_v23, %v1142_v14  ;;  %v1957_v63 = vadd.f32 %v1925_v38, %v1890_v2  ;;  %v1351_v11 = vmul.f32 %v7184_v62, %v4448_v7  ;;  %v7216_v4 = vld [vmem:[#allocation48_spill] sm:$0xff]  ;;  %v7219_v50 = vld [vmem:[#allocation141_spill] sm:$0xff]  ;;  %v7221_v2 = vld [vmem:[#allocation99_spill] sm:$0xff] }
 0x11f   : > { %v2331_v41 = vadd.f32 %v2299_v24, %v2264_v8  ;;  %v942_v51 = vadd.f32 %v7217_v35, %v7216_v4  ;;  %v1792_v38 = vmul.f32 %v7219_v50, %v7218_v37  ;;  %v7220_v23 = vld [vmem:[#allocation144_spill] sm:$0xff]  ;;  %v1044_v52 = vmul.f32 %v7223_v54, %v7222_v0  ;;  %v7224_v62 = vld [vmem:[#allocation137_spill] sm:$0xff]  ;;  %v7227_v4 = vld [vmem:[#allocation142_spill] sm:$0xff] }
 0x120   : > { %v1690_v56 = vadd.f32 %v1658_v28, %v1583_v43  ;;  %v1316_v22 = vadd.f32 %v1284_v40, %v1209_v9  ;;  %v2064_v14 = vadd.f32 %v2032_v13, %v1957_v63  ;;  %v1418_v53 = vmul.f32 %v7221_v2, %v7220_v23  ;;  %v4786_v28 = vld [vmem:[#allocation2 + $0x128] sm:$0xff]  ;;  %v7226_v63 = vld [vmem:[#allocation135_spill] sm:$0xff] }
 0x121   : > { %2364 = vst [vmem:[%s4454_s29 + $0x38] sm:$0xff] %v2331_v41  ;;  %v4784_v24 = vadd.f32 %v7224_v62, %v2331_v41  ;;  %v7225_v9 = vld [vmem:[#allocation30_spill] sm:$0xff]  ;;  %v1859_v35 = vmul.f32 %v7227_v4, %v7226_v63  ;;  %v7228_v50 = vld [vmem:[#allocation143_spill] sm:$0xff] }
 0x122   : > { %v1757_v8 = vadd.f32 %v1725_v15, %v1690_v56  ;;  %v1383_v43 = vadd.f32 %v1351_v11, %v1316_v22  ;;  %v1009_v40 = vadd.f32 %v7225_v9, %v942_v51  ;;  %v2131_v13 = vadd.f32 %v2099_v3, %v2064_v14  ;;  %v7229_v23 = vld [vmem:[#allocation106_spill] sm:$0xff]  ;;  %v7232_v22 = vld [vmem:[#allocation151_spill] sm:$0xff]  ;;  %v7233_v3 = vld [vmem:[#allocation152_spill] sm:$0xff] }
 0x123   : > { %v1926_v2 = vmul.f32 %v7228_v50, %v4772_v46  ;;  %v1485_v54 = vmul.f32 %v7229_v23, %v4691_v31  ;;  %v7230_v62 = vld [vmem:[#allocation114_spill] sm:$0xff]  ;;  %v2100_v14 = vmul.f32 %v7233_v3, %v7195_v6  ;;  %v1552_v9 = vmul.f32 %v7199_v57, %v4786_v28 }
 0x124   : > { %v1824_v0 = vadd.f32 %v1792_v38, %v1757_v8  ;;  %v1450_v37 = vadd.f32 %v1418_v53, %v1383_v43  ;;  %v1076_v41 = vadd.f32 %v1044_v52, %v1009_v40  ;;  %v1111_v15 = vmul.f32 %v4701_v20, %v7230_v62  ;;  %v7231_v11 = vld [vmem:[#allocation150_spill] sm:$0xff]  ;;  %v7235_v8 = vld [vmem:[#allocation153_spill] sm:$0xff]  ;;  %v7237_v62 = vld [vmem:[#allocation132_spill] sm:$0xff] }
 0x125   : > { %v2198_v56 = vadd.f32 %v2166_v18, %v2131_v13  ;;  %v2033_v51 = vmul.f32 %v7232_v22, %v7231_v11  ;;  %v4803_v23 = vld [vmem:[#allocation2 + $0x12f] sm:$0xff]  ;;  %v2167_v18 = vmul.f32 %v7196_v49, %v7197_v58  ;;  %v2234_v43 = vmul.f32 %v7235_v8, %v4695_v17 }
 0x126   : > { %v1891_v50 = vadd.f32 %v1859_v35, %v1824_v0  ;;  %v1517_v4 = vadd.f32 %v1485_v54, %v1450_v37  ;;  %v1143_v46 = vadd.f32 %v1111_v15, %v1076_v41  ;;  %v7234_v53 = vld [vmem:[#allocation126_spill] sm:$0xff]  ;;  %v1659_v40 = vmul.f32 %v7163_v47, %v7167_v16  ;;  %v7236_v13 = vld [vmem:[#allocation131_spill] sm:$0xff] }
 0x127   : > { %v1178_v52 = vmul.f32 %v4803_v23, %v7234_v53  ;;  %v2265_v38 = vadd.f32 %v2233_v32, %v2198_v56  ;;  %v1285_v35 = vmul.f32 %v7236_v13, %v4406_v19  ;;  %v1726_v32 = vmul.f32 %v7201_v10, %v4509_v42  ;;  %v4821_v56 = vld [vmem:[#allocation2 + $0x112] sm:$0xff]  ;;  %v7240_v10 = vld [vmem:[#allocation133_spill] sm:$0xff] }
 0x128   : > { %v1958_v57 = vadd.f32 %v1926_v2, %v1891_v50  ;;  %v1584_v0 = vadd.f32 %v1552_v9, %v1517_v4  ;;  %v1793_v41 = vmul.f32 %v7205_v55, %v4615_v21  ;;  %v1352_v15 = vmul.f32 %v7237_v62, %v7175_v60  ;;  %v7238_v50 = vld [vmem:[#allocation52_spill] sm:$0xff]  ;;  %v7241_v2 = vld [vmem:[#allocation15_spill] sm:$0xff] }
 0x129   : > { %v1210_v37 = vadd.f32 %v1178_v52, %v1143_v46  ;;  %v2332_v54 = vadd.f32 %v2300_v34, %v2265_v38  ;;  %v7239_v46 = vld [vmem:[#allocation26_spill] sm:$0xff]  ;;  %v1419_v34 = vmul.f32 %v7240_v10, %v4646_v12  ;;  %v1045_v55 = vmul.f32 %v4654_v5, %v7241_v2  ;;  %v4836_v9 = vld [vmem:[%s6590_s1 + $0x100] sm:$0xff] }
 0x12a   : > { %v2065_v11 = vadd.f32 %v2033_v51, %v1958_v57  ;;  %v1691_v16 = vadd.f32 %v1659_v40, %v1584_v0  ;;  %v943_v4 = vadd.f32 %v7239_v46, %v7238_v50  ;;  %7242 = vst [vmem:[#allocation138_spill] sm:$0xff] %v4836_v9  ;;  %v1112_v51 = vmul.f32 %v4836_v9, %v4754_v59  ;;  %v4840_v52 = vld [vmem:[#allocation2 + $0x129] sm:$0xff]  ;;  %v7246_v50 = vld [vmem:[#allocation136_spill] sm:$0xff] }
 0x12b   : > { %v1317_v47 = vadd.f32 %v1285_v35, %v1210_v37  ;;  %2365 = vst [vmem:[%s4454_s29 + $0x40] sm:$0xff] %v2332_v54  ;;  %v4827_v19 = vadd.f32 %v4733_v1, %v2332_v54  ;;  %v4842_v1 = vld [vmem:[#allocation2 + $0x130] sm:$0xff]  ;;  %v7243_v57 = vld [vmem:[#allocation33_spill] sm:$0xff]  ;;  %v1860_v13 = vmul.f32 %v7208_v27, %v4721_v44  ;;  %v1486_v35 = vmul.f32 %v7176_v45, %v4735_v25 }
 0x12c   : > { %v2132_v53 = vadd.f32 %v2100_v14, %v2065_v11  ;;  %v1758_v38 = vadd.f32 %v1726_v32, %v1691_v16  ;;  %v1010_v0 = vadd.f32 %v7243_v57, %v943_v4  ;;  %v7244_v37 = vld [vmem:[#allocation154_spill] sm:$0xff]  ;;  %v1927_v27 = vmul.f32 %v7209_v30, %v4840_v52  ;;  %v7247_v30 = vld [vmem:[#allocation124_spill] sm:$0xff] }
 0x12d   : > { %v1384_v40 = vadd.f32 %v1352_v15, %v1317_v47  ;;  %v2301_v5 = vmul.f32 %v7244_v37, %v4821_v56  ;;  %v4851_v54 = vld [vmem:[#allocation2 + $0x147] sm:$0xff]  ;;  %v4856_v14 = vld [vmem:[%s6590_s1 + $0x150] sm:$0xff]  ;;  %v2034_v45 = vmul.f32 %v7134_v33, %v7144_v48  ;;  %v2101_v47 = vmul.f32 %v7210_v39, %v7212_v61 }
 0x12e   : > { %7245 = vst [vmem:[#allocation139_spill] sm:$0xff] %v4856_v14  ;;  %v1179_v32 = vmul.f32 %v4856_v14, %v4851_v54  ;;  %v2199_v62 = vadd.f32 %v2167_v18, %v2132_v53  ;;  %v1825_v15 = vadd.f32 %v1793_v41, %v1758_v38  ;;  %v1077_v16 = vadd.f32 %v1045_v55, %v1010_v0  ;;  %v4868_v57 = vld [vmem:[#allocation2 + $0x12a] sm:$0xff]  ;;  %v7248_v33 = vld [vmem:[#allocation127_spill] sm:$0xff]  ;;  %v7249_v48 = vld [vmem:[#allocation145_spill] sm:$0xff] }
 0x12f   : > { %v1451_v11 = vadd.f32 %v1419_v34, %v1384_v40  ;;  %v1553_v46 = vmul.f32 %v7246_v50, %v4842_v1  ;;  %v2168_v34 = vmul.f32 %v7213_v36, %v4642_v29  ;;  %v2235_v55 = vmul.f32 %v7247_v30, %v4752_v26  ;;  %v4879_v39 = vld [vmem:[%s6590_s1 + $0x20] sm:$0xff]  ;;  %v7256_v30 = vld [vmem:[#allocation55_spill] sm:$0xff] }
 0x130   : > { %v2266_v4 = vadd.f32 %v2234_v43, %v2199_v62  ;;  %v1892_v10 = vadd.f32 %v1860_v13, %v1825_v15  ;;  %v1144_v41 = vadd.f32 %v1112_v51, %v1077_v16  ;;  %v1660_v53 = vmul.f32 %v7249_v48, %v7248_v33  ;;  %7250 = vst [vmem:[#allocation31_spill] sm:$0xff] %v4879_v39  ;;  %v7251_v36 = vld [vmem:[#allocation125_spill] sm:$0xff]  ;;  %v7253_v62 = vld [vmem:[#allocation146_spill] sm:$0xff]  ;;  %v7255_v16 = vld [vmem:[#allocation144_spill] sm:$0xff] }
 0x131   : > { %v1518_v18 = vadd.f32 %v1486_v35, %v1451_v11  ;;  %v1286_v43 = vmul.f32 %v4879_v39, %v4448_v7  ;;  %v2302_v13 = vmul.f32 %v7251_v36, %v4868_v57  ;;  %v7252_v35 = vld [vmem:[#allocation129_spill] sm:$0xff]  ;;  %v4890_v11 = vld [vmem:[%s6590_s1 + $0x70] sm:$0xff]  ;;  %v7261_v36 = vld [vmem:[#allocation28_spill] sm:$0xff] }
 0x132   : > { %v2333_v38 = vadd.f32 %v2301_v5, %v2266_v4  ;;  %v1959_v40 = vadd.f32 %v1927_v27, %v1892_v10  ;;  %v1211_v0 = vadd.f32 %v1179_v32, %v1144_v41  ;;  %v1727_v15 = vmul.f32 %v7253_v62, %v7252_v35  ;;  %7254 = vst [vmem:[#allocation10_spill] sm:$0xff] %v4890_v11  ;;  %v7257_v7 = vld [vmem:[#allocation29_spill] sm:$0xff] }
 0x133   : > { %v1585_v51 = vadd.f32 %v1553_v46, %v1518_v18  ;;  %v1353_v50 = vmul.f32 %v4890_v11, %v7255_v16  ;;  %v944_v5 = vadd.f32 %v7257_v7, %v7256_v30  ;;  %v4900_v46 = vld [vmem:[#allocation2 + $0x131] sm:$0xff]  ;;  %v7259_v18 = vld [vmem:[#allocation141_spill] sm:$0xff]  ;;  %v1046_v62 = vmul.f32 %v4701_v20, %v7261_v36  ;;  %v7264_v20 = vld [vmem:[#allocation120_spill] sm:$0xff] }
 0x134   : > { %2366 = vst [vmem:[%s4454_s29 + $0x48] sm:$0xff] %v2333_v38  ;;  %v4898_v32 = vadd.f32 %v4784_v24, %v2333_v38  ;;  %v2066_v27 = vadd.f32 %v2034_v45, %v1959_v40  ;;  %7258 = vst [vmem:[#allocation140_spill] sm:$0xff] %v4900_v46  ;;  %v1318_v10 = vadd.f32 %v1286_v43, %v1211_v0  ;;  %v7260_v33 = vld [vmem:[#allocation37_spill] sm:$0xff]  ;;  %v7266_v7 = vld [vmem:[#allocation143_spill] sm:$0xff] }
 0x135   : > { %v1692_v4 = vadd.f32 %v1660_v53, %v1585_v51  ;;  %v1794_v41 = vmul.f32 %v7259_v18, %v7226_v63  ;;  %v1011_v48 = vadd.f32 %v7260_v33, %v944_v5  ;;  %v4910_v30 = vld [vmem:[%s6590_s1 + $0x108] sm:$0xff]  ;;  %v4917_v43 = vld [vmem:[%s6590_s1 + $0xc0] sm:$0xff]  ;;  %v1928_v5 = vmul.f32 %v7266_v7, %v4900_v46  ;;  %v4941_v7 = vld [vmem:[%s6590_s1 + $0x110] sm:$0xff] }
 0x136   : > { %7262 = vst [vmem:[#allocation14_spill] sm:$0xff] %v4910_v30  ;;  %v1113_v24 = vmul.f32 %v4910_v30, %v4803_v23  ;;  %v2133_v45 = vadd.f32 %v2101_v47, %v2066_v27  ;;  %v1385_v53 = vadd.f32 %v1353_v50, %v1318_v10  ;;  %7263 = vst [vmem:[#allocation147_spill] sm:$0xff] %v4917_v43  ;;  %v7265_v51 = vld [vmem:[#allocation142_spill] sm:$0xff]  ;;  %v4936_v10 = vld [vmem:[#allocation2 + $0x132] sm:$0xff] }
 0x137   : > { %v1759_v38 = vadd.f32 %v1727_v15, %v1692_v4  ;;  %v1420_v40 = vmul.f32 %v4917_v43, %v4691_v31  ;;  %v1861_v0 = vmul.f32 %v7265_v51, %v7264_v20  ;;  %v4925_v18 = vld [vmem:[#allocation2 + $0x148] sm:$0xff]  ;;  %v1078_v33 = vadd.f32 %v1046_v62, %v1011_v48  ;;  %v4932_v15 = vld [vmem:[%s6590_s1 + $0x158] sm:$0xff]  ;;  %7268 = vst [vmem:[#allocation34_spill] sm:$0xff] %v4936_v10 }
 0x138   : > { %v4927_v47 = vld [vmem:[#allocation2 + $0x14f] sm:$0xff]  ;;  %7267 = vst [vmem:[#allocation149_spill] sm:$0xff] %v4932_v15  ;;  %v2200_v27 = vadd.f32 %v2168_v34, %v2133_v45  ;;  %7269 = vst [vmem:[#allocation11_spill] sm:$0xff] %v4941_v7  ;;  %v1487_v48 = vmul.f32 %v4941_v7, %v4786_v28  ;;  %v2035_v62 = vmul.f32 %v7232_v22, %v7195_v6 }
 0x139   : > { %v1180_v50 = vmul.f32 %v4932_v15, %v4927_v47  ;;  %v1826_v4 = vadd.f32 %v1794_v41, %v1759_v38  ;;  %v1452_v51 = vadd.f32 %v1420_v40, %v1385_v53  ;;  %v2102_v46 = vmul.f32 %v7233_v3, %v7197_v58  ;;  %v4954_v40 = vld [vmem:[%s6590_s1 + $0x160] sm:$0xff]  ;;  %v4965_v3 = vld [vmem:[%s6590_s1 + $0x28] sm:$0xff] }
 0x13a   : > { %v2169_v34 = vmul.f32 %v7196_v49, %v4695_v17  ;;  %v1145_v41 = vadd.f32 %v1113_v24, %v1078_v33  ;;  %v2267_v45 = vadd.f32 %v2235_v55, %v2200_v27  ;;  %7270 = vst [vmem:[#allocation17_spill] sm:$0xff] %v4954_v40  ;;  %v1554_v15 = vmul.f32 %v4954_v40, %v4925_v18 }
 0x13b   : > { %v1893_v38 = vadd.f32 %v1861_v0, %v1826_v4  ;;  %v1519_v53 = vadd.f32 %v1487_v48, %v1452_v51  ;;  %v2236_v6 = vmul.f32 %v7235_v8, %v4821_v56  ;;  %v2303_v22 = vmul.f32 %v7244_v37, %v4936_v10  ;;  %7271 = vst [vmem:[#allocation117_spill] sm:$0xff] %v4965_v3  ;;  %v4972_v8 = vld [vmem:[%s6590_s1 + $0x30] sm:$0xff]  ;;  %v7275_v4 = vld [vmem:[#allocation32_spill] sm:$0xff] }
 0x13c   : > { %v1212_v49 = vadd.f32 %v1180_v50, %v1145_v41  ;;  %v1287_v55 = vmul.f32 %v4965_v3, %v7175_v60  ;;  %v2334_v24 = vadd.f32 %v2302_v13, %v2267_v45  ;;  %v1661_v37 = vmul.f32 %v4972_v8, %v4509_v42  ;;  %v4979_v50 = vld [vmem:[%s6590_s1 + $0x80] sm:$0xff]  ;;  %v4986_v13 = vld [vmem:[%s6590_s1 + $0x78] sm:$0xff] }
 0x13d   : > { %v1960_v0 = vadd.f32 %v1928_v5, %v1893_v38  ;;  %v1586_v33 = vadd.f32 %v1554_v15, %v1519_v53  ;;  %7272 = vst [vmem:[#allocation121_spill] sm:$0xff] %v4979_v50  ;;  %v1728_v27 = vmul.f32 %v4979_v50, %v4615_v21  ;;  %7273 = vst [vmem:[#allocation89_spill] sm:$0xff] %v4986_v13  ;;  %v7274_v15 = vld [vmem:[#allocation58_spill] sm:$0xff] }
 0x13e   : > { %v1319_v60 = vadd.f32 %v1287_v55, %v1212_v49  ;;  %v1354_v5 = vmul.f32 %v4986_v13, %v4646_v12  ;;  %v945_v42 = vadd.f32 %v7275_v4, %v7274_v15  ;;  %2367 = vst [vmem:[%s4454_s29 + $0x50] sm:$0xff] %v2334_v24  ;;  %v4994_v51 = vadd.f32 %v4827_v19, %v2334_v24  ;;  %v4998_v38 = vld [vmem:[#allocation2 + $0x149] sm:$0xff]  ;;  %v7278_v15 = vld [vmem:[#allocation39_spill] sm:$0xff] }
 0x13f   : > { %v2067_v48 = vadd.f32 %v2035_v62, %v1960_v0  ;;  %v1693_v41 = vadd.f32 %v1661_v37, %v1586_v33  ;;  %v1047_v45 = vmul.f32 %v4754_v59, %v7241_v2  ;;  %7276 = vst [vmem:[#allocation98_spill] sm:$0xff] %v4998_v38  ;;  %v5003_v49 = vld [vmem:[%s6590_s1 + $0xc8] sm:$0xff]  ;;  %v1114_v19 = vmul.f32 %v4851_v54, %v4836_v9  ;;  %v5013_v59 = vld [vmem:[%s6590_s1 + $0xd0] sm:$0xff]  ;;  %v5020_v0 = vld [vmem:[%s6590_s1 + $0x120] sm:$0xff] }
 0x140   : > { %v1386_v53 = vadd.f32 %v1354_v5, %v1319_v60  ;;  %7277 = vst [vmem:[#allocation100_spill] sm:$0xff] %v5003_v49  ;;  %v1421_v55 = vmul.f32 %v5003_v49, %v4735_v25  ;;  %v1012_v4 = vadd.f32 %v7278_v15, %v945_v42  ;;  %7279 = vst [vmem:[#allocation97_spill] sm:$0xff] %v5013_v59  ;;  %v5024_v37 = vld [vmem:[#allocation2 + $0x150] sm:$0xff]  ;;  %v5033_v42 = vld [vmem:[#allocation2 + $0x167] sm:$0xff] }
 0x141   : > { %v2134_v62 = vadd.f32 %v2102_v46, %v2067_v48  ;;  %v1760_v24 = vadd.f32 %v1728_v27, %v1693_v41  ;;  %v1795_v2 = vmul.f32 %v5013_v59, %v4721_v44  ;;  %7280 = vst [vmem:[#allocation22_spill] sm:$0xff] %v5020_v0  ;;  %v1862_v33 = vmul.f32 %v5020_v0, %v4840_v52  ;;  %v5029_v27 = vld [vmem:[%s6590_s1 + $0x118] sm:$0xff] }
 0x142   : > { %7281 = vst [vmem:[#allocation36_spill] sm:$0xff] %v5024_v37  ;;  %v1453_v46 = vadd.f32 %v1421_v55, %v1386_v53  ;;  %7282 = vst [vmem:[#allocation13_spill] sm:$0xff] %v5029_v27  ;;  %v1488_v60 = vmul.f32 %v5029_v27, %v4842_v1  ;;  %v1079_v5 = vadd.f32 %v1047_v45, %v1012_v4  ;;  %v5040_v53 = vld [vmem:[%s6590_s1 + $0x170] sm:$0xff]  ;;  %v5047_v27 = vld [vmem:[%s6590_s1 + $0x40] sm:$0xff] }
 0x143   : > { %7283 = vst [vmem:[#allocation19_spill] sm:$0xff] %v5033_v42  ;;  %v1181_v48 = vmul.f32 %v5033_v42, %v4856_v14  ;;  %v2201_v41 = vadd.f32 %v2169_v34, %v2134_v62  ;;  %v1827_v15 = vadd.f32 %v1795_v2, %v1760_v24  ;;  %7284 = vst [vmem:[#allocation103_spill] sm:$0xff] %v5040_v53  ;;  %v5054_v34 = vld [vmem:[%s6590_s1 + $0x90] sm:$0xff]  ;;  %v5061_v24 = vld [vmem:[%s6590_s1 + $0x168] sm:$0xff] }
 0x144   : > { %v1929_v55 = vmul.f32 %v5040_v53, %v4998_v38  ;;  %7285 = vst [vmem:[#allocation109_spill] sm:$0xff] %v5047_v27  ;;  %v2036_v45 = vmul.f32 %v5047_v27, %v7212_v61  ;;  %7286 = vst [vmem:[#allocation108_spill] sm:$0xff] %v5054_v34  ;;  %v2103_v4 = vmul.f32 %v5054_v34, %v4642_v29  ;;  %v5068_v27 = vld [vmem:[%s6590_s1 + $0xe0] sm:$0xff] }
 0x145   : > { %v1520_v62 = vadd.f32 %v1488_v60, %v1453_v46  ;;  %7287 = vst [vmem:[#allocation155_spill] sm:$0xff] %v5061_v24  ;;  %v1555_v2 = vmul.f32 %v5061_v24, %v5024_v37  ;;  %v1146_v53 = vadd.f32 %v1114_v19, %v1079_v5  ;;  %v2268_v14 = vadd.f32 %v2236_v6, %v2201_v41  ;;  %v5075_v46 = vld [vmem:[%s6590_s1 + $0x130] sm:$0xff]  ;;  %v5082_v6 = vld [vmem:[%s6590_s1 + $0x38] sm:$0xff] }
 0x146   : > { %v1894_v61 = vadd.f32 %v1862_v33, %v1827_v15  ;;  %7288 = vst [vmem:[#allocation40_spill] sm:$0xff] %v5068_v27  ;;  %v2170_v34 = vmul.f32 %v5068_v27, %v4752_v26  ;;  %7289 = vst [vmem:[#allocation16_spill] sm:$0xff] %v5075_v46  ;;  %v2237_v60 = vmul.f32 %v5075_v46, %v4868_v57  ;;  %v5091_v46 = vld [vmem:[%s6590_s1 + $0x88] sm:$0xff] }
 0x147   : > { %v1587_v24 = vadd.f32 %v1555_v2, %v1520_v62  ;;  %7290 = vst [vmem:[#allocation21_spill] sm:$0xff] %v5082_v6  ;;  %v1662_v19 = vmul.f32 %v5082_v6, %v7252_v35  ;;  %v1213_v33 = vadd.f32 %v1181_v48, %v1146_v53  ;;  %v1288_v5 = vmul.f32 %v4879_v39, %v7255_v16  ;;  %v5098_v2 = vld [vmem:[%s6590_s1 + $0xd8] sm:$0xff]  ;;  %v5102_v48 = vld [vmem:[#allocation2 + $0x14a] sm:$0xff] }
 0x148   : > { %v2335_v41 = vadd.f32 %v2303_v22, %v2268_v14  ;;  %v1961_v15 = vadd.f32 %v1929_v55, %v1894_v61  ;;  %7291 = vst [vmem:[#allocation116_spill] sm:$0xff] %v5091_v46  ;;  %v1729_v62 = vmul.f32 %v5091_v46, %v7226_v63  ;;  %7292 = vst [vmem:[#allocation134_spill] sm:$0xff] %v5098_v2  ;;  %v7294_v53 = vld [vmem:[#allocation60_spill] sm:$0xff]  ;;  %v7295_v55 = vld [vmem:[#allocation35_spill] sm:$0xff] }
 0x149   : > { %v1796_v35 = vmul.f32 %v5098_v2, %v7264_v20  ;;  %7293 = vst [vmem:[#allocation43_spill] sm:$0xff] %v5102_v48  ;;  %v1694_v14 = vadd.f32 %v1662_v19, %v1587_v24  ;;  %v1320_v16 = vadd.f32 %v1288_v5, %v1213_v33  ;;  %v1355_v22 = vmul.f32 %v4890_v11, %v4691_v31  ;;  %v5116_v20 = vld [vmem:[#allocation2 + $0x151] sm:$0xff] }
 0x14a   : > { %v946_v61 = vadd.f32 %v7295_v55, %v7294_v53  ;;  %2368 = vst [vmem:[%s4454_s29 + $0x58] sm:$0xff] %v2335_v41  ;;  %v5110_v46 = vadd.f32 %v4898_v32, %v2335_v41  ;;  %v2068_v39 = vadd.f32 %v2036_v45, %v1961_v15  ;;  %v1422_v6 = vmul.f32 %v4917_v43, %v4786_v28  ;;  %v7297_v33 = vld [vmem:[#allocation42_spill] sm:$0xff]  ;;  %v5124_v32 = vld [vmem:[%s6590_s1 + $0x180] sm:$0xff]  ;;  %v5146_v43 = vld [vmem:[%s6590_s1 + $0x178] sm:$0xff] }
 0x14b   : > { %v1048_v2 = vmul.f32 %v4803_v23, %v7261_v36  ;;  %7296 = vst [vmem:[#allocation18_spill] sm:$0xff] %v5116_v20  ;;  %v1761_v24 = vadd.f32 %v1729_v62, %v1694_v14  ;;  %v1387_v19 = vadd.f32 %v1355_v22, %v1320_v16  ;;  %v1115_v53 = vmul.f32 %v4927_v47, %v4910_v30  ;;  %v5131_v23 = vld [vmem:[%s6590_s1 + $0x128] sm:$0xff]  ;;  %v7300_v36 = vld [vmem:[#allocation140_spill] sm:$0xff] }
 0x14c   : > { %v1013_v5 = vadd.f32 %v7297_v33, %v946_v61  ;;  %v2135_v55 = vadd.f32 %v2103_v4, %v2068_v39  ;;  %7298 = vst [vmem:[#allocation102_spill] sm:$0xff] %v5124_v32  ;;  %v2304_v45 = vmul.f32 %v5124_v32, %v5102_v48  ;;  %7299 = vst [vmem:[#allocation25_spill] sm:$0xff] %v5131_v23  ;;  %v5135_v15 = vld [vmem:[#allocation2 + $0x168] sm:$0xff] }
 0x14d   : > { %v1863_v41 = vmul.f32 %v5131_v23, %v7300_v36  ;;  %v1489_v39 = vmul.f32 %v4941_v7, %v4925_v18  ;;  %v1828_v4 = vadd.f32 %v1796_v35, %v1761_v24  ;;  %v1454_v62 = vadd.f32 %v1422_v6, %v1387_v19  ;;  %v5139_v16 = vld [vmem:[#allocation2 + $0x16f] sm:$0xff]  ;;  %v7301_v22 = vld [vmem:[#allocation149_spill] sm:$0xff]  ;;  %7302 = vst [vmem:[#allocation9_spill] sm:$0xff] %v5146_v43 }
 0x14e   : > { %v1080_v14 = vadd.f32 %v1048_v2, %v1013_v5  ;;  %v1182_v61 = vmul.f32 %v5139_v16, %v7301_v22  ;;  %v2202_v33 = vadd.f32 %v2170_v34, %v2135_v55  ;;  %v1930_v23 = vmul.f32 %v5146_v43, %v5116_v20  ;;  %v5153_v35 = vld [vmem:[%s6590_s1 + $0x48] sm:$0xff]  ;;  %v5160_v34 = vld [vmem:[%s6590_s1 + $0x98] sm:$0xff] }
 0x14f   : > { %7303 = vst [vmem:[#allocation148_spill] sm:$0xff] %v5153_v35  ;;  %v2037_v6 = vmul.f32 %v5153_v35, %v7197_v58  ;;  %7304 = vst [vmem:[#allocation130_spill] sm:$0xff] %v5160_v34  ;;  %v2104_v2 = vmul.f32 %v5160_v34, %v4695_v17  ;;  %v1895_v24 = vadd.f32 %v1863_v41, %v1828_v4  ;;  %v5169_v22 = vld [vmem:[%s6590_s1 + $0xe8] sm:$0xff]  ;;  %v5176_v35 = vld [vmem:[%s6590_s1 + $0x138] sm:$0xff] }
 0x150   : > { %v1521_v19 = vadd.f32 %v1489_v39, %v1454_v62  ;;  %v1556_v5 = vmul.f32 %v4954_v40, %v5135_v15  ;;  %v1147_v55 = vadd.f32 %v1115_v53, %v1080_v14  ;;  %v2269_v7 = vadd.f32 %v2237_v60, %v2202_v33  ;;  %7305 = vst [vmem:[#allocation107_spill] sm:$0xff] %v5169_v22 }
 0x151   : > { %v2171_v58 = vmul.f32 %v5169_v22, %v4821_v56  ;;  %7306 = vst [vmem:[#allocation115_spill] sm:$0xff] %v5176_v35  ;;  %v2238_v41 = vmul.f32 %v5176_v35, %v4936_v10  ;;  %v1663_v60 = vmul.f32 %v4972_v8, %v4615_v21  ;;  %v1962_v53 = vadd.f32 %v1930_v23, %v1895_v24  ;;  %v5190_v35 = vld [vmem:[#allocation2 + $0x152] sm:$0xff]  ;;  %v7307_v24 = vld [vmem:[#allocation64_spill] sm:$0xff] }
 0x152   : > { %v1588_v39 = vadd.f32 %v1556_v5, %v1521_v19  ;;  %v1214_v4 = vadd.f32 %v1182_v61, %v1147_v55  ;;  %v1289_v62 = vmul.f32 %v4965_v3, %v4646_v12  ;;  %v2336_v14 = vadd.f32 %v2304_v45, %v2269_v7  ;;  %v7308_v61 = vld [vmem:[#allocation38_spill] sm:$0xff] }
 0x153   : > { %v1730_v33 = vmul.f32 %v4979_v50, %v4721_v44  ;;  %v1797_v40 = vmul.f32 %v5013_v59, %v4840_v52  ;;  %v1356_v22 = vmul.f32 %v4986_v13, %v4735_v25  ;;  %v2069_v10 = vadd.f32 %v2037_v6, %v1962_v53  ;;  %v5203_v45 = vld [vmem:[%s6590_s1 + $0xb0] sm:$0xff] }
 0x154   : > { %v1695_v21 = vadd.f32 %v1663_v60, %v1588_v39  ;;  %v1321_v23 = vadd.f32 %v1289_v62, %v1214_v4  ;;  %v947_v19 = vadd.f32 %v7308_v61, %v7307_v24  ;;  %2369 = vst [vmem:[%s4454_s29 + $0x60] sm:$0xff] %v2336_v14  ;;  %v5196_v12 = vadd.f32 %v4994_v51, %v2336_v14  ;;  %v5209_v60 = vld [vmem:[#allocation2 + $0x169] sm:$0xff]  ;;  %v7315_v59 = vld [vmem:[#allocation103_spill] sm:$0xff] }
 0x155   : > { %v1423_v7 = vmul.f32 %v5003_v49, %v4842_v1  ;;  %7310 = vst [vmem:[#allocation20_spill] sm:$0xff] %v5203_v45  ;;  %v1049_v6 = vmul.f32 %v5203_v45, %v4851_v54  ;;  %v1116_v5 = vmul.f32 %v5033_v42, %v4836_v9  ;;  %v2136_v55 = vadd.f32 %v2104_v2, %v2069_v10  ;;  %v5211_v51 = vld [vmem:[#allocation2 + $0x170] sm:$0xff]  ;;  %v7311_v4 = vld [vmem:[#allocation45_spill] sm:$0xff] }
 0x156   : > { %7309 = vst [vmem:[#allocation46_spill] sm:$0xff] %v5196_v12  ;;  %v1762_v53 = vadd.f32 %v1730_v33, %v1695_v21  ;;  %v1388_v39 = vadd.f32 %v1356_v22, %v1321_v23  ;;  %v1014_v62 = vadd.f32 %v7311_v4, %v947_v19  ;;  %v5217_v14 = vld [vmem:[%s6590_s1 + $0x188] sm:$0xff]  ;;  %v1864_v24 = vmul.f32 %v5020_v0, %v4998_v38  ;;  %v7314_v21 = vld [vmem:[#allocation139_spill] sm:$0xff]  ;;  %v7317_v0 = vld [vmem:[#allocation108_spill] sm:$0xff] }
 0x157   : > { %7312 = vst [vmem:[#allocation110_spill] sm:$0xff] %v5217_v14  ;;  %v2305_v54 = vmul.f32 %v5217_v14, %v5190_v35  ;;  %v7313_v10 = vld [vmem:[#allocation13_spill] sm:$0xff]  ;;  %v2203_v23 = vadd.f32 %v2171_v58, %v2136_v55  ;;  %v1931_v9 = vmul.f32 %v7315_v59, %v5209_v60  ;;  %v2105_v38 = vmul.f32 %v7317_v0, %v4752_v26 }
 0x158   : > { %v1490_v2 = vmul.f32 %v7313_v10, %v5024_v37  ;;  %v5225_v33 = vld [vmem:[#allocation2 + $0x187] sm:$0xff]  ;;  %v1829_v61 = vadd.f32 %v1797_v40, %v1762_v53  ;;  %v1455_v19 = vadd.f32 %v1423_v7, %v1388_v39  ;;  %v1081_v4 = vadd.f32 %v1049_v6, %v1014_v62  ;;  %v7318_v10 = vld [vmem:[#allocation155_spill] sm:$0xff]  ;;  %v7319_v6 = vld [vmem:[#allocation16_spill] sm:$0xff] }
 0x159   : > { %v1183_v22 = vmul.f32 %v5225_v33, %v7314_v21  ;;  %v7316_v49 = vld [vmem:[#allocation109_spill] sm:$0xff]  ;;  %v1557_v37 = vmul.f32 %v7318_v10, %v5211_v51  ;;  %v2270_v42 = vadd.f32 %v2238_v41, %v2203_v23  ;;  %v5237_v21 = vld [vmem:[#allocation2 + $0x16a] sm:$0xff]  ;;  %v2172_v7 = vmul.f32 %v5068_v27, %v4868_v57  ;;  %v7321_v39 = vld [vmem:[#allocation31_spill] sm:$0xff] }
 0x15a   : > { %v2038_v45 = vmul.f32 %v7316_v49, %v4642_v29  ;;  %v1896_v12 = vadd.f32 %v1864_v24, %v1829_v61  ;;  %v1522_v40 = vadd.f32 %v1490_v2, %v1455_v19  ;;  %v1148_v58 = vadd.f32 %v1116_v5, %v1081_v4  ;;  %v7320_v29 = vld [vmem:[#allocation21_spill] sm:$0xff]  ;;  %v7322_v5 = vld [vmem:[#allocation120_spill] sm:$0xff] }
 0x15b   : > { %v2239_v55 = vmul.f32 %v7319_v6, %v5102_v48  ;;  %v1664_v53 = vmul.f32 %v7320_v29, %v7226_v63  ;;  %v1290_v62 = vmul.f32 %v7321_v39, %v4691_v31  ;;  %v2337_v10 = vadd.f32 %v2305_v54, %v2270_v42  ;;  %v7323_v61 = vld [vmem:[#allocation116_spill] sm:$0xff]  ;;  %v7324_v6 = vld [vmem:[#allocation67_spill] sm:$0xff]  ;;  %v7325_v27 = vld [vmem:[#allocation41_spill] sm:$0xff] }
 0x15c   : > { %v1963_v41 = vadd.f32 %v1931_v9, %v1896_v12  ;;  %v1589_v24 = vadd.f32 %v1557_v37, %v1522_v40  ;;  %v1215_v23 = vadd.f32 %v1183_v22, %v1148_v58  ;;  %v2306_v2 = vmul.f32 %v5124_v32, %v5237_v21  ;;  %v5259_v9 = vld [vmem:[#allocation2 + $0x171] sm:$0xff]  ;;  %v7328_v22 = vld [vmem:[#allocation49_spill] sm:$0xff] }
 0x15d   : > { %v1731_v19 = vmul.f32 %v7323_v61, %v7322_v5  ;;  %v1357_v4 = vmul.f32 %v4890_v11, %v4786_v28  ;;  %v948_v48 = vadd.f32 %v7325_v27, %v7324_v6  ;;  %2370 = vst [vmem:[%s4454_s29 + $0x68] sm:$0xff] %v2337_v10  ;;  %v5257_v63 = vadd.f32 %v5110_v46, %v2337_v10  ;;  %v7327_v12 = vld [vmem:[#allocation134_spill] sm:$0xff]  ;;  %v5267_v58 = vld [vmem:[%s6590_s1 + $0xb8] sm:$0xff]  ;;  %v7333_v32 = vld [vmem:[#allocation149_spill] sm:$0xff] }
 0x15e   : > { %v2070_v31 = vadd.f32 %v2038_v45, %v1963_v41  ;;  %7326 = vst [vmem:[#allocation23_spill] sm:$0xff] %v5259_v9  ;;  %v1696_v37 = vadd.f32 %v1664_v53, %v1589_v24  ;;  %v1322_v42 = vadd.f32 %v1290_v62, %v1215_v23  ;;  %v1798_v54 = vmul.f32 %v7327_v12, %v7300_v36  ;;  %v7330_v53 = vld [vmem:[#allocation147_spill] sm:$0xff]  ;;  %v7331_v41 = vld [vmem:[#allocation25_spill] sm:$0xff] }
 0x15f   : > { %v1015_v40 = vadd.f32 %v7328_v22, %v948_v48  ;;  %7329 = vst [vmem:[#allocation27_spill] sm:$0xff] %v5267_v58  ;;  %v1050_v27 = vmul.f32 %v5267_v58, %v4927_v47  ;;  %v1117_v46 = vmul.f32 %v5139_v16, %v4910_v30  ;;  %v1424_v62 = vmul.f32 %v7330_v53, %v4925_v18  ;;  %v5279_v22 = vld [vmem:[#allocation2 + $0x18f] sm:$0xff] }
 0x160   : > { %v2137_v45 = vadd.f32 %v2105_v38, %v2070_v31  ;;  %v1763_v10 = vadd.f32 %v1731_v19, %v1696_v37  ;;  %v1389_v6 = vadd.f32 %v1357_v4, %v1322_v42  ;;  %v1865_v48 = vmul.f32 %v7331_v41, %v5116_v20  ;;  %7332 = vst [vmem:[#allocation111_spill] sm:$0xff] %v5279_v22  ;;  %v5283_v38 = vld [vmem:[#allocation2 + $0x172] sm:$0xff]  ;;  %v7336_v37 = vld [vmem:[#allocation148_spill] sm:$0xff] }
 0x161   : > { %v1932_v24 = vmul.f32 %v5146_v43, %v5259_v9  ;;  %v1082_v23 = vadd.f32 %v1050_v27, %v1015_v40  ;;  %v1184_v47 = vmul.f32 %v5279_v22, %v7333_v32  ;;  %7334 = vst [vmem:[#allocation112_spill] sm:$0xff] %v5283_v38  ;;  %v7335_v4 = vld [vmem:[#allocation11_spill] sm:$0xff]  ;;  %v2039_v42 = vmul.f32 %v7336_v37, %v4695_v17  ;;  %v7337_v40 = vld [vmem:[#allocation34_spill] sm:$0xff] }
 0x162   : > { %v2204_v58 = vadd.f32 %v2172_v7, %v2137_v45  ;;  %v1830_v30 = vadd.f32 %v1798_v54, %v1763_v10  ;;  %v1456_v19 = vadd.f32 %v1424_v62, %v1389_v6  ;;  %v1491_v31 = vmul.f32 %v7335_v4, %v5135_v15  ;;  %v7338_v27 = vld [vmem:[#allocation107_spill] sm:$0xff]  ;;  %v5293_v9 = vld [vmem:[#allocation2 + $0x188] sm:$0xff] }
 0x163   : > { %v2106_v43 = vmul.f32 %v5160_v34, %v4821_v56  ;;  %v2173_v41 = vmul.f32 %v7338_v27, %v7337_v40  ;;  %v1149_v32 = vadd.f32 %v1117_v46, %v1082_v23  ;;  %v7339_v10 = vld [vmem:[#allocation17_spill] sm:$0xff]  ;;  %v7340_v62 = vld [vmem:[#allocation115_spill] sm:$0xff]  ;;  %v2307_v17 = vmul.f32 %v5217_v14, %v5283_v38 }
 0x164   : > { %v2271_v7 = vadd.f32 %v2239_v55, %v2204_v58  ;;  %v1897_v54 = vadd.f32 %v1865_v48, %v1830_v30  ;;  %v1523_v45 = vadd.f32 %v1491_v31, %v1456_v19  ;;  %v1558_v6 = vmul.f32 %v7339_v10, %v5293_v9  ;;  %v7341_v23 = vld [vmem:[#allocation69_spill] sm:$0xff]  ;;  %v7342_v19 = vld [vmem:[#allocation44_spill] sm:$0xff]  ;;  %v7349_v14 = vld [vmem:[#allocation51_spill] sm:$0xff] }
 0x165   : > { %v2240_v4 = vmul.f32 %v7340_v62, %v5190_v35  ;;  %v1216_v34 = vadd.f32 %v1184_v47, %v1149_v32  ;;  %v1291_v27 = vmul.f32 %v4965_v3, %v4735_v25  ;;  %v1665_v30 = vmul.f32 %v4972_v8, %v4721_v44  ;;  %v7343_v32 = vld [vmem:[#allocation46_spill] sm:$0xff] }
 0x166   : > { %v2338_v40 = vadd.f32 %v2306_v2, %v2271_v7  ;;  %v1964_v37 = vadd.f32 %v1932_v24, %v1897_v54  ;;  %v1590_v46 = vadd.f32 %v1558_v6, %v1523_v45  ;;  %v1732_v55 = vmul.f32 %v4979_v50, %v4840_v52  ;;  %v7344_v24 = vld [vmem:[#allocation19_spill] sm:$0xff]  ;;  %v7345_v7 = vld [vmem:[#allocation20_spill] sm:$0xff]  ;;  %v5317_v44 = vld [vmem:[#allocation2 + $0x189] sm:$0xff] }
 0x167   : > { %v1323_v58 = vadd.f32 %v1291_v27, %v1216_v34  ;;  %v1358_v48 = vmul.f32 %v4986_v13, %v4842_v1  ;;  %v949_v31 = vadd.f32 %v7342_v19, %v7341_v23  ;;  %v1051_v54 = vmul.f32 %v7345_v7, %v7344_v24  ;;  %7346 = vst [vmem:[#allocation122_spill] sm:$0xff] %v5317_v44  ;;  %v7347_v6 = vld [vmem:[#allocation36_spill] sm:$0xff]  ;;  %v7350_v50 = vld [vmem:[#allocation138_spill] sm:$0xff]  ;;  %v7354_v24 = vld [vmem:[#allocation13_spill] sm:$0xff] }
 0x168   : > { %2371 = vst [vmem:[%s4454_s29 + $0x70] sm:$0xff] %v2338_v40  ;;  %v5313_v47 = vadd.f32 %v7343_v32, %v2338_v40  ;;  %v2071_v25 = vadd.f32 %v2039_v42, %v1964_v37  ;;  %v1697_v2 = vadd.f32 %v1665_v30, %v1590_v46  ;;  %v7348_v34 = vld [vmem:[#allocation100_spill] sm:$0xff]  ;;  %v1118_v23 = vmul.f32 %v5225_v33, %v7350_v50  ;;  %v7351_v40 = vld [vmem:[#allocation98_spill] sm:$0xff]  ;;  %v7352_v32 = vld [vmem:[#allocation97_spill] sm:$0xff] }
 0x169   : > { %v1390_v45 = vadd.f32 %v1358_v48, %v1323_v58  ;;  %v1425_v27 = vmul.f32 %v7348_v34, %v7347_v6  ;;  %v1016_v13 = vadd.f32 %v7349_v14, %v949_v31  ;;  %v1799_v37 = vmul.f32 %v7352_v32, %v7351_v40  ;;  %v7353_v42 = vld [vmem:[#allocation22_spill] sm:$0xff]  ;;  %v7356_v34 = vld [vmem:[#allocation139_spill] sm:$0xff] }
 0x16a   : > { %v2138_v19 = vadd.f32 %v2106_v43, %v2071_v25  ;;  %v1764_v3 = vadd.f32 %v1732_v55, %v1697_v2  ;;  %v1866_v46 = vmul.f32 %v7353_v42, %v5209_v60  ;;  %v1492_v58 = vmul.f32 %v7354_v24, %v5211_v51  ;;  %v5330_v7 = vld [vmem:[#allocation2 + $0x1a7] sm:$0xff]  ;;  %v5338_v25 = vld [vmem:[#allocation2 + $0x190] sm:$0xff] }
 0x16b   : > { %v1457_v30 = vadd.f32 %v1425_v27, %v1390_v45  ;;  %v1083_v48 = vadd.f32 %v1051_v54, %v1016_v13  ;;  %7355 = vst [vmem:[#allocation91_spill] sm:$0xff] %v5330_v7  ;;  %v1185_v14 = vmul.f32 %v5330_v7, %v7356_v34  ;;  %v1933_v43 = vmul.f32 %v7315_v59, %v5317_v44  ;;  %v7358_v13 = vld [vmem:[#allocation155_spill] sm:$0xff] }
 0x16c   : > { %v2205_v31 = vadd.f32 %v2173_v41, %v2138_v19  ;;  %v1831_v50 = vadd.f32 %v1799_v37, %v1764_v3  ;;  %v2040_v55 = vmul.f32 %v7316_v49, %v4752_v26  ;;  %7357 = vst [vmem:[#allocation128_spill] sm:$0xff] %v5338_v25  ;;  %v2107_v2 = vmul.f32 %v7317_v0, %v4868_v57  ;;  %v7359_v41 = vld [vmem:[#allocation43_spill] sm:$0xff]  ;;  %v7360_v3 = vld [vmem:[#allocation40_spill] sm:$0xff] }
 0x16d   : > { %v1524_v45 = vadd.f32 %v1492_v58, %v1457_v30  ;;  %v1559_v54 = vmul.f32 %v7358_v13, %v5338_v25  ;;  %v1150_v27 = vadd.f32 %v1118_v23, %v1083_v48  ;;  %v2174_v19 = vmul.f32 %v7360_v3, %v7359_v41  ;;  %v7361_v37 = vld [vmem:[#allocation16_spill] sm:$0xff]  ;;  %v5356_v23 = vld [vmem:[#allocation2 + $0x18a] sm:$0xff] }
 0x16e   : > { %v2272_v24 = vadd.f32 %v2240_v4, %v2205_v31  ;;  %v1898_v34 = vadd.f32 %v1866_v46, %v1831_v50  ;;  %v2241_v59 = vmul.f32 %v7361_v37, %v5237_v21  ;;  %v1666_v49 = vmul.f32 %v7320_v29, %v7322_v5  ;;  %v7362_v5 = vld [vmem:[#allocation71_spill] sm:$0xff] }
 0x16f   : > { %v1591_v26 = vadd.f32 %v1559_v54, %v1524_v45  ;;  %v1217_v42 = vadd.f32 %v1185_v14, %v1150_v27  ;;  %v1292_v30 = vmul.f32 %v7321_v39, %v4786_v28  ;;  %v1733_v50 = vmul.f32 %v7323_v61, %v7300_v36  ;;  %v7363_v14 = vld [vmem:[#allocation47_spill] sm:$0xff]  ;;  %v7366_v27 = vld [vmem:[#allocation54_spill] sm:$0xff] }
 0x170   : > { %v2339_v58 = vadd.f32 %v2307_v17, %v2272_v24  ;;  %v1965_v13 = vadd.f32 %v1933_v43, %v1898_v34  ;;  %v1800_v4 = vmul.f32 %v7327_v12, %v5116_v20  ;;  %v1359_v31 = vmul.f32 %v4890_v11, %v4925_v18  ;;  %v7365_v24 = vld [vmem:[#allocation27_spill] sm:$0xff] }
 0x171   : > { %v1698_v46 = vadd.f32 %v1666_v49, %v1591_v26  ;;  %v1324_v48 = vadd.f32 %v1292_v30, %v1217_v42  ;;  %v950_v45 = vadd.f32 %v7363_v14, %v7362_v5  ;;  %v1426_v34 = vmul.f32 %v7330_v53, %v5135_v15  ;;  %v5370_v54 = vld [vmem:[#allocation2 + $0x191] sm:$0xff] }
 0x172   : > { %2372 = vst [vmem:[%s4454_s29 + $0x78] sm:$0xff] %v2339_v58  ;;  %v5364_v28 = vadd.f32 %v5257_v63, %v2339_v58  ;;  %v2072_v17 = vadd.f32 %v2040_v55, %v1965_v13  ;;  %v1052_v43 = vmul.f32 %v7365_v24, %v5139_v16  ;;  %v7367_v30 = vld [vmem:[#allocation14_spill] sm:$0xff]  ;;  %v7369_v55 = vld [vmem:[#allocation23_spill] sm:$0xff]  ;;  %v7370_v13 = vld [vmem:[#allocation25_spill] sm:$0xff] }
 0x173   : > { %v1765_v49 = vadd.f32 %v1733_v50, %v1698_v46  ;;  %v1391_v42 = vadd.f32 %v1359_v31, %v1324_v48  ;;  %v1017_v26 = vadd.f32 %v7366_v27, %v950_v45  ;;  %v1119_v5 = vmul.f32 %v5279_v22, %v7367_v30  ;;  %v7368_v63 = vld [vmem:[#allocation102_spill] sm:$0xff]  ;;  %v7371_v53 = vld [vmem:[#allocation11_spill] sm:$0xff]  ;;  %v7372_v46 = vld [vmem:[#allocation149_spill] sm:$0xff] }
 0x174   : > { %7364 = vst [vmem:[#allocation123_spill] sm:$0xff] %v5364_v28  ;;  %v2139_v14 = vadd.f32 %v2107_v2, %v2072_v17  ;;  %v2308_v58 = vmul.f32 %v7368_v63, %v5356_v23  ;;  %v1867_v12 = vmul.f32 %v7370_v13, %v7369_v55  ;;  %v1493_v28 = vmul.f32 %v7371_v53, %v5293_v9  ;;  %v5381_v50 = vld [vmem:[#allocation2 + $0x1af] sm:$0xff]  ;;  %v7373_v2 = vld [vmem:[#allocation9_spill] sm:$0xff]  ;;  %v7374_v17 = vld [vmem:[#allocation148_spill] sm:$0xff] }
 0x175   : > { %v1832_v16 = vadd.f32 %v1800_v4, %v1765_v49  ;;  %v1458_v24 = vadd.f32 %v1426_v34, %v1391_v42  ;;  %v1084_v11 = vadd.f32 %v1052_v43, %v1017_v26  ;;  %v1186_v48 = vmul.f32 %v5381_v50, %v7372_v46  ;;  %v7375_v30 = vld [vmem:[#allocation34_spill] sm:$0xff] }
 0x176   : > { %v2206_v31 = vadd.f32 %v2174_v19, %v2139_v14  ;;  %v1934_v45 = vmul.f32 %v7373_v2, %v5370_v54  ;;  %v2041_v27 = vmul.f32 %v7374_v17, %v4821_v56  ;;  %v7376_v13 = vld [vmem:[#allocation130_spill] sm:$0xff]  ;;  %v7377_v19 = vld [vmem:[#allocation107_spill] sm:$0xff]  ;;  %v2242_v14 = vmul.f32 %v7340_v62, %v5283_v38 }
 0x177   : > { %v2108_v22 = vmul.f32 %v7376_v13, %v7375_v30  ;;  %v5391_v55 = vld [vmem:[#allocation2 + $0x1a8] sm:$0xff]  ;;  %v1899_v4 = vadd.f32 %v1867_v12, %v1832_v16  ;;  %v1525_v34 = vadd.f32 %v1493_v28, %v1458_v24  ;;  %v1151_v49 = vadd.f32 %v1119_v5, %v1084_v11  ;;  %v5409_v62 = vld [vmem:[#allocation2 + $0x192] sm:$0xff] }
 0x178   : > { %v1560_v43 = vmul.f32 %v7339_v10, %v5391_v55  ;;  %v2273_v42 = vadd.f32 %v2241_v59, %v2206_v31  ;;  %v2175_v26 = vmul.f32 %v7377_v19, %v5190_v35  ;;  %v1667_v56 = vmul.f32 %v4972_v8, %v4840_v52  ;;  %v7378_v12 = vld [vmem:[#allocation117_spill] sm:$0xff]  ;;  %7381 = vst [vmem:[#allocation48_spill] sm:$0xff] %v5409_v62 }
 0x179   : > { %v1966_v13 = vadd.f32 %v1934_v45, %v1899_v4  ;;  %v1218_v30 = vadd.f32 %v1186_v48, %v1151_v49  ;;  %v1293_v28 = vmul.f32 %v7378_v12, %v4842_v1  ;;  %v7379_v11 = vld [vmem:[#allocation121_spill] sm:$0xff]  ;;  %v1801_v5 = vmul.f32 %v7352_v32, %v5209_v60  ;;  %v7382_v4 = vld [vmem:[#allocation75_spill] sm:$0xff]  ;;  %v7383_v48 = vld [vmem:[#allocation50_spill] sm:$0xff] }
 0x17a   : > { %v1592_v17 = vadd.f32 %v1560_v43, %v1525_v34  ;;  %v2340_v24 = vadd.f32 %v2308_v58, %v2273_v42  ;;  %v1734_v59 = vmul.f32 %v7379_v11, %v7351_v40  ;;  %v7380_v16 = vld [vmem:[#allocation89_spill] sm:$0xff]  ;;  %v951_v34 = vadd.f32 %v7383_v48, %v7382_v4  ;;  %v7384_v58 = vld [vmem:[#allocation100_spill] sm:$0xff]  ;;  %v7386_v32 = vld [vmem:[#allocation138_spill] sm:$0xff] }
 0x17b   : > { %v1360_v31 = vmul.f32 %v7380_v16, %v7347_v6  ;;  %v2073_v10 = vadd.f32 %v2041_v27, %v1966_v13  ;;  %v1325_v45 = vadd.f32 %v1293_v28, %v1218_v30  ;;  %v1427_v43 = vmul.f32 %v7384_v58, %v5211_v51  ;;  %v7385_v49 = vld [vmem:[#allocation20_spill] sm:$0xff]  ;;  %v5423_v13 = vld [vmem:[#allocation2 + $0x1a9] sm:$0xff] }
 0x17c   : > { %v1699_v52 = vadd.f32 %v1667_v56, %v1592_v17  ;;  %2373 = vst [vmem:[%s4454_s29 + $0x80] sm:$0xff] %v2340_v24  ;;  %v5415_v1 = vadd.f32 %v5313_v47, %v2340_v24  ;;  %v1053_v42 = vmul.f32 %v5225_v33, %v7385_v49  ;;  %v1120_v16 = vmul.f32 %v5330_v7, %v7386_v32  ;;  %v7387_v27 = vld [vmem:[#allocation57_spill] sm:$0xff]  ;;  %v7388_v28 = vld [vmem:[#allocation110_spill] sm:$0xff]  ;;  %v7392_v49 = vld [vmem:[#allocation139_spill] sm:$0xff] }
 0x17d   : > { %v2140_v11 = vadd.f32 %v2108_v22, %v2073_v10  ;;  %v1392_v17 = vadd.f32 %v1360_v31, %v1325_v45  ;;  %v1018_v56 = vadd.f32 %v7387_v27, %v951_v34  ;;  %v2309_v47 = vmul.f32 %v7388_v28, %v5409_v62  ;;  %v7389_v24 = vld [vmem:[#allocation22_spill] sm:$0xff]  ;;  %v7390_v48 = vld [vmem:[#allocation13_spill] sm:$0xff]  ;;  %v7393_v45 = vld [vmem:[#allocation103_spill] sm:$0xff] }
 0x17e   : > { %v1766_v30 = vadd.f32 %v1734_v59, %v1699_v52  ;;  %v1868_v4 = vmul.f32 %v7389_v24, %v5317_v44  ;;  %v1494_v58 = vmul.f32 %v7390_v48, %v5338_v25  ;;  %v5432_v33 = vld [vmem:[#allocation2 + $0x1c7] sm:$0xff]  ;;  %v5436_v59 = vld [vmem:[#allocation2 + $0x1b0] sm:$0xff]  ;;  %v1935_v34 = vmul.f32 %v7393_v45, %v5423_v13 }
 0x17f   : > { %7391 = vst [vmem:[#allocation24_spill] sm:$0xff] %v5432_v33  ;;  %v1187_v22 = vmul.f32 %v5432_v33, %v7392_v49  ;;  %v2207_v10 = vadd.f32 %v2175_v26, %v2140_v11  ;;  %v1459_v31 = vadd.f32 %v1427_v43, %v1392_v17  ;;  %v1085_v52 = vadd.f32 %v1053_v42, %v1018_v56  ;;  %v7394_v27 = vld [vmem:[#allocation109_spill] sm:$0xff]  ;;  %v7395_v44 = vld [vmem:[#allocation155_spill] sm:$0xff]  ;;  %v5446_v26 = vld [vmem:[#allocation2 + $0x1aa] sm:$0xff] }
 0x180   : > { %v1833_v32 = vadd.f32 %v1801_v5, %v1766_v30  ;;  %v2042_v24 = vmul.f32 %v7394_v27, %v4868_v57  ;;  %v2109_v48 = vmul.f32 %v7317_v0, %v7359_v41  ;;  %v1561_v25 = vmul.f32 %v7395_v44, %v5436_v59  ;;  %7396 = vst [vmem:[#allocation99_spill] sm:$0xff] %v5446_v26 }
 0x181   : > { %v2274_v7 = vadd.f32 %v2242_v14, %v2207_v10  ;;  %v1526_v11 = vadd.f32 %v1494_v58, %v1459_v31  ;;  %v1152_v5 = vadd.f32 %v1120_v16, %v1085_v52  ;;  %v2176_v43 = vmul.f32 %v7360_v3, %v5237_v21  ;;  %v7398_v31 = vld [vmem:[#allocation78_spill] sm:$0xff]  ;;  %v7399_v52 = vld [vmem:[#allocation53_spill] sm:$0xff] }
 0x182   : > { %v1900_v49 = vadd.f32 %v1868_v4, %v1833_v32  ;;  %v2243_v42 = vmul.f32 %v7361_v37, %v5356_v23  ;;  %v1668_v57 = vmul.f32 %v7320_v29, %v7300_v36  ;;  %v1294_v30 = vmul.f32 %v7321_v39, %v4925_v18  ;;  %v7397_v4 = vld [vmem:[#allocation10_spill] sm:$0xff]  ;;  %v7400_v36 = vld [vmem:[#allocation123_spill] sm:$0xff] }
 0x183   : > { %v2341_v17 = vadd.f32 %v2309_v47, %v2274_v7  ;;  %v1593_v32 = vadd.f32 %v1561_v25, %v1526_v11  ;;  %v1219_v56 = vadd.f32 %v1187_v22, %v1152_v5  ;;  %v2310_v58 = vmul.f32 %v7368_v63, %v5446_v26  ;;  %v5468_v7 = vld [vmem:[#allocation2 + $0x1b1] sm:$0xff]  ;;  %v7403_v11 = vld [vmem:[#allocation61_spill] sm:$0xff] }
 0x184   : > { %v1967_v14 = vadd.f32 %v1935_v34, %v1900_v49  ;;  %v1735_v16 = vmul.f32 %v7323_v61, %v5116_v20  ;;  %v1361_v10 = vmul.f32 %v7397_v4, %v5135_v15  ;;  %v952_v37 = vadd.f32 %v7399_v52, %v7398_v31  ;;  %v7401_v47 = vld [vmem:[#allocation23_spill] sm:$0xff]  ;;  %v7402_v22 = vld [vmem:[#allocation134_spill] sm:$0xff] }
 0x185   : > { %2374 = vst [vmem:[%s4454_s29 + $0x88] sm:$0xff] %v2341_v17  ;;  %v5466_v29 = vadd.f32 %v7400_v36, %v2341_v17  ;;  %v1700_v25 = vadd.f32 %v1668_v57, %v1593_v32  ;;  %v1326_v49 = vadd.f32 %v1294_v30, %v1219_v56  ;;  %v1802_v34 = vmul.f32 %v7402_v22, %v7401_v47  ;;  %v7404_v63 = vld [vmem:[#allocation27_spill] sm:$0xff]  ;;  %v7406_v4 = vld [vmem:[#allocation14_spill] sm:$0xff]  ;;  %v7408_v57 = vld [vmem:[#allocation25_spill] sm:$0xff] }
 0x186   : > { %v2074_v18 = vadd.f32 %v2042_v24, %v1967_v14  ;;  %v1019_v5 = vadd.f32 %v7403_v11, %v952_v37  ;;  %v7405_v26 = vld [vmem:[#allocation111_spill] sm:$0xff]  ;;  %v1121_v31 = vmul.f32 %v5381_v50, %v7406_v4  ;;  %v1869_v30 = vmul.f32 %v7408_v57, %v5370_v54  ;;  %v7412_v57 = vld [vmem:[#allocation130_spill] sm:$0xff] }
 0x187   : > { %v1054_v61 = vmul.f32 %v7405_v26, %v7404_v63  ;;  %v1767_v20 = vadd.f32 %v1735_v16, %v1700_v25  ;;  %v1393_v17 = vadd.f32 %v1361_v10, %v1326_v49  ;;  %v7407_v24 = vld [vmem:[#allocation147_spill] sm:$0xff]  ;;  %v1936_v32 = vmul.f32 %v7373_v2, %v5468_v7  ;;  %v7411_v25 = vld [vmem:[#allocation148_spill] sm:$0xff] }
 0x188   : > { %v2141_v52 = vadd.f32 %v2109_v48, %v2074_v18  ;;  %v1428_v14 = vmul.f32 %v7407_v24, %v5293_v9  ;;  %v5483_v37 = vld [vmem:[#allocation2 + $0x1cf] sm:$0xff]  ;;  %v1495_v10 = vmul.f32 %v7371_v53, %v5391_v55  ;;  %v2110_v2 = vmul.f32 %v7412_v57, %v5190_v35 }
 0x189   : > { %v1086_v56 = vadd.f32 %v1054_v61, %v1019_v5  ;;  %v1188_v26 = vmul.f32 %v5483_v37, %v7372_v46  ;;  %v1834_v11 = vadd.f32 %v1802_v34, %v1767_v20  ;;  %v5487_v48 = vld [vmem:[#allocation2 + $0x1b2] sm:$0xff]  ;;  %v7410_v18 = vld [vmem:[#allocation34_spill] sm:$0xff]  ;;  %v5497_v61 = vmul.f32 %v7377_v19, %v5283_v38 }
 0x18a   : > { %v2208_v36 = vadd.f32 %v2176_v43, %v2141_v52  ;;  %7409 = vst [vmem:[#allocation119_spill] sm:$0xff] %v5487_v48  ;;  %v1460_v16 = vadd.f32 %v1428_v14, %v1393_v17  ;;  %v2043_v49 = vmul.f32 %v7411_v25, %v7410_v18  ;;  %v5499_v5 = vld [vmem:[#allocation2 + $0x1c8] sm:$0xff]  ;;  %v7414_v46 = vld [vmem:[#allocation115_spill] sm:$0xff]  ;;  %v5509_v57 = vmul.f32 %v7388_v28, %v5487_v48  ;;  %v7418_v28 = vld [vmem:[#allocation56_spill] sm:$0xff] }
 0x18b   : > { %v1153_v43 = vadd.f32 %v1121_v31, %v1086_v56  ;;  %v1901_v34 = vadd.f32 %v1869_v30, %v1834_v11  ;;  %v7413_v17 = vld [vmem:[#allocation17_spill] sm:$0xff]  ;;  %v5505_v18 = vmul.f32 %v7414_v46, %v5409_v62  ;;  %v1295_v38 = vmul.f32 %v7378_v12, %v7347_v6  ;;  %v7424_v48 = vld [vmem:[#allocation63_spill] sm:$0xff] }
 0x18c   : > { %v2275_v20 = vadd.f32 %v2243_v42, %v2208_v36  ;;  %v1527_v52 = vadd.f32 %v1495_v10, %v1460_v16  ;;  %v1562_v14 = vmul.f32 %v7413_v17, %v5499_v5  ;;  %v1669_v30 = vmul.f32 %v4972_v8, %v7351_v40  ;;  %v7415_v36 = vld [vmem:[#allocation121_spill] sm:$0xff] }
 0x18d   : > { %v1220_v19 = vadd.f32 %v1188_v26, %v1153_v43  ;;  %v1968_v42 = vadd.f32 %v1936_v32, %v1901_v34  ;;  %v1736_v11 = vmul.f32 %v7415_v36, %v5209_v60  ;;  %v7416_v10 = vld [vmem:[#allocation89_spill] sm:$0xff]  ;;  %v7419_v43 = vld [vmem:[#allocation20_spill] sm:$0xff] }
 0x18e   : > { %v2342_v31 = vadd.f32 %v2310_v58, %v2275_v20  ;;  %v1594_v56 = vadd.f32 %v1562_v14, %v1527_v52  ;;  %v1362_v46 = vmul.f32 %v7416_v10, %v5211_v51  ;;  %v7417_v62 = vld [vmem:[#allocation81_spill] sm:$0xff]  ;;  %v7420_v20 = vld [vmem:[#allocation91_spill] sm:$0xff]  ;;  %v7423_v52 = vld [vmem:[#allocation100_spill] sm:$0xff] }
 0x18f   : > { %v1327_v16 = vadd.f32 %v1295_v38, %v1220_v19  ;;  %v953_v26 = vadd.f32 %v7418_v28, %v7417_v62  ;;  %v2075_v58 = vadd.f32 %v2043_v49, %v1968_v42  ;;  %v5527_v40 = vmul.f32 %v7420_v20, %v7419_v43  ;;  %v5529_v34 = vld [vmem:[#allocation2 + $0x1c9] sm:$0xff]  ;;  %v7422_v19 = vld [vmem:[#allocation128_spill] sm:$0xff] }
 0x190   : > { %2375 = vst [vmem:[%s4454_s29 + $0x90] sm:$0xff] %v2342_v31  ;;  %v5523_v6 = vadd.f32 %v5415_v1, %v2342_v31  ;;  %v1701_v32 = vadd.f32 %v1669_v30, %v1594_v56  ;;  %7421 = vst [vmem:[#allocation137_spill] sm:$0xff] %v5529_v34  ;;  %v5535_v14 = vmul.f32 %v7423_v52, %v7422_v19  ;;  %v7425_v28 = vld [vmem:[#allocation138_spill] sm:$0xff]  ;;  %v7427_v56 = vld [vmem:[#allocation97_spill] sm:$0xff] }
 0x191   : > { %v5531_v38 = vadd.f32 %v1362_v46, %v1327_v16  ;;  %v5538_v62 = vadd.f32 %v7424_v48, %v953_v26  ;;  %v5542_v1 = vmul.f32 %v5432_v33, %v7425_v28  ;;  %v5544_v49 = vadd.f32 %v2110_v2, %v2075_v58  ;;  %v7426_v42 = vld [vmem:[#allocation122_spill] sm:$0xff] }
 0x192   : > { %v5546_v31 = vadd.f32 %v1736_v11, %v1701_v32  ;;  %v5550_v30 = vmul.f32 %v7427_v56, %v7426_v42  ;;  %v7428_v46 = vld [vmem:[#allocation22_spill] sm:$0xff] }
 0x193   : > { %v5554_v16 = vmul.f32 %v7428_v46, %v5423_v13  ;;  %v3112_v2 = vld [vmem:[#allocation2 + $0x48] sm:$0xff]  ;;  %v3113_v48 = vld [vmem:[#allocation2 + $0x50] sm:$0xff] }
 0x194   : > { %450 = vst [vmem:[%s5558_s14] sm:$0xff] %v3112_v2  ;;  %451 = vst [vmem:[%s5558_s14 + $0x8] sm:$0xff] %v3113_v48  ;;  %v3114_v11 = vld [vmem:[#allocation2 + $0x68] sm:$0xff]  ;;  %v3115_v26 = vld [vmem:[#allocation2 + $0x70] sm:$0xff] }
 0x195   : > { %452 = vst [vmem:[%s5558_s14 + $0x10] sm:$0xff] %v3114_v11  ;;  %453 = vst [vmem:[%s5558_s14 + $0x18] sm:$0xff] %v3115_v26  ;;  %v3116_v58 = vld [vmem:[#allocation2 + $0x88] sm:$0xff]  ;;  %v3117_v32 = vld [vmem:[#allocation2 + $0x90] sm:$0xff] }
 0x196   : > { %454 = vst [vmem:[%s5558_s14 + $0x20] sm:$0xff] %v3116_v58  ;;  %455 = vst [vmem:[%s5558_s14 + $0x28] sm:$0xff] %v3117_v32  ;;  %v3118_v20 = vld [vmem:[#allocation2 + $0xa8] sm:$0xff]  ;;  %v3119_v28 = vld [vmem:[#allocation2 + $0xb0] sm:$0xff] }
 0x197   : > { %456 = vst [vmem:[%s5558_s14 + $0x30] sm:$0xff] %v3118_v20  ;;  %457 = vst [vmem:[%s5558_s14 + $0x38] sm:$0xff] %v3119_v28  ;;  %v3120_v2 = vld [vmem:[#allocation2 + $0xc8] sm:$0xff]  ;;  %v3121_v48 = vld [vmem:[#allocation2 + $0xd0] sm:$0xff] }
 0x198   : > { %458 = vst [vmem:[%s5558_s14 + $0x40] sm:$0xff] %v3120_v2  ;;  %459 = vst [vmem:[%s5558_s14 + $0x48] sm:$0xff] %v3121_v48  ;;  %v3122_v11 = vld [vmem:[#allocation2 + $0xe8] sm:$0xff]  ;;  %v3123_v26 = vld [vmem:[#allocation2 + $0xf0] sm:$0xff] }
 0x199   : > { %460 = vst [vmem:[%s5558_s14 + $0x50] sm:$0xff] %v3122_v11  ;;  %461 = vst [vmem:[%s5558_s14 + $0x58] sm:$0xff] %v3123_v26  ;;  %v3124_v58 = vld [vmem:[#allocation2 + $0x108] sm:$0xff]  ;;  %v3125_v32 = vld [vmem:[#allocation2 + $0x110] sm:$0xff] }
 0x19a   : > { %462 = vst [vmem:[%s5558_s14 + $0x60] sm:$0xff] %v3124_v58  ;;  %463 = vst [vmem:[%s5558_s14 + $0x68] sm:$0xff] %v3125_v32  ;;  %v3126_v20 = vld [vmem:[#allocation2 + $0x128] sm:$0xff]  ;;  %v3127_v28 = vld [vmem:[#allocation2 + $0x130] sm:$0xff] }
 0x19b   : > { %464 = vst [vmem:[%s5558_s14 + $0x70] sm:$0xff] %v3126_v20  ;;  %465 = vst [vmem:[%s5558_s14 + $0x78] sm:$0xff] %v3127_v28  ;;  %v3128_v2 = vld [vmem:[#allocation2 + $0x148] sm:$0xff]  ;;  %v3129_v48 = vld [vmem:[#allocation2 + $0x150] sm:$0xff] }
 0x19c   : > { %466 = vst [vmem:[%s5558_s14 + $0x80] sm:$0xff] %v3128_v2  ;;  %467 = vst [vmem:[%s5558_s14 + $0x88] sm:$0xff] %v3129_v48  ;;  %v3130_v11 = vld [vmem:[#allocation2 + $0x168] sm:$0xff]  ;;  %v3131_v26 = vld [vmem:[#allocation2 + $0x170] sm:$0xff] }
 0x19d   : > { %468 = vst [vmem:[%s5558_s14 + $0x90] sm:$0xff] %v3130_v11  ;;  %469 = vst [vmem:[%s5558_s14 + $0x98] sm:$0xff] %v3131_v26  ;;  %v3132_v58 = vld [vmem:[#allocation2 + $0x188] sm:$0xff]  ;;  %v3133_v32 = vld [vmem:[#allocation2 + $0x190] sm:$0xff] }
 0x19e   : > { %470 = vst [vmem:[%s5558_s14 + $0xa0] sm:$0xff] %v3132_v58  ;;  %471 = vst [vmem:[%s5558_s14 + $0xa8] sm:$0xff] %v3133_v32  ;;  %v3134_v20 = vld [vmem:[#allocation2 + $0x1a8] sm:$0xff]  ;;  %v3135_v28 = vld [vmem:[#allocation2 + $0x1b0] sm:$0xff] }
 0x19f   : > { %472 = vst [vmem:[%s5558_s14 + $0xb0] sm:$0xff] %v3134_v20  ;;  %473 = vst [vmem:[%s5558_s14 + $0xb8] sm:$0xff] %v3135_v28  ;;  %v3136_v2 = vld [vmem:[#allocation2 + $0x1c8] sm:$0xff]  ;;  %v3137_v48 = vld [vmem:[#allocation2 + $0x1d0] sm:$0xff]  ;;  %v1461_v20 = vadd.f32 %v5535_v14, %v5531_v38  ;;  %v1937_v38 = vmul.f32 %v7393_v45, %v5529_v34  ;;  %v2044_v14 = vmul.f32 %v7394_v27, %v7359_v41 }
 0x1a0   : > { %474 = vst [vmem:[%s5558_s14 + $0xc0] sm:$0xff] %v3136_v2  ;;  %475 = vst [vmem:[%s5558_s14 + $0xc8] sm:$0xff] %v3137_v48  ;;  %v3138_v11 = vld [vmem:[#allocation2 + $0x1e8] sm:$0xff]  ;;  %v3139_v26 = vld [vmem:[#allocation2 + $0x1f0] sm:$0xff]  ;;  %v1087_v48 = vadd.f32 %v5527_v40, %v5538_v62  ;;  %v2178_v41 = vmul.f32 %v7360_v3, %v5356_v23 }
 0x1a1   : > { %476 = vst [vmem:[%s5558_s14 + $0xd0] sm:$0xff] %v3138_v11  ;;  %477 = vst [vmem:[%s5558_s14 + $0xd8] sm:$0xff] %v3139_v26  ;;  %v3140_v46 = vld [vmem:[#allocation2 + $0x208] sm:$0xff]  ;;  %v3141_v58 = vld [vmem:[#allocation2 + $0x210] sm:$0xff] }
 0x1a2   : > { %478 = vst [vmem:[%s5558_s14 + $0xe0] sm:$0xff] %v3140_v46  ;;  %479 = vst [vmem:[%s5558_s14 + $0xe8] sm:$0xff] %v3141_v58  ;;  %v3142_v32 = vld [vmem:[#allocation2 + $0x228] sm:$0xff]  ;;  %v3143_v33 = vld [vmem:[#allocation2 + $0x230] sm:$0xff]  ;;  %v2209_v58 = vadd.f32 %v5497_v61, %v5544_v49  ;;  %v1296_v61 = vmul.f32 %v7321_v39, %v5135_v15 }
 0x1a3   : > { %480 = vst [vmem:[%s5558_s14 + $0xf0] sm:$0xff] %v3142_v32  ;;  %481 = vst [vmem:[%s5558_s14 + $0xf8] sm:$0xff] %v3143_v33  ;;  %v7429_v28 = vld [vmem:[#allocation13_spill] sm:$0xff]  ;;  %v7430_v26 = vld [vmem:[#allocation139_spill] sm:$0xff]  ;;  %v1835_v33 = vadd.f32 %v5550_v30, %v5546_v31  ;;  %v2111_v30 = vmul.f32 %v7317_v0, %v5237_v21 }
 0x1a4   : > { %v1496_v2 = vmul.f32 %v7429_v28, %v5436_v59  ;;  %v5598_v11 = vld [vmem:[#allocation2 + $0x1e7] sm:$0xff]  ;;  %v5610_v32 = vld [vmem:[#allocation2 + $0x1d0] sm:$0xff]  ;;  %v2276_v49 = vadd.f32 %v5505_v18, %v2209_v58  ;;  %v7434_v18 = vld [vmem:[#allocation116_spill] sm:$0xff]  ;;  %v1804_v58 = vmul.f32 %v7402_v22, %v5370_v54 }
 0x1a5   : > { %v1189_v46 = vmul.f32 %v5598_v11, %v7430_v26  ;;  %v1563_v62 = vmul.f32 %v7395_v44, %v5610_v32  ;;  %v1154_v26 = vadd.f32 %v5542_v1, %v1087_v48  ;;  %v1902_v31 = vadd.f32 %v5554_v16, %v1835_v33  ;;  %v7432_v27 = vld [vmem:[#allocation21_spill] sm:$0xff]  ;;  %v7433_v1 = vld [vmem:[#allocation10_spill] sm:$0xff] }
 0x1a6   : > { %v1528_v40 = vadd.f32 %v1496_v2, %v1461_v20  ;;  %v7431_v2 = vld [vmem:[#allocation18_spill] sm:$0xff]  ;;  %v1363_v48 = vmul.f32 %v7433_v1, %v5293_v9  ;;  %v2343_v15 = vadd.f32 %v5509_v57, %v2276_v49  ;;  %v1737_v16 = vmul.f32 %v7434_v18, %v7401_v47 }
 0x1a7   : > { %v1670_v45 = vmul.f32 %v7432_v27, %v7431_v2  ;;  %v1221_v44 = vadd.f32 %v1189_v46, %v1154_v26  ;;  %v1969_v39 = vadd.f32 %v1937_v38, %v1902_v31  ;;  %v7436_v2 = vld [vmem:[#allocation59_spill] sm:$0xff]  ;;  %v1497_v38 = vmul.f32 %v7371_v53, %v5499_v5  ;;  %v5644_v31 = vld [vmem:[#allocation2 + $0x1ca] sm:$0xff] }
 0x1a8   : > { %v1595_v20 = vadd.f32 %v1563_v62, %v1528_v40  ;;  %v1430_v40 = vmul.f32 %v7407_v24, %v5391_v55  ;;  %v7435_v62 = vld [vmem:[#allocation83_spill] sm:$0xff]  ;;  %2376 = vst [vmem:[%s4454_s29 + $0x98] sm:$0xff] %v2343_v15  ;;  %v5638_v26 = vadd.f32 %v5466_v29, %v2343_v15  ;;  %v1056_v49 = vmul.f32 %v5381_v50, %v7404_v63  ;;  %v5648_v24 = vld [vmem:[#allocation2 + $0x1e8] sm:$0xff] }
 0x1a9   : > { %v1328_v0 = vadd.f32 %v1296_v61, %v1221_v44  ;;  %v954_v46 = vadd.f32 %v7436_v2, %v7435_v62  ;;  %v2076_v57 = vadd.f32 %v2044_v14, %v1969_v39  ;;  %7437 = vst [vmem:[#allocation30_spill] sm:$0xff] %v5644_v31  ;;  %v5646_v44 = vld [vmem:[#allocation2 + $0x1d1] sm:$0xff]  ;;  %v1123_v29 = vmul.f32 %v5483_v37, %v7406_v4  ;;  %v7441_v39 = vld [vmem:[#allocation16_spill] sm:$0xff]  ;;  %v7442_v62 = vld [vmem:[#allocation25_spill] sm:$0xff] }
 0x1aa   : > { %v1702_v33 = vadd.f32 %v1670_v45, %v1595_v20  ;;  %7438 = vst [vmem:[#allocation135_spill] sm:$0xff] %v5646_v44  ;;  %v7439_v20 = vld [vmem:[#allocation66_spill] sm:$0xff]  ;;  %v7440_v15 = vld [vmem:[#allocation99_spill] sm:$0xff]  ;;  %v1871_v50 = vmul.f32 %v7442_v62, %v5468_v7  ;;  %v1564_v2 = vmul.f32 %v7413_v17, %v5648_v24  ;;  %v2045_v62 = vmul.f32 %v7411_v25, %v5190_v35 }
 0x1ab   : > { %v1395_v61 = vadd.f32 %v1363_v48, %v1328_v0  ;;  %v1021_v1 = vadd.f32 %v7439_v20, %v954_v46  ;;  %v2143_v14 = vadd.f32 %v2111_v30, %v2076_v57  ;;  %v2245_v53 = vmul.f32 %v7441_v39, %v7440_v15  ;;  %v5659_v22 = vld [vmem:[#allocation2 + $0x1ef] sm:$0xff]  ;;  %v7443_v0 = vld [vmem:[#allocation149_spill] sm:$0xff] }
 0x1ac   : > { %v1769_v45 = vadd.f32 %v1737_v16, %v1702_v33  ;;  %v1190_v48 = vmul.f32 %v5659_v22, %v7443_v0  ;;  %v7444_v4 = vld [vmem:[#allocation102_spill] sm:$0xff]  ;;  %v7445_v57 = vld [vmem:[#allocation9_spill] sm:$0xff] }
 0x1ad   : > { %v1462_v16 = vadd.f32 %v1430_v40, %v1395_v61  ;;  %v1088_v33 = vadd.f32 %v1056_v49, %v1021_v1  ;;  %v2210_v46 = vadd.f32 %v2178_v41, %v2143_v14  ;;  %v2312_v30 = vmul.f32 %v7444_v4, %v5644_v31  ;;  %v7447_v61 = vld [vmem:[#allocation130_spill] sm:$0xff]  ;;  %v7448_v1 = vld [vmem:[#allocation48_spill] sm:$0xff]  ;;  %v7449_v14 = vld [vmem:[#allocation107_spill] sm:$0xff] }
 0x1ae   : > { %v1836_v63 = vadd.f32 %v1804_v58, %v1769_v45  ;;  %v1938_v20 = vmul.f32 %v7445_v57, %v5646_v44  ;;  %v1297_v40 = vmul.f32 %v7378_v12, %v5211_v51  ;;  %v7446_v45 = vld [vmem:[#allocation112_spill] sm:$0xff]  ;;  %v2179_v0 = vmul.f32 %v7449_v14, %v7448_v1 }
 0x1af   : > { %v1529_v17 = vadd.f32 %v1497_v38, %v1462_v16  ;;  %v1155_v58 = vadd.f32 %v1123_v29, %v1088_v33  ;;  %v2277_v49 = vadd.f32 %v2245_v53, %v2210_v46  ;;  %v2112_v41 = vmul.f32 %v7447_v61, %v7446_v45  ;;  %v5706_v46 = vld [vmem:[#allocation2 + $0x1f0] sm:$0xff] }
 0x1b0   : > { %v1903_v39 = vadd.f32 %v1871_v50, %v1836_v63  ;;  %v1671_v57 = vmul.f32 %v4972_v8, %v5209_v60  ;;  %v1364_v63 = vmul.f32 %v7416_v10, %v7422_v19  ;;  %v1738_v51 = vmul.f32 %v7415_v36, %v7426_v42  ;;  %v7450_v8 = vld [vmem:[#allocation87_spill] sm:$0xff]  ;;  %v7451_v60 = vld [vmem:[#allocation62_spill] sm:$0xff]  ;;  %v7452_v36 = vld [vmem:[#allocation24_spill] sm:$0xff] }
 0x1b1   : > { %v1596_v44 = vadd.f32 %v1564_v2, %v1529_v17  ;;  %v1222_v35 = vadd.f32 %v1190_v48, %v1155_v58  ;;  %v2344_v38 = vadd.f32 %v2312_v30, %v2277_v49  ;;  %v1805_v12 = vmul.f32 %v7427_v56, %v5423_v13  ;;  %v5704_v48 = vld [vmem:[#allocation2 + $0x1e9] sm:$0xff]  ;;  %v7459_v49 = vld [vmem:[#allocation155_spill] sm:$0xff] }
 0x1b2   : > { %v1970_v4 = vadd.f32 %v1938_v20, %v1903_v39  ;;  %v1431_v29 = vmul.f32 %v7423_v52, %v5436_v59  ;;  %v955_v39 = vadd.f32 %v7451_v60, %v7450_v8  ;;  %v1498_v10 = vmul.f32 %v7429_v28, %v5610_v32  ;;  %v5698_v52 = vld [vmem:[%s6590_s1 + $0x100] sm:$0xff]  ;;  %v7457_v20 = vld [vmem:[#allocation115_spill] sm:$0xff]  ;;  %v7458_v58 = vld [vmem:[#allocation22_spill] sm:$0xff] }
 0x1b3   : > { %v1703_v50 = vadd.f32 %v1671_v57, %v1596_v44  ;;  %v1329_v16 = vadd.f32 %v1297_v40, %v1222_v35  ;;  %2377 = vst [vmem:[%s4454_s29 + $0xa0] sm:$0xff] %v2344_v38  ;;  %v5689_v2 = vadd.f32 %v5523_v6, %v2344_v38  ;;  %v1057_v33 = vmul.f32 %v7452_v36, %v7419_v43  ;;  %v5702_v44 = vld [vmem:[#allocation2 + $0x1d2] sm:$0xff]  ;;  %v5715_v38 = vld [vmem:[#allocation2 + $0x207] sm:$0xff] }
 0x1b4   : > { %v2077_v53 = vadd.f32 %v2045_v62, %v1970_v4  ;;  %7453 = vst [vmem:[#allocation106_spill] sm:$0xff] %v5698_v52  ;;  %v1124_v56 = vmul.f32 %v5698_v52, %v5598_v11  ;;  %7454 = vst [vmem:[#allocation114_spill] sm:$0xff] %v5702_v44  ;;  %v7455_v4 = vld [vmem:[#allocation68_spill] sm:$0xff]  ;;  %v7456_v57 = vld [vmem:[#allocation119_spill] sm:$0xff]  ;;  %v1872_v40 = vmul.f32 %v7458_v58, %v5529_v34 }
 0x1b5   : > { %v1770_v6 = vadd.f32 %v1738_v51, %v1703_v50  ;;  %v1396_v28 = vadd.f32 %v1364_v63, %v1329_v16  ;;  %v1022_v30 = vadd.f32 %v7455_v4, %v955_v39  ;;  %v2246_v17 = vmul.f32 %v7457_v20, %v7456_v57  ;;  %v7461_v8 = vld [vmem:[#allocation118_spill] sm:$0xff]  ;;  %v7464_v58 = vld [vmem:[#allocation103_spill] sm:$0xff]  ;;  %v5735_v20 = vld [vmem:[%s6590_s1 + $0x20] sm:$0xff] }
 0x1b6   : > { %v2144_v62 = vadd.f32 %v2112_v41, %v2077_v53  ;;  %v1565_v35 = vmul.f32 %v7459_v49, %v5706_v46  ;;  %v5720_v41 = vld [vmem:[%s6590_s1 + $0x150] sm:$0xff]  ;;  %v1939_v49 = vmul.f32 %v7464_v58, %v5704_v48  ;;  %7465 = vst [vmem:[#allocation151_spill] sm:$0xff] %v5735_v20 }
 0x1b7   : > { %7460 = vst [vmem:[#allocation150_spill] sm:$0xff] %v5720_v41  ;;  %v1191_v63 = vmul.f32 %v5720_v41, %v5715_v38  ;;  %v1837_v53 = vadd.f32 %v1805_v12, %v1770_v6  ;;  %v1463_v50 = vadd.f32 %v1431_v29, %v1396_v28  ;;  %v1089_v16 = vadd.f32 %v1057_v33, %v1022_v30  ;;  %v7462_v60 = vld [vmem:[#allocation70_spill] sm:$0xff]  ;;  %v7466_v6 = vld [vmem:[#allocation109_spill] sm:$0xff]  ;;  %v7467_v30 = vld [vmem:[#allocation108_spill] sm:$0xff] }
 0x1b8   : > { %v2211_v51 = vadd.f32 %v2179_v0, %v2144_v62  ;;  %v5726_v39 = vadd.f32 %v7462_v60, %v7461_v8  ;;  %v7463_v36 = vld [vmem:[#allocation110_spill] sm:$0xff]  ;;  %v1298_v0 = vmul.f32 %v5735_v20, %v5293_v9  ;;  %v2046_v28 = vmul.f32 %v7466_v6, %v5237_v21 }
 0x1b9   : > { %v2313_v4 = vmul.f32 %v7463_v36, %v5702_v44  ;;  %v1904_v29 = vadd.f32 %v1872_v40, %v1837_v53  ;;  %v1530_v33 = vadd.f32 %v1498_v10, %v1463_v50  ;;  %v1156_v62 = vadd.f32 %v1124_v56, %v1089_v16  ;;  %v5748_v58 = vld [vmem:[%s6590_s1 + $0x70] sm:$0xff]  ;;  %v7469_v53 = vld [vmem:[#allocation92_spill] sm:$0xff]  ;;  %v7470_v50 = vld [vmem:[#allocation65_spill] sm:$0xff] }
 0x1ba   : > { %v2278_v12 = vadd.f32 %v2246_v17, %v2211_v51  ;;  %v2113_v8 = vmul.f32 %v7467_v30, %v5356_v23  ;;  %v1672_v60 = vmul.f32 %v7432_v27, %v7401_v47  ;;  %7468 = vst [vmem:[#allocation152_spill] sm:$0xff] %v5748_v58  ;;  %v1365_v9 = vmul.f32 %v5748_v58, %v5391_v55  ;;  %v5759_v27 = vld [vmem:[%s6590_s1 + $0xc0] sm:$0xff]  ;;  %v5777_v6 = vld [vmem:[%s6590_s1 + $0x108] sm:$0xff] }
 0x1bb   : > { %v1971_v17 = vadd.f32 %v1939_v49, %v1904_v29  ;;  %v1597_v56 = vadd.f32 %v1565_v35, %v1530_v33  ;;  %v1223_v40 = vadd.f32 %v1191_v63, %v1156_v62  ;;  %v2180_v21 = vmul.f32 %v7360_v3, %v7440_v15  ;;  %v7473_v33 = vld [vmem:[#allocation27_spill] sm:$0xff]  ;;  %7474 = vst [vmem:[#allocation126_spill] sm:$0xff] %v5777_v6  ;;  %v5781_v30 = vld [vmem:[#allocation2 + $0x1ea] sm:$0xff] }
 0x1bc   : > { %v2345_v10 = vadd.f32 %v2313_v4, %v2278_v12  ;;  %v1739_v51 = vmul.f32 %v7434_v18, %v5370_v54  ;;  %v1432_v47 = vmul.f32 %v5759_v27, %v5499_v5  ;;  %v956_v16 = vadd.f32 %v7470_v50, %v7469_v53  ;;  %v7471_v18 = vld [vmem:[#allocation134_spill] sm:$0xff]  ;;  %v7472_v12 = vld [vmem:[#allocation72_spill] sm:$0xff]  ;;  %v7476_v53 = vld [vmem:[#allocation135_spill] sm:$0xff] }
 0x1bd   : > { %v2078_v63 = vadd.f32 %v2046_v28, %v1971_v17  ;;  %v1704_v3 = vadd.f32 %v1672_v60, %v1597_v56  ;;  %v1330_v4 = vadd.f32 %v1298_v0, %v1223_v40  ;;  %v1806_v49 = vmul.f32 %v7471_v18, %v5468_v7  ;;  %v5783_v0 = vld [vmem:[#allocation2 + $0x1f1] sm:$0xff]  ;;  %v7475_v56 = vld [vmem:[#allocation16_spill] sm:$0xff]  ;;  %v7477_v50 = vld [vmem:[#allocation25_spill] sm:$0xff] }
 0x1be   : > { %2378 = vst [vmem:[%s4454_s29 + $0xa8] sm:$0xff] %v2345_v10  ;;  %v5767_v35 = vadd.f32 %v5638_v26, %v2345_v10  ;;  %v1023_v29 = vadd.f32 %v7472_v12, %v956_v16  ;;  %v1058_v62 = vmul.f32 %v5483_v37, %v7473_v33  ;;  %v1125_v26 = vmul.f32 %v5777_v6, %v5659_v22  ;;  %v5788_v17 = vld [vmem:[%s6590_s1 + $0x110] sm:$0xff]  ;;  %v5796_v18 = vld [vmem:[#allocation2 + $0x208] sm:$0xff] }
 0x1bf   : > { %v2145_v28 = vadd.f32 %v2113_v8, %v2078_v63  ;;  %v1771_v60 = vadd.f32 %v1739_v51, %v1704_v3  ;;  %v1397_v10 = vadd.f32 %v1365_v9, %v1330_v4  ;;  %v1499_v37 = vmul.f32 %v5788_v17, %v5648_v24  ;;  %v5798_v63 = vld [vmem:[#allocation2 + $0x20f] sm:$0xff]  ;;  %v5803_v9 = vld [vmem:[%s6590_s1 + $0x158] sm:$0xff] }
 0x1c0   : > { %v2247_v40 = vmul.f32 %v7475_v56, %v5644_v31  ;;  %v1873_v16 = vmul.f32 %v7477_v50, %v7476_v53  ;;  %v1090_v8 = vadd.f32 %v1058_v62, %v1023_v29  ;;  %7478 = vst [vmem:[#allocation153_spill] sm:$0xff] %v5803_v9  ;;  %v1192_v51 = vmul.f32 %v5803_v9, %v5798_v63  ;;  %v5810_v56 = vld [vmem:[%s6590_s1 + $0x160] sm:$0xff]  ;;  %v7480_v62 = vld [vmem:[#allocation102_spill] sm:$0xff] }
 0x1c1   : > { %v2212_v3 = vadd.f32 %v2180_v21, %v2145_v28  ;;  %v1838_v4 = vadd.f32 %v1806_v49, %v1771_v60  ;;  %v1464_v12 = vadd.f32 %v1432_v47, %v1397_v10  ;;  %7479 = vst [vmem:[#allocation131_spill] sm:$0xff] %v5810_v56  ;;  %v1566_v29 = vmul.f32 %v5810_v56, %v5796_v18  ;;  %v7481_v31 = vld [vmem:[#allocation9_spill] sm:$0xff] }
 0x1c2   : > { %v2314_v50 = vmul.f32 %v7480_v62, %v5781_v30  ;;  %v1940_v53 = vmul.f32 %v7481_v31, %v5783_v0  ;;  %v1157_v6 = vadd.f32 %v1125_v26, %v1090_v8  ;;  %v5821_v21 = vld [vmem:[%s6590_s1 + $0x28] sm:$0xff]  ;;  %v2047_v60 = vmul.f32 %v7411_v25, %v7446_v45  ;;  %v5834_v8 = vld [vmem:[%s6590_s1 + $0x78] sm:$0xff]  ;;  %v5841_v45 = vld [vmem:[%s6590_s1 + $0x30] sm:$0xff] }
 0x1c3   : > { %7482 = vst [vmem:[#allocation132_spill] sm:$0xff] %v5821_v21  ;;  %v1299_v47 = vmul.f32 %v5821_v21, %v7422_v19  ;;  %v2279_v49 = vadd.f32 %v2247_v40, %v2212_v3  ;;  %v1905_v28 = vadd.f32 %v1873_v16, %v1838_v4  ;;  %v1531_v10 = vadd.f32 %v1499_v37, %v1464_v12  ;;  %v7486_v3 = vld [vmem:[#allocation96_spill] sm:$0xff]  ;;  %v7487_v4 = vld [vmem:[#allocation74_spill] sm:$0xff] }
 0x1c4   : > { %v2114_v62 = vmul.f32 %v7447_v61, %v7448_v1  ;;  %v2181_v31 = vmul.f32 %v7449_v14, %v7456_v57  ;;  %v1224_v26 = vadd.f32 %v1192_v51, %v1157_v6  ;;  %v1366_v19 = vmul.f32 %v5834_v8, %v5436_v59  ;;  %7483 = vst [vmem:[#allocation52_spill] sm:$0xff] %v5841_v45  ;;  %v5848_v14 = vld [vmem:[%s6590_s1 + $0x80] sm:$0xff] }
 0x1c5   : > { %v2346_v40 = vadd.f32 %v2314_v50, %v2279_v49  ;;  %v1972_v16 = vadd.f32 %v1940_v53, %v1905_v28  ;;  %v1598_v25 = vadd.f32 %v1566_v29, %v1531_v10  ;;  %v1673_v61 = vmul.f32 %v5841_v45, %v7426_v42  ;;  %7484 = vst [vmem:[#allocation26_spill] sm:$0xff] %v5848_v14  ;;  %v5855_v53 = vld [vmem:[%s6590_s1 + $0xc8] sm:$0xff]  ;;  %v5870_v49 = vld [vmem:[%s6590_s1 + $0xd0] sm:$0xff] }
 0x1c6   : > { %v1740_v6 = vmul.f32 %v5848_v14, %v5423_v13  ;;  %v1331_v37 = vadd.f32 %v1299_v47, %v1224_v26  ;;  %7485 = vst [vmem:[#allocation133_spill] sm:$0xff] %v5855_v53  ;;  %v1433_v51 = vmul.f32 %v5855_v53, %v5610_v32  ;;  %v1024_v42 = vadd.f32 %v7487_v4, %v7486_v3  ;;  %v5877_v26 = vld [vmem:[%s6590_s1 + $0x118] sm:$0xff] }
 0x1c7   : > { %2379 = vst [vmem:[%s4454_s29 + $0xb0] sm:$0xff] %v2346_v40  ;;  %v5863_v12 = vadd.f32 %v5689_v2, %v2346_v40  ;;  %v2079_v29 = vadd.f32 %v2047_v60, %v1972_v16  ;;  %v1705_v50 = vadd.f32 %v1673_v61, %v1598_v25  ;;  %v1059_v47 = vmul.f32 %v5598_v11, %v7419_v43  ;;  %v5883_v11 = vld [vmem:[#allocation2 + $0x1f2] sm:$0xff]  ;;  %v5885_v40 = vld [vmem:[#allocation2 + $0x209] sm:$0xff] }
 0x1c8   : > { %7488 = vst [vmem:[#allocation15_spill] sm:$0xff] %v5870_v49  ;;  %v1807_v28 = vmul.f32 %v5870_v49, %v5529_v34  ;;  %v1398_v10 = vadd.f32 %v1366_v19, %v1331_v37  ;;  %7489 = vst [vmem:[#allocation33_spill] sm:$0xff] %v5877_v26  ;;  %v1500_v2 = vmul.f32 %v5877_v26, %v5706_v46  ;;  %v5887_v25 = vld [vmem:[#allocation2 + $0x210] sm:$0xff]  ;;  %v3164_v61 = vld [vmem:[#allocation2 + $0x227] sm:$0xff] }
 0x1c9   : > { %v1126_v43 = vmul.f32 %v5715_v38, %v5698_v52  ;;  %7490 = vst [vmem:[#allocation154_spill] sm:$0xff] %v5883_v11  ;;  %v2146_v60 = vadd.f32 %v2114_v62, %v2079_v29  ;;  %7491 = vst [vmem:[#allocation136_spill] sm:$0xff] %v5885_v40  ;;  %v1772_v16 = vadd.f32 %v1740_v6, %v1705_v50  ;;  %v7493_v3 = vld [vmem:[#allocation115_spill] sm:$0xff]  ;;  %v5895_v49 = vld [vmem:[%s6590_s1 + $0x120] sm:$0xff] }
 0x1ca   : > { %7492 = vst [vmem:[#allocation124_spill] sm:$0xff] %v5887_v25  ;;  %v1091_v19 = vadd.f32 %v1059_v47, %v1024_v42  ;;  %v1193_v37 = vmul.f32 %v3164_v61, %v5720_v41  ;;  %v2248_v4 = vmul.f32 %v7493_v3, %v5702_v44  ;;  %7494 = vst [vmem:[#allocation127_spill] sm:$0xff] %v5895_v49  ;;  %v5902_v6 = vld [vmem:[%s6590_s1 + $0x168] sm:$0xff] }
 0x1cb   : > { %v1874_v38 = vmul.f32 %v5895_v49, %v5704_v48  ;;  %v1465_v62 = vadd.f32 %v1433_v51, %v1398_v10  ;;  %7495 = vst [vmem:[#allocation145_spill] sm:$0xff] %v5902_v6  ;;  %v1567_v42 = vmul.f32 %v5902_v6, %v5887_v25  ;;  %v2213_v29 = vadd.f32 %v2181_v31, %v2146_v60  ;;  %v5913_v51 = vld [vmem:[%s6590_s1 + $0x170] sm:$0xff]  ;;  %v5920_v31 = vld [vmem:[%s6590_s1 + $0x40] sm:$0xff] }
 0x1cc   : > { %v1839_v50 = vadd.f32 %v1807_v28, %v1772_v16  ;;  %v1158_v47 = vadd.f32 %v1126_v43, %v1091_v19  ;;  %v1300_v61 = vmul.f32 %v5735_v20, %v5391_v55  ;;  %v2315_v3 = vmul.f32 %v7463_v36, %v5883_v11  ;;  %v5929_v19 = vld [vmem:[%s6590_s1 + $0x90] sm:$0xff] }
 0x1cd   : > { %v1941_v10 = vmul.f32 %v5913_v51, %v5885_v40  ;;  %v2048_v28 = vmul.f32 %v5920_v31, %v5356_v23  ;;  %v1532_v55 = vadd.f32 %v1500_v2, %v1465_v62  ;;  %v2280_v43 = vadd.f32 %v2248_v4, %v2213_v29  ;;  %7496 = vst [vmem:[#allocation125_spill] sm:$0xff] %v5929_v19  ;;  %v5936_v23 = vld [vmem:[%s6590_s1 + $0x38] sm:$0xff] }
 0x1ce   : > { %v1906_v60 = vadd.f32 %v1874_v38, %v1839_v50  ;;  %v1225_v36 = vadd.f32 %v1193_v37, %v1158_v47  ;;  %v1367_v16 = vmul.f32 %v5748_v58, %v5499_v5  ;;  %v2115_v52 = vmul.f32 %v5929_v19, %v7440_v15  ;;  %v5943_v37 = vld [vmem:[%s6590_s1 + $0x88] sm:$0xff] }
 0x1cf   : > { %v1599_v20 = vadd.f32 %v1567_v42, %v1532_v55  ;;  %v1674_v2 = vmul.f32 %v5936_v23, %v5370_v54  ;;  %v1741_v4 = vmul.f32 %v5943_v37, %v5468_v7  ;;  %v2347_v38 = vadd.f32 %v2315_v3, %v2280_v43  ;;  %v7497_v54 = vld [vmem:[#allocation77_spill] sm:$0xff]  ;;  %v5955_v58 = vld [vmem:[#allocation2 + $0x22f] sm:$0xff] }
 0x1d0   : > { %v1973_v62 = vadd.f32 %v1941_v10, %v1906_v60  ;;  %v1332_v29 = vadd.f32 %v1300_v61, %v1225_v36  ;;  %v1434_v42 = vmul.f32 %v5759_v27, %v5648_v24  ;;  %v1501_v47 = vmul.f32 %v5788_v17, %v5796_v18  ;;  %7498 = vst [vmem:[#allocation129_spill] sm:$0xff] %v5955_v58  ;;  %v7499_v43 = vld [vmem:[#allocation126_spill] sm:$0xff]  ;;  %v5966_v36 = vld [vmem:[%s6590_s1 + $0xd8] sm:$0xff] }
 0x1d1   : > { %v1706_v50 = vadd.f32 %v1674_v2, %v1599_v20  ;;  %v1025_v55 = vadd.f32 %v7497_v54, %v5726_v39  ;;  %v1060_v19 = vmul.f32 %v5659_v22, %v7473_v33  ;;  %2380 = vst [vmem:[%s4454_s29 + $0xb8] sm:$0xff] %v2347_v38  ;;  %v5959_v3 = vadd.f32 %v5767_v35, %v2347_v38  ;;  %v7500_v39 = vld [vmem:[#allocation135_spill] sm:$0xff]  ;;  %v5970_v33 = vld [vmem:[#allocation2 + $0x228] sm:$0xff] }
 0x1d2   : > { %v2080_v61 = vadd.f32 %v2048_v28, %v1973_v62  ;;  %v1399_v10 = vadd.f32 %v1367_v16, %v1332_v29  ;;  %v1127_v20 = vmul.f32 %v5798_v63, %v7499_v43  ;;  %v1808_v22 = vmul.f32 %v5966_v36, %v7500_v39  ;;  %v5977_v63 = vld [vmem:[%s6590_s1 + $0xe0] sm:$0xff]  ;;  %v7502_v16 = vld [vmem:[#allocation30_spill] sm:$0xff] }
 0x1d3   : > { %v1773_v60 = vadd.f32 %v1741_v4, %v1706_v50  ;;  %v1092_v2 = vadd.f32 %v1060_v19, %v1025_v55  ;;  %v1194_v35 = vmul.f32 %v5803_v9, %v5955_v58  ;;  %7501 = vst [vmem:[#allocation146_spill] sm:$0xff] %v5977_v63  ;;  %v2182_v4 = vmul.f32 %v5977_v63, %v7502_v16  ;;  %v5981_v38 = vld [vmem:[#allocation2 + $0x211] sm:$0xff] }
 0x1d4   : > { %v2147_v28 = vadd.f32 %v2115_v52, %v2080_v61  ;;  %v1466_v62 = vadd.f32 %v1434_v42, %v1399_v10  ;;  %v1568_v29 = vmul.f32 %v5810_v56, %v5970_v33  ;;  %v5985_v50 = vld [vmem:[#allocation2 + $0x20a] sm:$0xff]  ;;  %v1301_v61 = vmul.f32 %v5821_v21, %v5436_v59 }
 0x1d5   : > { %v1840_v19 = vadd.f32 %v1808_v22, %v1773_v60  ;;  %v5990_v52 = vld [vmem:[%s6590_s1 + $0x128] sm:$0xff]  ;;  %v1159_v55 = vadd.f32 %v1127_v20, %v1092_v2  ;;  %v5998_v42 = vmul.f32 %v7499_v43, %v5955_v58  ;;  %v6003_v60 = vld [vmem:[%s6590_s1 + $0x130] sm:$0xff]  ;;  %v6010_v20 = vld [vmem:[%s6590_s1 + $0x178] sm:$0xff] }
 0x1d6   : > { %7503 = vst [vmem:[#allocation144_spill] sm:$0xff] %v5990_v52  ;;  %v1875_v54 = vmul.f32 %v5990_v52, %v5783_v0  ;;  %v2214_v10 = vadd.f32 %v2182_v4, %v2147_v28  ;;  %7504 = vst [vmem:[#allocation55_spill] sm:$0xff] %v6003_v60  ;;  %v2249_v22 = vmul.f32 %v6003_v60, %v5781_v30  ;;  %v6019_v43 = vld [vmem:[%s6590_s1 + $0x180] sm:$0xff] }
 0x1d7   : > { %v1533_v56 = vadd.f32 %v1501_v47, %v1466_v62  ;;  %v1942_v59 = vmul.f32 %v6010_v20, %v5981_v38  ;;  %v1226_v2 = vadd.f32 %v1194_v35, %v1159_v55  ;;  %v1368_v28 = vmul.f32 %v5834_v8, %v5610_v32  ;;  %7505 = vst [vmem:[#allocation29_spill] sm:$0xff] %v6019_v43  ;;  %v6028_v35 = vld [vmem:[%s6590_s1 + $0x48] sm:$0xff] }
 0x1d8   : > { %v1907_v9 = vadd.f32 %v1875_v54, %v1840_v19  ;;  %v2281_v4 = vadd.f32 %v2249_v22, %v2214_v10  ;;  %v2316_v47 = vmul.f32 %v6019_v43, %v5985_v50  ;;  %v1675_v19 = vmul.f32 %v5841_v45, %v5423_v13  ;;  %7506 = vst [vmem:[#allocation141_spill] sm:$0xff] %v6028_v35 }
 0x1d9   : > { %v1600_v62 = vadd.f32 %v1568_v29, %v1533_v56  ;;  %v2049_v55 = vmul.f32 %v6028_v35, %v7448_v1  ;;  %v1333_v10 = vadd.f32 %v1301_v61, %v1226_v2  ;;  %v1435_v22 = vmul.f32 %v5855_v53, %v5706_v46  ;;  %v6037_v56 = vld [vmem:[%s6590_s1 + $0x98] sm:$0xff]  ;;  %v7509_v2 = vld [vmem:[#allocation73_spill] sm:$0xff] }
 0x1da   : > { %v1974_v54 = vadd.f32 %v1942_v59, %v1907_v9  ;;  %v2348_v58 = vadd.f32 %v2316_v47, %v2281_v4  ;;  %7507 = vst [vmem:[#allocation37_spill] sm:$0xff] %v6037_v56  ;;  %v2116_v13 = vmul.f32 %v6037_v56, %v7456_v57  ;;  %v1742_v29 = vmul.f32 %v5848_v14, %v5529_v34  ;;  %v7508_v61 = vld [vmem:[#allocation95_spill] sm:$0xff]  ;;  %v6054_v53 = vld [vmem:[%s6590_s1 + $0xe8] sm:$0xff] }
 0x1db   : > { %v1707_v9 = vadd.f32 %v1675_v19, %v1600_v62  ;;  %v1400_v45 = vadd.f32 %v1368_v28, %v1333_v10  ;;  %v1502_v1 = vmul.f32 %v5877_v26, %v5887_v25  ;;  %v959_v4 = vadd.f32 %v7509_v2, %v7508_v61  ;;  %7511 = vst [vmem:[#allocation142_spill] sm:$0xff] %v6054_v53  ;;  %v7512_v28 = vld [vmem:[#allocation15_spill] sm:$0xff]  ;;  %v6064_v2 = vld [vmem:[#allocation2 + $0x229] sm:$0xff]  ;;  %v7515_v26 = vld [vmem:[#allocation80_spill] sm:$0xff] }
 0x1dc   : > { %v2081_v59 = vadd.f32 %v2049_v55, %v1974_v54  ;;  %2381 = vst [vmem:[%s4454_s29 + $0xc0] sm:$0xff] %v2348_v58  ;;  %v6049_v47 = vadd.f32 %v5863_v12, %v2348_v58  ;;  %v2183_v62 = vmul.f32 %v6054_v53, %v5702_v44  ;;  %v1809_v54 = vmul.f32 %v7512_v28, %v5704_v48  ;;  %v6060_v55 = vld [vmem:[#allocation2 + $0x230] sm:$0xff]  ;;  %v7517_v25 = vld [vmem:[#allocation101_spill] sm:$0xff] }
 0x1dd   : > { %v1774_v19 = vadd.f32 %v1742_v29, %v1707_v9  ;;  %7513 = vst [vmem:[#allocation143_spill] sm:$0xff] %v6060_v55  ;;  %v6062_v10 = vld [vmem:[#allocation2 + $0x212] sm:$0xff]  ;;  %v1467_v58 = vadd.f32 %v1435_v22, %v1400_v45  ;;  %v1569_v12 = vmul.f32 %v5902_v6, %v6060_v55  ;;  %v1026_v14 = vadd.f32 %v7515_v26, %v959_v4  ;;  %v6080_v22 = vld [vmem:[#allocation2 + $0x247] sm:$0xff] }
 0x1de   : > { %7510 = vst [vmem:[#allocation28_spill] sm:$0xff] %v6049_v47  ;;  %7514 = vst [vmem:[#allocation58_spill] sm:$0xff] %v6062_v10  ;;  %v2148_v61 = vadd.f32 %v2116_v13, %v2081_v59  ;;  %v7516_v47 = vld [vmem:[#allocation105_spill] sm:$0xff]  ;;  %v6074_v9 = vld [vmem:[%s6590_s1 + $0x138] sm:$0xff]  ;;  %v1876_v45 = vmul.f32 %v5895_v49, %v5885_v40  ;;  %v1943_v49 = vmul.f32 %v5913_v51, %v6064_v2 }
 0x1df   : > { %v853_v34 = vadd.f32 %v7517_v25, %v7516_v47  ;;  %7518 = vst [vmem:[#allocation32_spill] sm:$0xff] %v6074_v9  ;;  %v2250_v29 = vmul.f32 %v6074_v9, %v5883_v11  ;;  %v1841_v13 = vadd.f32 %v1809_v54, %v1774_v19  ;;  %v1534_v6 = vadd.f32 %v1502_v1, %v1467_v58  ;;  %v7519_v26 = vld [vmem:[#allocation86_spill] sm:$0xff]  ;;  %v7523_v40 = vld [vmem:[#allocation12_spill] sm:$0xff] }
 0x1e0   : > { %v2215_v59 = vadd.f32 %v2183_v62, %v2148_v61  ;;  %v1093_v4 = vadd.f32 %v7519_v26, %v1026_v14  ;;  %v1195_v25 = vmul.f32 %v5720_v41, %v6080_v22  ;;  %v6088_v47 = vld [vmem:[%s6590_s1 + $0x188] sm:$0xff]  ;;  %v1676_v1 = vmul.f32 %v5936_v23, %v5468_v7  ;;  %v7522_v26 = vld [vmem:[#allocation151_spill] sm:$0xff] }
 0x1e1   : > { %7520 = vst [vmem:[#allocation39_spill] sm:$0xff] %v6088_v47  ;;  %v2317_v19 = vmul.f32 %v6088_v47, %v6062_v10  ;;  %v1908_v54 = vadd.f32 %v1876_v45, %v1841_v13  ;;  %v1601_v14 = vadd.f32 %v1569_v12, %v1534_v6  ;;  %v7521_v61 = vld [vmem:[#allocation94_spill] sm:$0xff]  ;;  %v1302_v28 = vmul.f32 %v7522_v26, %v5499_v5  ;;  %v7524_v41 = vld [vmem:[#allocation113_spill] sm:$0xff]  ;;  %v7525_v6 = vld [vmem:[#allocation152_spill] sm:$0xff] }
 0x1e2   : > { %v2282_v62 = vadd.f32 %v2250_v29, %v2215_v59  ;;  %v1160_v58 = vadd.f32 %v7521_v61, %v1093_v4  ;;  %v6101_v55 = vadd.f32 %v7524_v41, %v7523_v40  ;;  %v2050_v13 = vmul.f32 %v5920_v31, %v7440_v15  ;;  %v7526_v5 = vld [vmem:[#allocation125_spill] sm:$0xff] }
 0x1e3   : > { %v1975_v47 = vadd.f32 %v1943_v49, %v1908_v54  ;;  %v1743_v45 = vmul.f32 %v5943_v37, %v7500_v39  ;;  %v1708_v29 = vadd.f32 %v1676_v1, %v1601_v14  ;;  %v1369_v12 = vmul.f32 %v7525_v6, %v5648_v24  ;;  %v7527_v49 = vld [vmem:[#allocation76_spill] sm:$0xff]  ;;  %v6118_v54 = vld [vmem:[#allocation2 + $0x22a] sm:$0xff] }
 0x1e4   : > { %v2349_v7 = vadd.f32 %v2317_v19, %v2282_v62  ;;  %v1227_v59 = vadd.f32 %v1195_v25, %v1160_v58  ;;  %v2117_v61 = vmul.f32 %v7526_v5, %v7502_v16  ;;  %v1810_v41 = vmul.f32 %v5966_v36, %v5783_v0  ;;  %7528 = vst [vmem:[#allocation60_spill] sm:$0xff] %v6118_v54  ;;  %v6126_v58 = vld [vmem:[#allocation2 + $0x231] sm:$0xff] }
 0x1e5   : > { %v2082_v4 = vadd.f32 %v2050_v13, %v1975_v47  ;;  %v960_v40 = vadd.f32 %v7527_v49, %v853_v34  ;;  %v1775_v19 = vadd.f32 %v1743_v45, %v1708_v29  ;;  %v1436_v1 = vmul.f32 %v5759_v27, %v5796_v18  ;;  %v7529_v34 = vld [vmem:[#allocation84_spill] sm:$0xff]  ;;  %v6133_v29 = vld [vmem:[#allocation2 + $0x24f] sm:$0xff] }
 0x1e6   : > { %2382 = vst [vmem:[%s4454_s29 + $0xc8] sm:$0xff] %v2349_v7  ;;  %v6116_v15 = vadd.f32 %v5959_v3, %v2349_v7  ;;  %v1334_v25 = vadd.f32 %v1302_v28, %v1227_v59  ;;  %v2184_v62 = vmul.f32 %v5977_v63, %v5781_v30  ;;  %v2251_v14 = vmul.f32 %v6003_v60, %v5985_v50  ;;  %v7530_v49 = vld [vmem:[#allocation90_spill] sm:$0xff] }
 0x1e7   : > { %v2149_v47 = vadd.f32 %v2117_v61, %v2082_v4  ;;  %v1027_v13 = vadd.f32 %v7529_v34, %v960_v40  ;;  %v1842_v3 = vadd.f32 %v1810_v41, %v1775_v19  ;;  %v1877_v7 = vmul.f32 %v5990_v52, %v5981_v38  ;;  %v6137_v61 = vld [vmem:[#allocation2 + $0x248] sm:$0xff]  ;;  %v7532_v34 = vld [vmem:[#allocation131_spill] sm:$0xff] }
 0x1e8   : > { %v1401_v45 = vadd.f32 %v1369_v12, %v1334_v25  ;;  %v1503_v28 = vmul.f32 %v5788_v17, %v5970_v33  ;;  %v2318_v4 = vmul.f32 %v6019_v43, %v6118_v54  ;;  %v7531_v40 = vld [vmem:[#allocation153_spill] sm:$0xff]  ;;  %v1944_v12 = vmul.f32 %v6010_v20, %v6126_v58 }
 0x1e9   : > { %v2216_v59 = vadd.f32 %v2184_v62, %v2149_v47  ;;  %v1094_v60 = vadd.f32 %v7530_v49, %v1027_v13  ;;  %v1196_v41 = vmul.f32 %v7531_v40, %v6133_v29  ;;  %v1909_v19 = vadd.f32 %v1877_v7, %v1842_v3  ;;  %v7535_v54 = vld [vmem:[#allocation137_spill] sm:$0xff] }
 0x1ea   : > { %v1468_v25 = vadd.f32 %v1436_v1, %v1401_v45  ;;  %v1570_v52 = vmul.f32 %v7532_v34, %v6137_v61  ;;  %v2051_v47 = vmul.f32 %v6028_v35, %v7456_v57  ;;  %v1303_v13 = vmul.f32 %v5821_v21, %v5610_v32  ;;  %v7533_v57 = vld [vmem:[#allocation104_spill] sm:$0xff]  ;;  %v7538_v21 = vld [vmem:[#allocation133_spill] sm:$0xff] }
 0x1eb   : > { %v2283_v63 = vadd.f32 %v2251_v14, %v2216_v59  ;;  %v1161_v62 = vadd.f32 %v5998_v42, %v1094_v60  ;;  %v1976_v49 = vadd.f32 %v1944_v12, %v1909_v19  ;;  %v2118_v3 = vmul.f32 %v6037_v56, %v5702_v44  ;;  %v7534_v59 = vld [vmem:[#allocation79_spill] sm:$0xff]  ;;  %v7536_v32 = vld [vmem:[#allocation52_spill] sm:$0xff]  ;;  %v894_v44 = vld [vmem:[#allocation2 + $0x267] sm:$0xff] }
 0x1ec   : > { %v2185_v1 = vmul.f32 %v6054_v53, %v5883_v11  ;;  %v1535_v7 = vadd.f32 %v1503_v28, %v1468_v25  ;;  %v1370_v14 = vmul.f32 %v5834_v8, %v5706_v46  ;;  %v961_v35 = vadd.f32 %v7534_v59, %v7533_v57  ;;  %v7537_v12 = vld [vmem:[#allocation124_spill] sm:$0xff]  ;;  %v7545_v11 = vld [vmem:[#allocation143_spill] sm:$0xff] }
 0x1ed   : > { %v2350_v45 = vadd.f32 %v2318_v4, %v2283_v63  ;;  %v1228_v43 = vadd.f32 %v1196_v41, %v1161_v62  ;;  %v2083_v42 = vadd.f32 %v2051_v47, %v1976_v49  ;;  %v1677_v19 = vmul.f32 %v7536_v32, %v7535_v54  ;;  %v7539_v53 = vld [vmem:[#allocation28_spill] sm:$0xff]  ;;  %v6167_v63 = vld [vmem:[#allocation2 + $0x232] sm:$0xff]  ;;  %v7542_v41 = vld [vmem:[#allocation85_spill] sm:$0xff] }
 0x1ee   : > { %v1602_v60 = vadd.f32 %v1570_v52, %v1535_v7  ;;  %v1437_v56 = vmul.f32 %v7538_v21, %v7537_v12  ;;  %7541 = vst [vmem:[#allocation42_spill] sm:$0xff] %v6167_v63  ;;  %v1028_v25 = vadd.f32 %v7542_v41, %v961_v35  ;;  %v7543_v62 = vld [vmem:[#allocation106_spill] sm:$0xff]  ;;  %v2252_v54 = vmul.f32 %v6074_v9, %v6062_v10  ;;  %v7549_v41 = vld [vmem:[#allocation39_spill] sm:$0xff] }
 0x1ef   : > { %2383 = vst [vmem:[%s4454_s29 + $0xd0] sm:$0xff] %v2350_v45  ;;  %v6165_v28 = vadd.f32 %v7539_v53, %v2350_v45  ;;  %v1335_v4 = vadd.f32 %v1303_v13, %v1228_v43  ;;  %v1130_v47 = vmul.f32 %v7543_v62, %v6080_v22  ;;  %v2150_v52 = vadd.f32 %v2118_v3, %v2083_v42  ;;  %v7544_v7 = vld [vmem:[#allocation26_spill] sm:$0xff]  ;;  %v7546_v53 = vld [vmem:[#allocation33_spill] sm:$0xff]  ;;  %v7550_v42 = vld [vmem:[#allocation136_spill] sm:$0xff] }
 0x1f0   : > { %v1709_v49 = vadd.f32 %v1677_v19, %v1602_v60  ;;  %v1744_v57 = vmul.f32 %v7544_v7, %v5704_v48  ;;  %v1504_v45 = vmul.f32 %v7546_v53, %v7545_v11  ;;  %v7548_v43 = vld [vmem:[#allocation150_spill] sm:$0xff]  ;;  %v2319_v22 = vmul.f32 %v7549_v41, %v6167_v63  ;;  %v7551_v62 = vld [vmem:[#allocation15_spill] sm:$0xff] }
 0x1f1   : > { %7540 = vst [vmem:[#allocation35_spill] sm:$0xff] %v6165_v28  ;;  %v1402_v59 = vadd.f32 %v1370_v14, %v1335_v4  ;;  %v7547_v28 = vld [vmem:[#allocation93_spill] sm:$0xff]  ;;  %v1197_v13 = vmul.f32 %v7548_v43, %v894_v44  ;;  %v2217_v35 = vadd.f32 %v2185_v1, %v2150_v52  ;;  %v1811_v9 = vmul.f32 %v7551_v62, %v7550_v42  ;;  %v6184_v60 = vld [vmem:[#allocation2 + $0x250] sm:$0xff] }
 0x1f2   : > { %v1095_v21 = vadd.f32 %v7547_v28, %v1028_v25  ;;  %v1776_v3 = vadd.f32 %v1744_v57, %v1709_v49  ;;  %v6186_v19 = vld [vmem:[#allocation2 + $0x249] sm:$0xff]  ;;  %v1304_v44 = vmul.f32 %v7522_v26, %v5648_v24  ;;  %v7553_v25 = vld [vmem:[#allocation127_spill] sm:$0xff]  ;;  %v1371_v24 = vmul.f32 %v7525_v6, %v5796_v18 }
 0x1f3   : > { %v1469_v14 = vadd.f32 %v1437_v56, %v1402_v59  ;;  %v7552_v4 = vld [vmem:[#allocation145_spill] sm:$0xff]  ;;  %v2284_v1 = vadd.f32 %v2252_v54, %v2217_v35  ;;  %v1878_v52 = vmul.f32 %v7553_v25, %v6064_v2  ;;  %v1945_v49 = vmul.f32 %v5913_v51, %v6186_v19  ;;  %v3183_v56 = vld [vmem:[%s6590_s1 + $0xb8] sm:$0xff] }
 0x1f4   : > { %v1571_v10 = vmul.f32 %v7552_v4, %v6184_v60  ;;  %v1162_v53 = vadd.f32 %v1130_v47, %v1095_v21  ;;  %v1843_v28 = vadd.f32 %v1811_v9, %v1776_v3  ;;  %v7554_v57 = vld [vmem:[#allocation129_spill] sm:$0xff]  ;;  %v2052_v47 = vmul.f32 %v5920_v31, %v7502_v16 }
 0x1f5   : > { %v1064_v59 = vmul.f32 %v3183_v56, %v7554_v57  ;;  %v1536_v43 = vadd.f32 %v1504_v45, %v1469_v14  ;;  %v2351_v26 = vadd.f32 %v2319_v22, %v2284_v1  ;;  %v1678_v54 = vmul.f32 %v5936_v23, %v7500_v39  ;;  %v1269_v3 = vld [vmem:[#allocation2 + $0x268] sm:$0xff]  ;;  %v7556_v14 = vld [vmem:[#allocation88_spill] sm:$0xff] }
 0x1f6   : > { %v1229_v21 = vadd.f32 %v1197_v13, %v1162_v53  ;;  %v1910_v9 = vadd.f32 %v1878_v52, %v1843_v28  ;;  %v1438_v63 = vmul.f32 %v5759_v27, %v5970_v33  ;;  %v7555_v45 = vld [vmem:[#allocation82_spill] sm:$0xff]  ;;  %v1745_v16 = vmul.f32 %v5943_v37, %v5783_v0 }
 0x1f7   : > { %v1603_v35 = vadd.f32 %v1571_v10, %v1536_v43  ;;  %v962_v53 = vadd.f32 %v7555_v45, %v6101_v55  ;;  %2384 = vst [vmem:[%s4454_s29 + $0xd8] sm:$0xff] %v2351_v26  ;;  %v6212_v18 = vadd.f32 %v6116_v15, %v2351_v26  ;;  %v1505_v39 = vmul.f32 %v5788_v17, %v6137_v61  ;;  %v895_v10 = vld [vmem:[#allocation2 + $0x26f] sm:$0xff]  ;;  %v7559_v43 = vld [vmem:[#allocation144_spill] sm:$0xff]  ;;  %v7563_v45 = vld [vmem:[#allocation29_spill] sm:$0xff] }
 0x1f8   : > { %v1336_v41 = vadd.f32 %v1304_v44, %v1229_v21  ;;  %v1977_v6 = vadd.f32 %v1945_v49, %v1910_v9  ;;  %v7557_v27 = vld [vmem:[#allocation126_spill] sm:$0xff]  ;;  %v2119_v15 = vmul.f32 %v7526_v5, %v5781_v30  ;;  %v1812_v1 = vmul.f32 %v5966_v36, %v5981_v38 }
 0x1f9   : > { %v1710_v13 = vadd.f32 %v1678_v54, %v1603_v35  ;;  %v1029_v44 = vadd.f32 %v7556_v14, %v962_v53  ;;  %v1131_v33 = vmul.f32 %v7557_v27, %v6133_v29  ;;  %v1572_v28 = vmul.f32 %v7532_v34, %v1269_v3  ;;  %v6226_v52 = vld [vmem:[#allocation2 + $0x251] sm:$0xff]  ;;  %v7560_v54 = vld [vmem:[#allocation132_spill] sm:$0xff] }
 0x1fa   : > { %v1403_v22 = vadd.f32 %v1371_v24, %v1336_v41  ;;  %v2084_v55 = vadd.f32 %v2052_v47, %v1977_v6  ;;  %v1198_v41 = vmul.f32 %v7531_v40, %v895_v10  ;;  %v7558_v57 = vld [vmem:[#allocation146_spill] sm:$0xff]  ;;  %v1879_v21 = vmul.f32 %v7559_v43, %v6126_v58  ;;  %v7561_v35 = vld [vmem:[#allocation60_spill] sm:$0xff]  ;;  %v7562_v40 = vld [vmem:[#allocation55_spill] sm:$0xff] }
 0x1fb   : > { %v1777_v17 = vadd.f32 %v1745_v16, %v1710_v13  ;;  %v1096_v49 = vadd.f32 %v1064_v59, %v1029_v44  ;;  %v2186_v29 = vmul.f32 %v7558_v57, %v5985_v50  ;;  %v1946_v24 = vmul.f32 %v6010_v20, %v6226_v52  ;;  %v2017_v26 = vld [vmem:[#allocation2 + $0x24a] sm:$0xff]  ;;  %v7565_v44 = vld [vmem:[#allocation141_spill] sm:$0xff] }
 0x1fc   : > { %v1470_v61 = vadd.f32 %v1438_v63, %v1403_v22  ;;  %v2151_v56 = vadd.f32 %v2119_v15, %v2084_v55  ;;  %v1305_v63 = vmul.f32 %v7560_v54, %v5706_v46  ;;  %v2253_v3 = vmul.f32 %v7562_v40, %v7561_v35  ;;  %v7564_v14 = vld [vmem:[#allocation114_spill] sm:$0xff] }
 0x1fd   : > { %v1844_v9 = vadd.f32 %v1812_v1, %v1777_v17  ;;  %v1163_v47 = vadd.f32 %v1131_v33, %v1096_v49  ;;  %v2320_v53 = vmul.f32 %v7563_v45, %v2017_v26  ;;  %v1679_v6 = vmul.f32 %v7536_v32, %v5704_v48  ;;  %v1644_v55 = vld [vmem:[#allocation2 + $0x269] sm:$0xff] }
 0x1fe   : > { %v1537_v34 = vadd.f32 %v1505_v39, %v1470_v61  ;;  %v2218_v59 = vadd.f32 %v2186_v29, %v2151_v56  ;;  %v1372_v22 = vmul.f32 %v5834_v8, %v7537_v12  ;;  %v2053_v27 = vmul.f32 %v7565_v44, %v7564_v14  ;;  %v7566_v48 = vld [vmem:[#allocation133_spill] sm:$0xff]  ;;  %v7567_v17 = vld [vmem:[#allocation154_spill] sm:$0xff] }
 0x1ff   : > { %v1911_v16 = vadd.f32 %v1879_v21, %v1844_v9  ;;  %v1230_v13 = vadd.f32 %v1198_v41, %v1163_v47  ;;  %v1746_v46 = vmul.f32 %v7544_v7, %v7550_v42  ;;  %v1439_v32 = vmul.f32 %v7566_v48, %v7545_v11  ;;  %v7568_v61 = vld [vmem:[#allocation37_spill] sm:$0xff]  ;;  %v1270_v41 = vld [vmem:[#allocation2 + $0x270] sm:$0xff] }
 0x200   : > { %v1604_v10 = vadd.f32 %v1572_v28, %v1537_v34  ;;  %v2285_v39 = vadd.f32 %v2253_v3, %v2218_v59  ;;  %v2120_v49 = vmul.f32 %v7568_v61, %v7567_v17  ;;  %v1813_v8 = vmul.f32 %v7551_v62, %v6064_v2  ;;  %v7569_v29 = vld [vmem:[#allocation33_spill] sm:$0xff]  ;;  %v7571_v9 = vld [vmem:[#allocation58_spill] sm:$0xff]  ;;  %v7574_v3 = vld [vmem:[#allocation32_spill] sm:$0xff] }
 0x201   : > { %v1978_v33 = vadd.f32 %v1946_v24, %v1911_v16  ;;  %v1337_v1 = vadd.f32 %v1305_v63, %v1230_v13  ;;  %v1880_v12 = vmul.f32 %v7553_v25, %v6186_v19  ;;  %v1506_v21 = vmul.f32 %v7569_v29, %v6184_v60  ;;  %v7570_v24 = vld [vmem:[#allocation35_spill] sm:$0xff]  ;;  %v7572_v34 = vld [vmem:[#allocation142_spill] sm:$0xff] }
 0x202   : > { %v1711_v15 = vadd.f32 %v1679_v6, %v1604_v10  ;;  %v2352_v28 = vadd.f32 %v2320_v53, %v2285_v39  ;;  %v2187_v47 = vmul.f32 %v7572_v34, %v7571_v9  ;;  %v1947_v54 = vmul.f32 %v5913_v51, %v1644_v55  ;;  %v2018_v25 = vld [vmem:[#allocation2 + $0x252] sm:$0xff]  ;;  %v7573_v59 = vld [vmem:[#allocation42_spill] sm:$0xff] }
 0x203   : > { %v2085_v56 = vadd.f32 %v2053_v27, %v1978_v33  ;;  %v1404_v42 = vadd.f32 %v1372_v22, %v1337_v1  ;;  %v1573_v19 = vmul.f32 %v7552_v4, %v1270_v41  ;;  %v2254_v53 = vmul.f32 %v7574_v3, %v7573_v59  ;;  %v7575_v16 = vld [vmem:[#allocation39_spill] sm:$0xff]  ;;  %v2019_v1 = vld [vmem:[#allocation2 + $0x26a] sm:$0xff] }
 0x204   : > { %v1778_v7 = vadd.f32 %v1746_v46, %v1711_v15  ;;  %2385 = vst [vmem:[%s4454_s29 + $0xe0] sm:$0xff] %v2352_v28  ;;  %v2403_v11 = vadd.f32 %v7570_v24, %v2352_v28  ;;  %v2321_v60 = vmul.f32 %v7575_v16, %v2018_v25  ;;  %v2054_v22 = vmul.f32 %v5920_v31, %v5781_v30  ;;  %v1645_v31 = vld [vmem:[#allocation2 + $0x271] sm:$0xff] }
 0x205   : > { %v2152_v63 = vadd.f32 %v2120_v49, %v2085_v56  ;;  %v1471_v62 = vadd.f32 %v1439_v32, %v1404_v42  ;;  %v1680_v27 = vmul.f32 %v5936_v23, %v5783_v0  ;;  %v2121_v4 = vmul.f32 %v7526_v5, %v5985_v50 }
 0x206   : > { %v1845_v2 = vadd.f32 %v1813_v8, %v1778_v7  ;;  %v1747_v15 = vmul.f32 %v5943_v37, %v5981_v38  ;;  %v2188_v48 = vmul.f32 %v7558_v57, %v7561_v35  ;;  %v2255_v30 = vmul.f32 %v7562_v40, %v2017_v26 }
 0x207   : > { %v2219_v6 = vadd.f32 %v2187_v47, %v2152_v63  ;;  %v1538_v13 = vadd.f32 %v1506_v21, %v1471_v62  ;;  %v1814_v0 = vmul.f32 %v5966_v36, %v6126_v58  ;;  %v1881_v32 = vmul.f32 %v7559_v43, %v6226_v52  ;;  %v2020_v43 = vld [vmem:[#allocation2 + $0x272] sm:$0xff] }
 0x208   : > { %v1912_v10 = vadd.f32 %v1880_v12, %v1845_v2  ;;  %v2322_v38 = vmul.f32 %v7563_v45, %v2019_v1  ;;  %v1948_v57 = vmul.f32 %v6010_v20, %v1645_v31  ;;  %v2055_v36 = vmul.f32 %v7565_v44, %v7567_v17 }
 0x209   : > { %v2286_v39 = vadd.f32 %v2254_v53, %v2219_v6  ;;  %v1605_v14 = vadd.f32 %v1573_v19, %v1538_v13  ;;  %v2122_v52 = vmul.f32 %v7568_v61, %v7571_v9  ;;  %v2189_v45 = vmul.f32 %v7572_v34, %v7573_v59 }
 0x20a   : > { %v1979_v51 = vadd.f32 %v1947_v54, %v1912_v10  ;;  %v2256_v20 = vmul.f32 %v7574_v3, %v2018_v25  ;;  %v2323_v41 = vmul.f32 %v7575_v16, %v2020_v43 }
 0x20b   : > { %v2353_v46 = vadd.f32 %v2321_v60, %v2286_v39  ;;  %v1712_v55 = vadd.f32 %v1680_v27, %v1605_v14 }
 0x20c   : > { %v2086_v33 = vadd.f32 %v2054_v22, %v1979_v51 }
 0x20d   : > { %2386 = vst [vmem:[%s4454_s29 + $0xe8] sm:$0xff] %v2353_v46  ;;  %v2418_v23 = vadd.f32 %v6212_v18, %v2353_v46  ;;  %v1779_v5 = vadd.f32 %v1747_v15, %v1712_v55 }
 0x20e   : > { %v2153_v50 = vadd.f32 %v2121_v4, %v2086_v33 }
 0x20f   : > { %v1846_v28 = vadd.f32 %v1814_v0, %v1779_v5 }
 0x210   : > { %v2220_v37 = vadd.f32 %v2188_v48, %v2153_v50 }
 0x211   : > { %v1913_v35 = vadd.f32 %v1881_v32, %v1846_v28 }
 0x212   : > { %v2287_v26 = vadd.f32 %v2255_v30, %v2220_v37 }
 0x213   : > { %v1980_v49 = vadd.f32 %v1948_v57, %v1913_v35 }
 0x214   : > { %v2354_v40 = vadd.f32 %v2322_v38, %v2287_v26 }
 0x215   : > { %v2087_v18 = vadd.f32 %v2055_v36, %v1980_v49 }
 0x216   : > { %2387 = vst [vmem:[%s4454_s29 + $0xf0] sm:$0xff] %v2354_v40  ;;  %v2404_v58 = vadd.f32 %v2403_v11, %v2354_v40  ;;  %v2389_v11 = vld [vmem:[#allocation4] sm:$0x1] }
 0x217   : > { %v2154_v8 = vadd.f32 %v2122_v52, %v2087_v18 }
 0x219   : > { %v2221_v12 = vadd.f32 %v2189_v45, %v2154_v8 }
 0x21b   : > { %v2288_v56 = vadd.f32 %v2256_v20, %v2221_v12 }
 0x21d   : > { %v2355_v7 = vadd.f32 %v2323_v41, %v2288_v56 }
 0x21f   : > { %2388 = vst [vmem:[%s4454_s29 + $0xf8] sm:$0xff] %v2355_v7  ;;  %v2419_v44 = vadd.f32 %v2418_v23, %v2355_v7 }
 0x221   : > { %v2420_v17 = vadd.f32 %v2419_v44, %v2404_v58 }
 0x223   : > { %v2421_v42 = vrot.slane %v2420_v17, 4 }
 0x225   : > { %v2422_v29 = vadd.f32 %v2421_v42, %v2420_v17 }
 0x227   : > { %v2423_v21 = vrot.slane %v2422_v29, 2 }
 0x229   : > { %v2424_v24 = vadd.f32 %v2423_v21, %v2422_v29 }
 0x22b   : > { %v2425_v61 = vrot.slane %v2424_v24, 1 }
 0x22d   : > { %v2426_v9 = vadd.f32 %v2425_v61, %v2424_v24 }
 0x22f   : > { %v2427_v47 = vadd.f32 %v2426_v9, %v2389_v11 }
 0x231   : > { %2428 = vst [vmem:[#allocation4] sm:$0x1] %v2427_v47 }
 0x232 PF: > { %p2988_p10 = scmp.ne.s32.totalorder %s3242_s16, 1 }
 0x233   : > { %v2470_v34 = vlaneseq (!%p2988_p10)  ;;  %s2989_s29 = sshll.u32 (!%p2988_p10), %s3238_s15, 8 }
 0x234   : > { %2432 = sbr.rel (%p2988_p10) target bundleno = 625 (0x271), region = 48  ;;  %s6298_s24 = scalar_lea.vmem (!%p2988_p10), [#allocation6], %s2989_s29 }
 0x235   : > { %v2471_v54 = vshrl.u32 (!%p2988_p10), %v2470_v34, 7  ;;  %v2437_v19 = vld [vmem:[%s6298_s24] sm:$0xff] (!%p2988_p10)  ;;  %v2438_v59 = vld [vmem:[%s6298_s24 + $0x8] sm:$0xff] (!%p2988_p10)  ;;  %v2439_v3 = vld [vmem:[%s6298_s24 + $0x10] sm:$0xff] (!%p2988_p10) }
 0x236   : > { %v2440_v53 = vld [vmem:[%s6298_s24 + $0x18] sm:$0xff] (!%p2988_p10)  ;;  %v2441_v6 = vld [vmem:[%s6298_s24 + $0x20] sm:$0xff] (!%p2988_p10)  ;;  %v2442_v16 = vld [vmem:[%s6298_s24 + $0x28] sm:$0xff] (!%p2988_p10) }
 0x237   : > { %v2472_v62 = vsub.s32 (!%p2988_p10), 0, %v2471_v54  ;;  %v2443_v60 = vld [vmem:[%s6298_s24 + $0x30] sm:$0xff] (!%p2988_p10)  ;;  %v2444_v10 = vld [vmem:[%s6298_s24 + $0x38] sm:$0xff] (!%p2988_p10)  ;;  %v2445_v4 = vld [vmem:[%s6298_s24 + $0x40] sm:$0xff] (!%p2988_p10) }
 0x238   : > { %v2433_v63 = vld [vmem:[#allocation4] sm:$0x1] (!%p2988_p10)  ;;  %v2446_v46 = vld [vmem:[%s6298_s24 + $0x48] sm:$0xff] (!%p2988_p10)  ;;  %v2447_v15 = vld [vmem:[%s6298_s24 + $0x50] sm:$0xff] (!%p2988_p10) }
 0x239   : > { %v2434_v2 = vmul.f32 (!%p2988_p10), 0.001953125, %v2433_v63  ;;  %v2448_v1 = vld [vmem:[%s6298_s24 + $0x58] sm:$0xff] (!%p2988_p10)  ;;  %v2449_v23 = vld [vmem:[%s6298_s24 + $0x60] sm:$0xff] (!%p2988_p10)  ;;  %v2450_v50 = vld [vmem:[%s6298_s24 + $0x68] sm:$0xff] (!%p2988_p10) }
 0x23a   : > { %v2451_v26 = vld [vmem:[%s6298_s24 + $0x70] sm:$0xff] (!%p2988_p10)  ;;  %v2452_v35 = vld [vmem:[%s6298_s24 + $0x78] sm:$0xff] (!%p2988_p10)  ;;  %v2453_v43 = vld [vmem:[%s6298_s24 + $0x80] sm:$0xff] (!%p2988_p10) }
 0x23b   : > { %v6301_v25 = vrot.slane %v2434_v2, %v2472_v62  ;;  %v2454_v8 = vld [vmem:[%s6298_s24 + $0x88] sm:$0xff]  ;;  %v2455_v44 = vld [vmem:[%s6298_s24 + $0x90] sm:$0xff]  ;;  %v2456_v17 = vld [vmem:[%s6298_s24 + $0x98] sm:$0xff] }
 0x23c   : > { %v2457_v9 = vld [vmem:[%s6298_s24 + $0xa0] sm:$0xff]  ;;  %v2458_v47 = vld [vmem:[%s6298_s24 + $0xa8] sm:$0xff] }
 0x23d   : > { %v2475_v13 = vsub.f32 %v2437_v19, %v6301_v25  ;;  %v2476_v22 = vsub.f32 %v2438_v59, %v6301_v25  ;;  %v2477_v39 = vsub.f32 %v2439_v3, %v6301_v25  ;;  %v2478_v51 = vsub.f32 %v2440_v53, %v6301_v25  ;;  %v2459_v59 = vld [vmem:[%s6298_s24 + $0xb0] sm:$0xff]  ;;  %v2460_v3 = vld [vmem:[%s6298_s24 + $0xb8] sm:$0xff] }
 0x23e   : > { %v2479_v14 = vsub.f32 %v2441_v6, %v6301_v25  ;;  %v2480_v27 = vsub.f32 %v2442_v16, %v6301_v25  ;;  %v2481_v33 = vsub.f32 %v2443_v60, %v6301_v25  ;;  %v2482_v55 = vsub.f32 %v2444_v10, %v6301_v25 }
 0x23f   : > { %v2508_v48 = vmul.f32 %v2475_v13, %v2475_v13  ;;  %v2509_v30 = vmul.f32 %v2476_v22, %v2476_v22  ;;  %v2510_v31 = vmul.f32 %v2477_v39, %v2477_v39  ;;  %v2511_v0 = vmul.f32 %v2478_v51, %v2478_v51  ;;  %v2461_v22 = vld [vmem:[%s6298_s24 + $0xc0] sm:$0xff]  ;;  %v2462_v39 = vld [vmem:[%s6298_s24 + $0xc8] sm:$0xff] }
 0x240   : > { %v2483_v5 = vsub.f32 %v2445_v4, %v6301_v25  ;;  %v2484_v32 = vsub.f32 %v2446_v46, %v6301_v25  ;;  %v2512_v37 = vmul.f32 %v2479_v14, %v2479_v14  ;;  %v2513_v38 = vmul.f32 %v2480_v27, %v2480_v27 }
 0x241   : > { %v2485_v28 = vsub.f32 %v2447_v15, %v6301_v25  ;;  %v2486_v57 = vsub.f32 %v2448_v1, %v6301_v25  ;;  %v2514_v40 = vmul.f32 %v2481_v33, %v2481_v33  ;;  %v2515_v49 = vmul.f32 %v2482_v55, %v2482_v55  ;;  %v2463_v55 = vld [vmem:[%s6298_s24 + $0xd0] sm:$0xff]  ;;  %v2464_v15 = vld [vmem:[%s6298_s24 + $0xd8] sm:$0xff] }
 0x242   : > { %v2540_v36 = vadd.f32 %v2510_v31, %v2508_v48  ;;  %v2555_v58 = vadd.f32 %v2511_v0, %v2509_v30  ;;  %v2487_v18 = vsub.f32 %v2449_v23, %v6301_v25  ;;  %v2488_v52 = vsub.f32 %v2450_v50, %v6301_v25  ;;  %v2465_v50 = vld [vmem:[%s6298_s24 + $0xe0] sm:$0xff] }
 0x243   : > { %v2516_v45 = vmul.f32 %v2483_v5, %v2483_v5  ;;  %v2517_v20 = vmul.f32 %v2484_v32, %v2484_v32  ;;  %v2489_v56 = vsub.f32 %v2451_v26, %v6301_v25  ;;  %v2490_v7 = vsub.f32 %v2452_v35, %v6301_v25  ;;  %v2466_v5 = vld [vmem:[%s6298_s24 + $0xe8] sm:$0xff]  ;;  %v2467_v35 = vld [vmem:[%s6298_s24 + $0xf0] sm:$0xff] }
 0x244   : > { %v2541_v12 = vadd.f32 %v2540_v36, %v2512_v37  ;;  %v2556_v41 = vadd.f32 %v2555_v58, %v2513_v38  ;;  %v2518_v42 = vmul.f32 %v2485_v28, %v2485_v28  ;;  %v2519_v29 = vmul.f32 %v2486_v57, %v2486_v57 }
 0x245   : > { %v2491_v61 = vsub.f32 %v2453_v43, %v6301_v25  ;;  %v2492_v11 = vsub.f32 %v2454_v8, %v6301_v25  ;;  %v2520_v34 = vmul.f32 %v2487_v18, %v2487_v18  ;;  %v2521_v54 = vmul.f32 %v2488_v52, %v2488_v52 }
 0x246   : > { %v2542_v21 = vadd.f32 %v2541_v12, %v2514_v40  ;;  %v2557_v24 = vadd.f32 %v2556_v41, %v2515_v49  ;;  %v2493_v62 = vsub.f32 %v2455_v44, %v6301_v25  ;;  %v2494_v19 = vsub.f32 %v2456_v17, %v6301_v25  ;;  %v2468_v40 = vld [vmem:[%s6298_s24 + $0xf8] sm:$0xff] }
 0x247   : > { %v2522_v53 = vmul.f32 %v2489_v56, %v2489_v56  ;;  %v2523_v6 = vmul.f32 %v2490_v7, %v2490_v7  ;;  %v2495_v10 = vsub.f32 %v2457_v9, %v6301_v25  ;;  %v2496_v13 = vsub.f32 %v2458_v47, %v6301_v25 }
 0x248   : > { %v2543_v63 = vadd.f32 %v2542_v21, %v2516_v45  ;;  %v2558_v2 = vadd.f32 %v2557_v24, %v2517_v20  ;;  %v2524_v51 = vmul.f32 %v2491_v61, %v2491_v61  ;;  %v2525_v14 = vmul.f32 %v2492_v11, %v2492_v11 }
 0x249   : > { %v2497_v46 = vsub.f32 %v2459_v59, %v6301_v25  ;;  %v2498_v33 = vsub.f32 %v2460_v3, %v6301_v25  ;;  %v2526_v1 = vmul.f32 %v2493_v62, %v2493_v62  ;;  %v2527_v48 = vmul.f32 %v2494_v19, %v2494_v19 }
 0x24a   : > { %v2544_v16 = vadd.f32 %v2543_v63, %v2518_v42  ;;  %v2559_v60 = vadd.f32 %v2558_v2, %v2519_v29  ;;  %v2499_v0 = vsub.f32 %v2461_v22, %v6301_v25  ;;  %v2500_v23 = vsub.f32 %v2462_v39, %v6301_v25 }
 0x24b   : > { %v2528_v32 = vmul.f32 %v2495_v10, %v2495_v10  ;;  %v2529_v37 = vmul.f32 %v2496_v13, %v2496_v13  ;;  %v2501_v57 = vsub.f32 %v2463_v55, %v6301_v25  ;;  %v2502_v26 = vsub.f32 %v2464_v15, %v6301_v25 }
 0x24c   : > { %v2545_v27 = vadd.f32 %v2544_v16, %v2520_v34  ;;  %v2560_v4 = vadd.f32 %v2559_v60, %v2521_v54  ;;  %v2530_v49 = vmul.f32 %v2497_v46, %v2497_v46  ;;  %v2531_v36 = vmul.f32 %v2498_v33, %v2498_v33  ;;  %v2507_v16 = vld [vmem:[#allocation5] sm:$0x1] }
 0x24d   : > { %v2503_v52 = vsub.f32 %v2465_v50, %v6301_v25  ;;  %v2504_v43 = vsub.f32 %v2466_v5, %v6301_v25  ;;  %v2532_v8 = vmul.f32 %v2499_v0, %v2499_v0  ;;  %v2533_v45 = vmul.f32 %v2500_v23, %v2500_v23 }
 0x24e   : > { %v2546_v30 = vadd.f32 %v2545_v27, %v2522_v53  ;;  %v2561_v31 = vadd.f32 %v2560_v4, %v2523_v6  ;;  %v2505_v41 = vsub.f32 %v2467_v35, %v6301_v25  ;;  %v2506_v56 = vsub.f32 %v2468_v40, %v6301_v25 }
 0x24f   : > { %v2534_v7 = vmul.f32 %v2501_v57, %v2501_v57  ;;  %v2535_v44 = vmul.f32 %v2502_v26, %v2502_v26  ;;  %v2536_v29 = vmul.f32 %v2503_v52, %v2503_v52  ;;  %v2537_v21 = vmul.f32 %v2504_v43, %v2504_v43 }
 0x250   : > { %v2547_v38 = vadd.f32 %v2546_v30, %v2524_v51  ;;  %v2562_v28 = vadd.f32 %v2561_v31, %v2525_v14  ;;  %v2538_v11 = vmul.f32 %v2505_v41, %v2505_v41  ;;  %v2539_v9 = vmul.f32 %v2506_v56, %v2506_v56 }
 0x252   : > { %v2548_v58 = vadd.f32 %v2547_v38, %v2526_v1  ;;  %v2563_v18 = vadd.f32 %v2562_v28, %v2527_v48 }
 0x254   : > { %v2549_v20 = vadd.f32 %v2548_v58, %v2528_v32  ;;  %v2564_v12 = vadd.f32 %v2563_v18, %v2529_v37 }
 0x256   : > { %v2550_v17 = vadd.f32 %v2549_v20, %v2530_v49  ;;  %v2565_v42 = vadd.f32 %v2564_v12, %v2531_v36 }
 0x258   : > { %v2551_v24 = vadd.f32 %v2550_v17, %v2532_v8  ;;  %v2566_v61 = vadd.f32 %v2565_v42, %v2533_v45 }
 0x25a   : > { %v2552_v47 = vadd.f32 %v2551_v24, %v2534_v7  ;;  %v2567_v34 = vadd.f32 %v2566_v61, %v2535_v44 }
 0x25c   : > { %v2553_v54 = vadd.f32 %v2552_v47, %v2536_v29  ;;  %v2568_v63 = vadd.f32 %v2567_v34, %v2537_v21 }
 0x25e   : > { %v2554_v2 = vadd.f32 %v2553_v54, %v2538_v11  ;;  %v2569_v62 = vadd.f32 %v2568_v63, %v2539_v9 }
 0x260   : > { %v2570_v19 = vadd.f32 %v2569_v62, %v2554_v2 }
 0x262   : > { %v2571_v59 = vrot.slane %v2570_v19, 4 }
 0x264   : > { %v2572_v3 = vadd.f32 %v2571_v59, %v2570_v19 }
 0x266   : > { %v2573_v25 = vrot.slane %v2572_v3, 2 }
 0x268   : > { %v2574_v53 = vadd.f32 %v2573_v25, %v2572_v3 }
 0x26a   : > { %v2575_v6 = vrot.slane %v2574_v53, 1 }
 0x26c   : > { %v2576_v60 = vadd.f32 %v2575_v6, %v2574_v53 }
 0x26e   : > { %v2577_v10 = vadd.f32 %v2576_v60, %v2507_v16 }
 0x270   : > { %2578 = vst [vmem:[#allocation5] sm:$0x1] %v2577_v10 }
 0x271 PF: > { %p2990_p11 = scmp.ne.s32.totalorder %s3242_s16, 2 }
 0x272   : > { %v2662_v51 = vlaneseq (!%p2990_p11)  ;;  %s2991_s25 = sshll.u32 (!%p2990_p11), %s3238_s15, 8  ;;  %v2583_v27 = vld [vmem:[#allocation4] sm:$0x1] (!%p2990_p11) }
 0x273   : > { %2582 = sbr.rel (%p2990_p11) target bundleno = 682 (0x2aa), region = 52  ;;  %v2587_v4 = vld [vmem:[%s6591_s2] sm:$0x1] (!%p2990_p11)  ;;  %v2584_v46 = vmul.f32 (!%p2990_p11), 0.001953125, %v2583_v27  ;;  %s6376_s5 = scalar_lea.vmem (!%p2990_p11), [#allocation6], %s2991_s25 }
 0x274   : > { %v2663_v14 = vshrl.u32 (!%p2990_p11), %v2662_v51, 7  ;;  %v2591_v1 = vld [vmem:[%s6592_s3] sm:$0x1] (!%p2990_p11)  ;;  %v2597_v30 = vld [vmem:[%s6376_s5 + $0x8] sm:$0xff] (!%p2990_p11)  ;;  %v2598_v31 = vld [vmem:[%s6376_s5 + $0x10] sm:$0xff] (!%p2990_p11)  ;;  %s6403_s6 = scalar_lea.vmem (!%p2990_p11), [#allocation3], %s2991_s25 }
 0x275   : > { %v2596_v48 = vld [vmem:[%s6376_s5] sm:$0xff] (!%p2990_p11)  ;;  %v2599_v0 = vld [vmem:[%s6376_s5 + $0x18] sm:$0xff] (!%p2990_p11)  ;;  %v2601_v32 = vld [vmem:[%s6376_s5 + $0x28] sm:$0xff] (!%p2990_p11) }
 0x276   : > { %v2664_v33 = vsub.s32 (!%p2990_p11), 0, %v2663_v14  ;;  %v2600_v23 = vld [vmem:[%s6376_s5 + $0x20] sm:$0xff] (!%p2990_p11)  ;;  %v2602_v37 = vld [vmem:[%s6376_s5 + $0x30] sm:$0xff] (!%p2990_p11)  ;;  %v2603_v38 = vld [vmem:[%s6376_s5 + $0x38] sm:$0xff] (!%p2990_p11) }
 0x277   : > { %v2585_v13 = vld [vmem:[#allocation5] sm:$0x1] (!%p2990_p11)  ;;  %v2605_v57 = vld [vmem:[%s6376_s5 + $0x48] sm:$0xff] (!%p2990_p11)  ;;  %v2606_v26 = vld [vmem:[%s6376_s5 + $0x50] sm:$0xff] (!%p2990_p11) }
 0x278   : > { %v2586_v22 = vmul.f32 (!%p2990_p11), 0.001953125, %v2585_v13  ;;  %v2604_v28 = vld [vmem:[%s6376_s5 + $0x40] sm:$0xff] (!%p2990_p11)  ;;  %v2607_v58 = vld [vmem:[%s6376_s5 + $0x58] sm:$0xff] (!%p2990_p11)  ;;  %v2609_v52 = vld [vmem:[%s6376_s5 + $0x68] sm:$0xff] (!%p2990_p11) }
 0x279   : > { %v2608_v18 = vld [vmem:[%s6376_s5 + $0x60] sm:$0xff] (!%p2990_p11)  ;;  %v2630_v56 = vld [vmem:[%s6403_s6 + $0x8] sm:$0xff] (!%p2990_p11)  ;;  %v2631_v42 = vld [vmem:[%s6403_s6 + $0x10] sm:$0xff] (!%p2990_p11) }
 0x27a   : > { %v2588_v39 = vadd.f32 1e-05, %v2586_v22  ;;  %v2629_v12 = vld [vmem:[%s6403_s6] sm:$0xff]  ;;  %v2632_v29 = vld [vmem:[%s6403_s6 + $0x18] sm:$0xff]  ;;  %v2634_v2 = vld [vmem:[%s6403_s6 + $0x28] sm:$0xff] }
 0x27b   : > { %v2633_v21 = vld [vmem:[%s6403_s6 + $0x20] sm:$0xff]  ;;  %v2635_v62 = vld [vmem:[%s6403_s6 + $0x30] sm:$0xff]  ;;  %v2636_v19 = vld [vmem:[%s6403_s6 + $0x38] sm:$0xff] }
 0x27c   : > { %3184 = vrsqrt.f32 %v2588_v39  ;;  %v2637_v6 = vld [vmem:[%s6403_s6 + $0x40] sm:$0xff]  ;;  %v2638_v22 = vld [vmem:[%s6403_s6 + $0x48] sm:$0xff]  ;;  %v2610_v39 = vld [vmem:[%s6376_s5 + $0x70] sm:$0xff] }
 0x27d   : > { %v2611_v51 = vld [vmem:[%s6376_s5 + $0x78] sm:$0xff] }
 0x286   : > { %v3185_v55 = vpop.eup %3184 }
 0x287   : > { %v2590_v15 = vmul.f32 %v3185_v55, %v2587_v4  ;;  %v2640_v55 = vld [vmem:[%s6403_s6 + $0x58] sm:$0xff] }
 0x289   : > { %v2592_v50 = vmul.f32 %v2590_v15, %v2584_v46  ;;  %v6383_v5 = vrot.slane %v2590_v15, %v2664_v33  ;;  %v2641_v15 = vld [vmem:[%s6403_s6 + $0x60] sm:$0xff] }
 0x28b   : > { %v2593_v35 = vsub.f32 %v2591_v1, %v2592_v50  ;;  %v2667_v40 = vmul.f32 %v6383_v5, %v2596_v48  ;;  %v2668_v49 = vmul.f32 %v6383_v5, %v2597_v30  ;;  %v2669_v36 = vmul.f32 %v6383_v5, %v2598_v31  ;;  %v2612_v50 = vld [vmem:[%s6376_s5 + $0x80] sm:$0xff] }
 0x28c   : > { %v2670_v43 = vmul.f32 %v6383_v5, %v2599_v0  ;;  %v2671_v8 = vmul.f32 %v6383_v5, %v2600_v23  ;;  %v2672_v45 = vmul.f32 %v6383_v5, %v2601_v32  ;;  %v2673_v20 = vmul.f32 %v6383_v5, %v2602_v37  ;;  %v2642_v0 = vld [vmem:[%s6403_s6 + $0x68] sm:$0xff]  ;;  %v2643_v23 = vld [vmem:[%s6403_s6 + $0x70] sm:$0xff] }
 0x28d   : > { %v6406_v41 = vrot.slane %v2593_v35, %v2664_v33  ;;  %v2674_v7 = vmul.f32 %v6383_v5, %v2603_v38  ;;  %v2675_v44 = vmul.f32 %v6383_v5, %v2604_v28  ;;  %v2676_v17 = vmul.f32 %v6383_v5, %v2605_v57  ;;  %v2639_v33 = vld [vmem:[%s6403_s6 + $0x50] sm:$0xff]  ;;  %v2613_v57 = vld [vmem:[%s6376_s5 + $0x88] sm:$0xff]  ;;  %v2615_v35 = vld [vmem:[%s6376_s5 + $0x98] sm:$0xff] }
 0x28e   : > { %v2677_v24 = vmul.f32 %v6383_v5, %v2606_v26  ;;  %v2678_v61 = vmul.f32 %v6383_v5, %v2607_v58  ;;  %v2679_v11 = vmul.f32 %v6383_v5, %v2608_v18  ;;  %v2680_v9 = vmul.f32 %v6383_v5, %v2609_v52  ;;  %v2614_v26 = vld [vmem:[%s6376_s5 + $0x90] sm:$0xff]  ;;  %v2644_v18 = vld [vmem:[%s6403_s6 + $0x78] sm:$0xff]  ;;  %v2616_v52 = vld [vmem:[%s6376_s5 + $0xa0] sm:$0xff] }
 0x28f   : > { %v2705_v47 = vadd.f32 %v6406_v41, %v2667_v40  ;;  %v2706_v34 = vadd.f32 %v6406_v41, %v2668_v49  ;;  %v2707_v54 = vadd.f32 %v6406_v41, %v2669_v36  ;;  %v2708_v63 = vadd.f32 %v6406_v41, %v2670_v43  ;;  %v2617_v43 = vld [vmem:[%s6376_s5 + $0xa8] sm:$0xff] }
 0x290   : > { %v2709_v59 = vadd.f32 %v6406_v41, %v2671_v8  ;;  %v2710_v3 = vadd.f32 %v6406_v41, %v2672_v45  ;;  %v2711_v25 = vadd.f32 %v6406_v41, %v2673_v20  ;;  %v2712_v53 = vadd.f32 %v6406_v41, %v2674_v7 }
 0x291   : > { %v2737_v16 = vmax.f32 %v2629_v12, %v2705_v47  ;;  %v2738_v60 = vmax.f32 %v2630_v56, %v2706_v34  ;;  %v2739_v10 = vmax.f32 %v2631_v42, %v2707_v54  ;;  %v2740_v13 = vmax.f32 %v2632_v29, %v2708_v63  ;;  %v2645_v56 = vld [vmem:[%s6403_s6 + $0x80] sm:$0xff]  ;;  %v2648_v47 = vld [vmem:[%s6403_s6 + $0x98] sm:$0xff] }
 0x292   : > { %v2741_v14 = vmax.f32 %v2633_v21, %v2709_v59  ;;  %v2742_v27 = vmax.f32 %v2634_v2, %v2710_v3  ;;  %v2743_v4 = vmax.f32 %v2635_v62, %v2711_v25  ;;  %v2744_v46 = vmax.f32 %v2636_v19, %v2712_v53  ;;  %v2618_v21 = vld [vmem:[%s6376_s5 + $0xb0] sm:$0xff]  ;;  %v2649_v34 = vld [vmem:[%s6403_s6 + $0xa0] sm:$0xff]  ;;  %v2650_v3 = vld [vmem:[%s6403_s6 + $0xa8] sm:$0xff] }
 0x293   : > { %2769 = vst [vmem:[%s6376_s5] sm:$0xff] %v2737_v16  ;;  %2770 = vst [vmem:[%s6376_s5 + $0x8] sm:$0xff] %v2738_v60  ;;  %v2713_v1 = vadd.f32 %v6406_v41, %v2675_v44  ;;  %v2714_v48 = vadd.f32 %v6406_v41, %v2676_v17  ;;  %v2715_v30 = vadd.f32 %v6406_v41, %v2677_v24  ;;  %v2646_v44 = vld [vmem:[%s6403_s6 + $0x88] sm:$0xff]  ;;  %v2619_v24 = vld [vmem:[%s6376_s5 + $0xb8] sm:$0xff] }
 0x294   : > { %2771 = vst [vmem:[%s6376_s5 + $0x10] sm:$0xff] %v2739_v10  ;;  %2772 = vst [vmem:[%s6376_s5 + $0x18] sm:$0xff] %v2740_v13  ;;  %v2716_v31 = vadd.f32 %v6406_v41, %v2678_v61  ;;  %v2717_v32 = vadd.f32 %v6406_v41, %v2679_v11  ;;  %v2718_v37 = vadd.f32 %v6406_v41, %v2680_v9  ;;  %v2647_v9 = vld [vmem:[%s6403_s6 + $0x90] sm:$0xff]  ;;  %v2620_v53 = vld [vmem:[%s6376_s5 + $0xc0] sm:$0xff] }
 0x295   : > { %2773 = vst [vmem:[%s6376_s5 + $0x20] sm:$0xff] %v2741_v14  ;;  %2774 = vst [vmem:[%s6376_s5 + $0x28] sm:$0xff] %v2742_v27  ;;  %v2681_v38 = vmul.f32 %v6383_v5, %v2610_v39  ;;  %v2682_v28 = vmul.f32 %v6383_v5, %v2611_v51  ;;  %v2745_v40 = vmax.f32 %v2637_v6, %v2713_v1  ;;  %v2651_v25 = vld [vmem:[%s6403_s6 + $0xb0] sm:$0xff]  ;;  %v2621_v13 = vld [vmem:[%s6376_s5 + $0xc8] sm:$0xff] }
 0x296   : > { %2775 = vst [vmem:[%s6376_s5 + $0x30] sm:$0xff] %v2743_v4  ;;  %2776 = vst [vmem:[%s6376_s5 + $0x38] sm:$0xff] %v2744_v46  ;;  %v2746_v49 = vmax.f32 %v2638_v22, %v2714_v48  ;;  %v2747_v36 = vmax.f32 %v2639_v33, %v2715_v30  ;;  %v2748_v58 = vmax.f32 %v2640_v55, %v2716_v31  ;;  %v2622_v22 = vld [vmem:[%s6376_s5 + $0xd0] sm:$0xff]  ;;  %v2623_v39 = vld [vmem:[%s6376_s5 + $0xd8] sm:$0xff] }
 0x297   : > { %v2749_v8 = vmax.f32 %v2641_v15, %v2717_v32  ;;  %v2750_v45 = vmax.f32 %v2642_v0, %v2718_v37  ;;  %v2719_v20 = vadd.f32 %v6406_v41, %v2681_v38  ;;  %v2720_v12 = vadd.f32 %v6406_v41, %v2682_v28  ;;  %2777 = vst [vmem:[%s6376_s5 + $0x40] sm:$0xff] %v2745_v40  ;;  %v2652_v46 = vld [vmem:[%s6403_s6 + $0xb8] sm:$0xff]  ;;  %v2624_v33 = vld [vmem:[%s6376_s5 + $0xe0] sm:$0xff]  ;;  %v2625_v55 = vld [vmem:[%s6376_s5 + $0xe8] sm:$0xff] }
 0x298   : > { %2778 = vst [vmem:[%s6376_s5 + $0x48] sm:$0xff] %v2746_v49  ;;  %2779 = vst [vmem:[%s6376_s5 + $0x50] sm:$0xff] %v2747_v36  ;;  %v2683_v7 = vmul.f32 %v6383_v5, %v2612_v50  ;;  %v2684_v17 = vmul.f32 %v6383_v5, %v2613_v57  ;;  %v2685_v42 = vmul.f32 %v6383_v5, %v2614_v26  ;;  %v2653_v31 = vld [vmem:[%s6403_s6 + $0xc0] sm:$0xff]  ;;  %v2626_v37 = vld [vmem:[%s6376_s5 + $0xf0] sm:$0xff] }
 0x299   : > { %2780 = vst [vmem:[%s6376_s5 + $0x58] sm:$0xff] %v2748_v58  ;;  %v2686_v29 = vmul.f32 %v6383_v5, %v2615_v35  ;;  %2781 = vst [vmem:[%s6376_s5 + $0x60] sm:$0xff] %v2749_v8  ;;  %v2751_v61 = vmax.f32 %v2643_v23, %v2719_v20  ;;  %v2752_v11 = vmax.f32 %v2644_v18, %v2720_v12  ;;  %v2627_v38 = vld [vmem:[%s6376_s5 + $0xf8] sm:$0xff]  ;;  %v2654_v26 = vld [vmem:[%s6403_s6 + $0xc8] sm:$0xff] }
 0x29a   : > { %2782 = vst [vmem:[%s6376_s5 + $0x68] sm:$0xff] %v2750_v45  ;;  %v2687_v54 = vmul.f32 %v6383_v5, %v2616_v52  ;;  %v2688_v63 = vmul.f32 %v6383_v5, %v2617_v43  ;;  %v2721_v2 = vadd.f32 %v6406_v41, %v2683_v7  ;;  %v2722_v62 = vadd.f32 %v6406_v41, %v2684_v17  ;;  %v2655_v35 = vld [vmem:[%s6403_s6 + $0xd0] sm:$0xff]  ;;  %v2656_v40 = vld [vmem:[%s6403_s6 + $0xd8] sm:$0xff]  ;;  %v2657_v8 = vld [vmem:[%s6403_s6 + $0xe0] sm:$0xff] }
 0x29b   : > { %v2723_v19 = vadd.f32 %v6406_v41, %v2685_v42  ;;  %v2724_v59 = vadd.f32 %v6406_v41, %v2686_v29  ;;  %2783 = vst [vmem:[%s6376_s5 + $0x70] sm:$0xff] %v2751_v61  ;;  %2784 = vst [vmem:[%s6376_s5 + $0x78] sm:$0xff] %v2752_v11  ;;  %v2689_v60 = vmul.f32 %v6383_v5, %v2618_v21  ;;  %v2658_v45 = vld [vmem:[%s6403_s6 + $0xe8] sm:$0xff]  ;;  %v2659_v21 = vld [vmem:[%s6403_s6 + $0xf0] sm:$0xff] }
 0x29c   : > { %v2725_v6 = vadd.f32 %v6406_v41, %v2687_v54  ;;  %v2726_v16 = vadd.f32 %v6406_v41, %v2688_v63  ;;  %v2690_v10 = vmul.f32 %v6383_v5, %v2619_v24  ;;  %v2753_v51 = vmax.f32 %v2645_v56, %v2721_v2  ;;  %v2660_v24 = vld [vmem:[%s6403_s6 + $0xf8] sm:$0xff] }
 0x29d   : > { %v2754_v14 = vmax.f32 %v2646_v44, %v2722_v62  ;;  %v2755_v27 = vmax.f32 %v2647_v9, %v2723_v19  ;;  %v2756_v4 = vmax.f32 %v2648_v47, %v2724_v59  ;;  %v2727_v48 = vadd.f32 %v6406_v41, %v2689_v60 }
 0x29e   : > { %v2757_v15 = vmax.f32 %v2649_v34, %v2725_v6  ;;  %v2758_v1 = vmax.f32 %v2650_v3, %v2726_v16  ;;  %v2728_v30 = vadd.f32 %v6406_v41, %v2690_v10  ;;  %2785 = vst [vmem:[%s6376_s5 + $0x80] sm:$0xff] %v2753_v51  ;;  %v2691_v0 = vmul.f32 %v6383_v5, %v2620_v53 }
 0x29f   : > { %2786 = vst [vmem:[%s6376_s5 + $0x88] sm:$0xff] %v2754_v14  ;;  %2787 = vst [vmem:[%s6376_s5 + $0x90] sm:$0xff] %v2755_v27  ;;  %v2692_v23 = vmul.f32 %v6383_v5, %v2621_v13  ;;  %v2693_v50 = vmul.f32 %v6383_v5, %v2622_v22  ;;  %v2694_v32 = vmul.f32 %v6383_v5, %v2623_v39 }
 0x2a0   : > { %2788 = vst [vmem:[%s6376_s5 + $0x98] sm:$0xff] %v2756_v4  ;;  %2789 = vst [vmem:[%s6376_s5 + $0xa0] sm:$0xff] %v2757_v15  ;;  %v2759_v28 = vmax.f32 %v2651_v25, %v2727_v48  ;;  %v2760_v57 = vmax.f32 %v2652_v46, %v2728_v30  ;;  %v2695_v49 = vmul.f32 %v6383_v5, %v2624_v33 }
 0x2a1   : > { %2790 = vst [vmem:[%s6376_s5 + $0xa8] sm:$0xff] %v2758_v1  ;;  %v2696_v36 = vmul.f32 %v6383_v5, %v2625_v55  ;;  %v2729_v58 = vadd.f32 %v6406_v41, %v2691_v0  ;;  %v2730_v18 = vadd.f32 %v6406_v41, %v2692_v23  ;;  %v2731_v52 = vadd.f32 %v6406_v41, %v2693_v50 }
 0x2a2   : > { %v2732_v43 = vadd.f32 %v6406_v41, %v2694_v32  ;;  %2791 = vst [vmem:[%s6376_s5 + $0xb0] sm:$0xff] %v2759_v28  ;;  %2792 = vst [vmem:[%s6376_s5 + $0xb8] sm:$0xff] %v2760_v57  ;;  %v2733_v20 = vadd.f32 %v6406_v41, %v2695_v49  ;;  %v2697_v56 = vmul.f32 %v6383_v5, %v2626_v37 }
 0x2a3   : > { %v2734_v12 = vadd.f32 %v6406_v41, %v2696_v36  ;;  %v2698_v7 = vmul.f32 %v6383_v5, %v2627_v38  ;;  %v2761_v44 = vmax.f32 %v2653_v31, %v2729_v58  ;;  %v2762_v17 = vmax.f32 %v2654_v26, %v2730_v18 }
 0x2a4   : > { %v2763_v42 = vmax.f32 %v2655_v35, %v2731_v52  ;;  %v2764_v29 = vmax.f32 %v2656_v40, %v2732_v43  ;;  %v2765_v61 = vmax.f32 %v2657_v8, %v2733_v20  ;;  %v2735_v9 = vadd.f32 %v6406_v41, %v2697_v56 }
 0x2a5   : > { %v2766_v11 = vmax.f32 %v2658_v45, %v2734_v12  ;;  %v2736_v47 = vadd.f32 %v6406_v41, %v2698_v7  ;;  %2793 = vst [vmem:[%s6376_s5 + $0xc0] sm:$0xff] %v2761_v44  ;;  %2794 = vst [vmem:[%s6376_s5 + $0xc8] sm:$0xff] %v2762_v17 }
 0x2a6   : > { %2795 = vst [vmem:[%s6376_s5 + $0xd0] sm:$0xff] %v2763_v42  ;;  %2796 = vst [vmem:[%s6376_s5 + $0xd8] sm:$0xff] %v2764_v29  ;;  %v2767_v5 = vmax.f32 %v2659_v21, %v2735_v9 }
 0x2a7   : > { %2797 = vst [vmem:[%s6376_s5 + $0xe0] sm:$0xff] %v2765_v61  ;;  %2798 = vst [vmem:[%s6376_s5 + $0xe8] sm:$0xff] %v2766_v11  ;;  %v2768_v34 = vmax.f32 %v2660_v24, %v2736_v47 }
 0x2a8   : > { %2799 = vst [vmem:[%s6376_s5 + $0xf0] sm:$0xff] %v2767_v5 }
 0x2a9   : > { %2800 = vst [vmem:[%s6376_s5 + $0xf8] sm:$0xff] %v2768_v34 }
 0x2aa PF: > { %p6548_p12 = scmp.eq.s32.totalorder %s2923_s20, 5  ;;  %s3257_s7 = smov [#allocation6]  }
 0x2ab   : > { %s2809_s8 = sshll.u32 %s3257_s7, 4  ;;  %s2810_s8 = int_to_ptr.vmem [resolvable:$true] %s2809_s8 }
 0x2ac   : > { %s3186_s9 = scalar_lea.vmem %s2810_s8, 8192  ;;  %p3193_p2 = scmp.lt.s32.totalorder %s2810_s8, %s2810_s8 }
 0x2ad   : > { %p3187_p13 = scmp.ne.s32.totalorder %s2810_s8, %s3186_s9  ;;  %p3194_p3 = scmp.lt.s32.totalorder %s3186_s9, %s3186_s9 }
 0x2af   : > { %p3188_p0 = pnand %p3187_p13, %p6548_p12  ;;  %p3195_p4 = por %p3194_p3, %p3193_p2 }
 0x2b1   : > { %p3189_p1 = pneg %p3188_p0 }
 0x2b3   : > { %p3196_p5 = pnand %p3195_p4, %p3189_p1 }
 0x2b5   : > { %3199 = shalt.err (!%p3196_p5)
}
 0x2b6   : > { %s3200_s20 = scalar_lea.hbm %s6593_s4, 8192 }
 0x2b7   : > { %p3201_p6 = scmp.ne.s32.totalorder %s6593_s4, %s3200_s20  ;;  %p3206_p9 = scmp.lt.u32.totalorder %s3200_s20, %s6593_s4 }
 0x2b9   : > { %p3202_p7 = pnand %p3201_p6, %p6548_p12 }
 0x2bb   : > { %p3203_p8 = pneg %p3202_p7 }
 0x2bd   : > { %p3208_p10 = pnand %p3206_p9, %p3203_p8 }
 0x2bf   : > { %3211 = shalt.err (!%p3208_p10)
}
 0x2c0   : > { %s3258_s23 = smov 128   ;;  %s3259_s29 = smov 8  }
 0x2c1   : > { %2998 = dma.vmem_to_hbm [thread:$0]  (%p6548_p12), %s2810_s8, 8192, %s6593_s4, [#allocation7], %s3258_s23, %s3258_s23, %s3259_s29  }
 0x2c2   : > { %3233 = dma.done.wait (%p6548_p12), [#allocation7], 8192  }
 0x2c3   : > { %3235 = vsyncadd (%p6548_p12), [#allocation7], 4294959104 }
 0x2c4 PF: > { %s15_s19 = sadd.s32 1, %s3254_s19   ;;  %s7577_s15 = smov %s3246_s17 }
 0x2c5   : > { %p12_p11 = scmp.ge.s32.totalorder %s15_s19, 8   ;;  %s7578_s16 = smov %s3250_s18 }
 0x2c6   : > { %s7579_s17 = smov %s7582_s21  ;;  %s7580_s18 = smov %s7586_s22 }
 0x2c7   :  { %14 = sbr.rel (!%p12_p11) target bundleno = 3 (0x3), region = 119 }
 0x2ce   :  { %2825 = vsyncpa [#allocation7], 1 }
 0x2cf   :  { %2827 = vsyncpa [#allocation7 + $0x1], 1 }

</bundles_post_ra>
